<compile_context>
chip_gen: v7x
topology: tpu7x:2x2x1
jax: 0.10.0
libtpu: 0.0.40
codegen_flags: <defaults>
</compile_context>

<pallas_src>
import functools

import jax
import jax.numpy as jnp
from jax import lax
from jax.experimental import pallas as pl
from jax.experimental.pallas import tpu as pltpu


def _spatial_attention_kernel(w_ref, x_ref, o_ref, am_ref, yflat_ref,
                              *, C, H, W, k, pad):
    """One batch element, lane-dense (C, H*W) layout.

    w_ref:     (2*k*k,)     f32   SMEM  conv weights flattened (in_ch, ky, kx)
    x_ref:     (1, C, H*W)  model VMEM  input block (read once from HBM)
    o_ref:     (1, C, H*W)  model VMEM  output block (aliases x in HBM)
    am_ref:    (2, Hp, Wp)  f32   VMEM  scratch: zero-padded [avg, max] maps
    yflat_ref: (1, H*W)     f32   VMEM  scratch: flattened attention map
    """
    x = x_ref[0].astype(jnp.float32)                       # (C, H*W) f32 compute

    # ---- channel pooling, vectorised over C (VPU elementwise + reduce) ----
    avg = jnp.sum(x, axis=0, keepdims=True) * (1.0 / C)    # (1, H*W)
    mx = jnp.max(x, axis=0, keepdims=True)                 # (1, H*W)

    # ---- build the zero-padded 2-D pooled maps for the conv ---------------
    # Zeroing the whole (tiny) scratch each step provides the conv's zero
    # padding; the interior is overwritten below.  (Zeroing every step keeps
    # this correct under megacore grid sharding.)
    am_ref[...] = jnp.zeros_like(am_ref)
    for h in range(H):                                     # H small static loop
        lo = h * W
        am_ref[0, pl.ds(pad + h, 1), pl.ds(pad, W)] = avg[:, lo:lo + W]
        am_ref[1, pl.ds(pad + h, 1), pl.ds(pad, W)] = mx[:, lo:lo + W]

    # ---- 2-in / 1-out k x k conv, fully unrolled taps (tiny vs. HBM cost) --
    acc = jnp.zeros((H, W), jnp.float32)
    for c in range(2):                                     # 0 = avg map, 1 = max map
        for dy in range(k):
            for dx in range(k):
                w = w_ref[c * k * k + dy * k + dx]         # scalar from SMEM
                acc = acc + w * am_ref[c, pl.ds(dy, H), pl.ds(dx, W)]

    y = jax.nn.sigmoid(acc)                                # (H, W), EUP

    # ---- flatten y to the lane-dense layout via static ref-window stores ---
    for h in range(H):
        yflat_ref[:, pl.ds(h * W, W)] = y[h:h + 1, :]

    # ---- out = x * y (broadcast over channels), single dense block store ---
    o_ref[0] = (x * yflat_ref[...]).astype(o_ref.dtype)


def spatial_attention_forward(x, conv_weight):
    """x: (B, C, H, W) any float dtype; conv_weight: (1, 2, k, k) (no bias)."""
    B, C, H, W = x.shape
    k = conv_weight.shape[-1]
    pad = (k - 1) // 2
    Hp, Wp = H + 2 * pad, W + 2 * pad
    N = H * W

    # Lane-dense view of the bulk traffic; free for contiguous NCHW.
    x_flat = x.reshape(B, C, N)
    w_flat = conv_weight.astype(jnp.float32).reshape(-1)   # (2*k*k,)

    kernel = functools.partial(_spatial_attention_kernel,
                               C=C, H=H, W=W, k=k, pad=pad)

    # VMEM budget: double-buffered in + out blocks plus the tiny scratch.
    block_bytes = C * N * x.dtype.itemsize
    scratch_bytes = (2 * Hp * Wp + N) * 4
    vmem_limit = min(100 * 1024 * 1024,
                     max(32 * 1024 * 1024,
                         int(2 * 2 * block_bytes * 1.5) + scratch_bytes))

    out_flat = pl.pallas_call(
        kernel,
        out_shape=jax.ShapeDtypeStruct((B, C, N), x.dtype),
        grid_spec=pltpu.PrefetchScalarGridSpec(
            num_scalar_prefetch=0,
            grid=(B,),
            in_specs=[
                # grid-invariant conv weights, resident in SMEM
                pl.BlockSpec(memory_space=pltpu.MemorySpace.SMEM),
                # one full image per step, lane-dense last dim (= full array dims)
                pl.BlockSpec((1, C, N), lambda b: (b, 0, 0)),
            ],
            out_specs=pl.BlockSpec((1, C, N), lambda b: (b, 0, 0)),
            scratch_shapes=[
                pltpu.VMEM((2, Hp, Wp), jnp.float32),   # padded pooled maps
                pltpu.VMEM((1, N), jnp.float32),        # flattened attention map
            ],
        ),
        # out reuses x's HBM buffer (effective when x is donated at jit level)
        input_output_aliases={1: 0},
        compiler_params=pltpu.CompilerParams(
            dimension_semantics=("parallel",),          # independent per batch
            vmem_limit_bytes=vmem_limit),
    )(w_flat, x_flat)
    return out_flat.reshape(B, C, H, W)


# x (arg 0) is donated so the in-place alias declared in pallas_call is honored.
spatial_attention = jax.jit(spatial_attention_forward, donate_argnums=(0,))


def _reference(x, conv_weight):
    """Pure-JAX reference matching the PyTorch forward."""
    k = conv_weight.shape[-1]
    pad = (k - 1) // 2
    avg = jnp.mean(x, axis=1, keepdims=True)
    mx = jnp.max(x, axis=1, keepdims=True)
    y = jnp.concatenate([avg, mx], axis=1)                 # (B, 2, H, W)
    y = lax.conv_general_dilated(
        y, conv_weight, window_strides=(1, 1),
        padding=[(pad, pad), (pad, pad)],
        dimension_numbers=("NCHW", "OIHW", "NCHW"),
        precision=lax.Precision.HIGHEST)
    y = jax.nn.sigmoid(y)
    return x * y


if __name__ == "__main__":
    B, C, H, W = 2, 4, 16, 16
    kernel_size = 7                                        # typical CBAM choice

    key = jax.random.PRNGKey(0)
    k_x, k_w = jax.random.split(key)
    x = jax.random.normal(k_x, (B, C, H, W), dtype=jnp.float32)

    # nn.Conv2d(2, 1, k, bias=False) default init: U(-1/sqrt(fan_in), +1/sqrt(fan_in))
    fan_in = 2 * kernel_size * kernel_size
    bound = 1.0 / (fan_in ** 0.5)
    conv_w = jax.random.uniform(
        k_w, (1, 2, kernel_size, kernel_size),
        dtype=jnp.float32, minval=-bound, maxval=bound)

    # Compute the reference first: x is donated to the kernel call below.
    ref = jax.block_until_ready(_reference(x, conv_w))

    out = spatial_attention(x, conv_w)
    out = jax.block_until_ready(out)

    assert out.shape == (B, C, H, W)
    max_err = jnp.max(jnp.abs(out - ref))
    assert jnp.allclose(out, ref, atol=1e-5, rtol=1e-5), f"max abs err {max_err}"

    print("KERNEL_OK")
</pallas_src>

<mosaic_0001>
module attributes {stable_mosaic.version = 11 : i64} {
  func.func @_spatial_attention_kernel(%arg0: i32, %arg1: memref<98xf32, #tpu.memory_space<smem>>, %arg2: memref<1x4x256xf32, #tpu.memory_space<vmem>>, %arg3: memref<1x4x256xf32, #tpu.memory_space<vmem>>, %arg4: memref<2x22x22xf32, #tpu.memory_space<vmem>>, %arg5: memref<1x256xf32, #tpu.memory_space<vmem>>) attributes {dimension_semantics = [#tpu.dimension_semantics<parallel>], iteration_bounds = array<i64: 2>, scalar_prefetch = 0 : i64, scratch_operands = 2 : i64, tpu.core_type = #tpu.core_type<tc>, window_params = [{transform_indices = @transform_0, window_bounds = array<i64: 98>}, {transform_indices = @transform_1, window_bounds = array<i64: 1, 4, 256>}, {transform_indices = @transform_2, window_bounds = array<i64: 1, 4, 256>}]} {
    %c0 = arith.constant 0 : index
    %c0_0 = arith.constant 0 : index
    %c0_1 = arith.constant 0 : index
    %0 = vector.load %arg2[%c0, %c0_0, %c0_1] : memref<1x4x256xf32, #tpu.memory_space<vmem>>, vector<1x4x256xf32>
    %1 = vector.shape_cast %0 : vector<1x4x256xf32> to vector<4x256xf32>
    %cst = arith.constant dense<0.000000e+00> : vector<256xf32>
    %2 = vector.multi_reduction <add>, %1, %cst [0] : vector<4x256xf32> to vector<256xf32>
    %3 = vector.shape_cast %2 : vector<256xf32> to vector<1x256xf32>
    %cst_2 = arith.constant 2.500000e-01 : f32
    %4 = vector.broadcast %cst_2 : f32 to vector<1x256xf32>
    %5 = arith.mulf %3, %4 : vector<1x256xf32>
    %cst_3 = arith.constant dense<0xFF800000> : vector<256xf32>
    %6 = vector.multi_reduction <maximumf>, %1, %cst_3 [0] : vector<4x256xf32> to vector<256xf32>
    %7 = vector.shape_cast %6 : vector<256xf32> to vector<1x256xf32>
    %cst_4 = arith.constant 0.000000e+00 : f32
    %8 = vector.broadcast %cst_4 : f32 to vector<2x22x22xf32>
    %c0_5 = arith.constant 0 : index
    %c0_6 = arith.constant 0 : index
    %c0_7 = arith.constant 0 : index
    %9 = vector.load %arg4[%c0_5, %c0_6, %c0_7] : memref<2x22x22xf32, #tpu.memory_space<vmem>>, vector<2x22x22xf32>
    tpu.vector_store %arg4[%c0_5, %c0_6, %c0_7], %8 {strides = array<i32>} : memref<2x22x22xf32, #tpu.memory_space<vmem>>, vector<2x22x22xf32>,
    %10 = vector.extract_strided_slice %5 {offsets = [0, 0], sizes = [1, 16], strides = [1, 1]} : vector<1x256xf32> to vector<1x16xf32>
    %c0_8 = arith.constant 0 : index
    %c3 = arith.constant 3 : index
    %c3_9 = arith.constant 3 : index
    %11 = vector.load %arg4[%c0_8, %c3, %c3_9] : memref<2x22x22xf32, #tpu.memory_space<vmem>>, vector<1x1x16xf32>
    %12 = vector.shape_cast %11 : vector<1x1x16xf32> to vector<1x16xf32>
    %13 = vector.shape_cast %10 : vector<1x16xf32> to vector<1x1x16xf32>
    tpu.vector_store %arg4[%c0_8, %c3, %c3_9], %13 {strides = array<i32>} : memref<2x22x22xf32, #tpu.memory_space<vmem>>, vector<1x1x16xf32>,
    %14 = vector.extract_strided_slice %7 {offsets = [0, 0], sizes = [1, 16], strides = [1, 1]} : vector<1x256xf32> to vector<1x16xf32>
    %c1 = arith.constant 1 : index
    %c3_10 = arith.constant 3 : index
    %c3_11 = arith.constant 3 : index
    %15 = vector.load %arg4[%c1, %c3_10, %c3_11] : memref<2x22x22xf32, #tpu.memory_space<vmem>>, vector<1x1x16xf32>
    %16 = vector.shape_cast %15 : vector<1x1x16xf32> to vector<1x16xf32>
    %17 = vector.shape_cast %14 : vector<1x16xf32> to vector<1x1x16xf32>
    tpu.vector_store %arg4[%c1, %c3_10, %c3_11], %17 {strides = array<i32>} : memref<2x22x22xf32, #tpu.memory_space<vmem>>, vector<1x1x16xf32>,
    %18 = vector.extract_strided_slice %5 {offsets = [0, 16], sizes = [1, 16], strides = [1, 1]} : vector<1x256xf32> to vector<1x16xf32>
    %c0_12 = arith.constant 0 : index
    %c4 = arith.constant 4 : index
    %c3_13 = arith.constant 3 : index
    %19 = vector.load %arg4[%c0_12, %c4, %c3_13] : memref<2x22x22xf32, #tpu.memory_space<vmem>>, vector<1x1x16xf32>
    %20 = vector.shape_cast %19 : vector<1x1x16xf32> to vector<1x16xf32>
    %21 = vector.shape_cast %18 : vector<1x16xf32> to vector<1x1x16xf32>
    tpu.vector_store %arg4[%c0_12, %c4, %c3_13], %21 {strides = array<i32>} : memref<2x22x22xf32, #tpu.memory_space<vmem>>, vector<1x1x16xf32>,
    %22 = vector.extract_strided_slice %7 {offsets = [0, 16], sizes = [1, 16], strides = [1, 1]} : vector<1x256xf32> to vector<1x16xf32>
    %c1_14 = arith.constant 1 : index
    %c4_15 = arith.constant 4 : index
    %c3_16 = arith.constant 3 : index
    %23 = vector.load %arg4[%c1_14, %c4_15, %c3_16] : memref<2x22x22xf32, #tpu.memory_space<vmem>>, vector<1x1x16xf32>
    %24 = vector.shape_cast %23 : vector<1x1x16xf32> to vector<1x16xf32>
    %25 = vector.shape_cast %22 : vector<1x16xf32> to vector<1x1x16xf32>
    tpu.vector_store %arg4[%c1_14, %c4_15, %c3_16], %25 {strides = array<i32>} : memref<2x22x22xf32, #tpu.memory_space<vmem>>, vector<1x1x16xf32>,
    %26 = vector.extract_strided_slice %5 {offsets = [0, 32], sizes = [1, 16], strides = [1, 1]} : vector<1x256xf32> to vector<1x16xf32>
    %c0_17 = arith.constant 0 : index
    %c5 = arith.constant 5 : index
    %c3_18 = arith.constant 3 : index
    %27 = vector.load %arg4[%c0_17, %c5, %c3_18] : memref<2x22x22xf32, #tpu.memory_space<vmem>>, vector<1x1x16xf32>
    %28 = vector.shape_cast %27 : vector<1x1x16xf32> to vector<1x16xf32>
    %29 = vector.shape_cast %26 : vector<1x16xf32> to vector<1x1x16xf32>
    tpu.vector_store %arg4[%c0_17, %c5, %c3_18], %29 {strides = array<i32>} : memref<2x22x22xf32, #tpu.memory_space<vmem>>, vector<1x1x16xf32>,
    %30 = vector.extract_strided_slice %7 {offsets = [0, 32], sizes = [1, 16], strides = [1, 1]} : vector<1x256xf32> to vector<1x16xf32>
    %c1_19 = arith.constant 1 : index
    %c5_20 = arith.constant 5 : index
    %c3_21 = arith.constant 3 : index
    %31 = vector.load %arg4[%c1_19, %c5_20, %c3_21] : memref<2x22x22xf32, #tpu.memory_space<vmem>>, vector<1x1x16xf32>
    %32 = vector.shape_cast %31 : vector<1x1x16xf32> to vector<1x16xf32>
    %33 = vector.shape_cast %30 : vector<1x16xf32> to vector<1x1x16xf32>
    tpu.vector_store %arg4[%c1_19, %c5_20, %c3_21], %33 {strides = array<i32>} : memref<2x22x22xf32, #tpu.memory_space<vmem>>, vector<1x1x16xf32>,
    %34 = vector.extract_strided_slice %5 {offsets = [0, 48], sizes = [1, 16], strides = [1, 1]} : vector<1x256xf32> to vector<1x16xf32>
    %c0_22 = arith.constant 0 : index
    %c6 = arith.constant 6 : index
    %c3_23 = arith.constant 3 : index
    %35 = vector.load %arg4[%c0_22, %c6, %c3_23] : memref<2x22x22xf32, #tpu.memory_space<vmem>>, vector<1x1x16xf32>
    %36 = vector.shape_cast %35 : vector<1x1x16xf32> to vector<1x16xf32>
    %37 = vector.shape_cast %34 : vector<1x16xf32> to vector<1x1x16xf32>
    tpu.vector_store %arg4[%c0_22, %c6, %c3_23], %37 {strides = array<i32>} : memref<2x22x22xf32, #tpu.memory_space<vmem>>, vector<1x1x16xf32>,
    %38 = vector.extract_strided_slice %7 {offsets = [0, 48], sizes = [1, 16], strides = [1, 1]} : vector<1x256xf32> to vector<1x16xf32>
    %c1_24 = arith.constant 1 : index
    %c6_25 = arith.constant 6 : index
    %c3_26 = arith.constant 3 : index
    %39 = vector.load %arg4[%c1_24, %c6_25, %c3_26] : memref<2x22x22xf32, #tpu.memory_space<vmem>>, vector<1x1x16xf32>
    %40 = vector.shape_cast %39 : vector<1x1x16xf32> to vector<1x16xf32>
    %41 = vector.shape_cast %38 : vector<1x16xf32> to vector<1x1x16xf32>
    tpu.vector_store %arg4[%c1_24, %c6_25, %c3_26], %41 {strides = array<i32>} : memref<2x22x22xf32, #tpu.memory_space<vmem>>, vector<1x1x16xf32>,
    %42 = vector.extract_strided_slice %5 {offsets = [0, 64], sizes = [1, 16], strides = [1, 1]} : vector<1x256xf32> to vector<1x16xf32>
    %c0_27 = arith.constant 0 : index
    %c7 = arith.constant 7 : index
    %c3_28 = arith.constant 3 : index
    %43 = vector.load %arg4[%c0_27, %c7, %c3_28] : memref<2x22x22xf32, #tpu.memory_space<vmem>>, vector<1x1x16xf32>
    %44 = vector.shape_cast %43 : vector<1x1x16xf32> to vector<1x16xf32>
    %45 = vector.shape_cast %42 : vector<1x16xf32> to vector<1x1x16xf32>
    tpu.vector_store %arg4[%c0_27, %c7, %c3_28], %45 {strides = array<i32>} : memref<2x22x22xf32, #tpu.memory_space<vmem>>, vector<1x1x16xf32>,
    %46 = vector.extract_strided_slice %7 {offsets = [0, 64], sizes = [1, 16], strides = [1, 1]} : vector<1x256xf32> to vector<1x16xf32>
    %c1_29 = arith.constant 1 : index
    %c7_30 = arith.constant 7 : index
    %c3_31 = arith.constant 3 : index
    %47 = vector.load %arg4[%c1_29, %c7_30, %c3_31] : memref<2x22x22xf32, #tpu.memory_space<vmem>>, vector<1x1x16xf32>
    %48 = vector.shape_cast %47 : vector<1x1x16xf32> to vector<1x16xf32>
    %49 = vector.shape_cast %46 : vector<1x16xf32> to vector<1x1x16xf32>
    tpu.vector_store %arg4[%c1_29, %c7_30, %c3_31], %49 {strides = array<i32>} : memref<2x22x22xf32, #tpu.memory_space<vmem>>, vector<1x1x16xf32>,
    %50 = vector.extract_strided_slice %5 {offsets = [0, 80], sizes = [1, 16], strides = [1, 1]} : vector<1x256xf32> to vector<1x16xf32>
    %c0_32 = arith.constant 0 : index
    %c8 = arith.constant 8 : index
    %c3_33 = arith.constant 3 : index
    %51 = vector.load %arg4[%c0_32, %c8, %c3_33] : memref<2x22x22xf32, #tpu.memory_space<vmem>>, vector<1x1x16xf32>
    %52 = vector.shape_cast %51 : vector<1x1x16xf32> to vector<1x16xf32>
    %53 = vector.shape_cast %50 : vector<1x16xf32> to vector<1x1x16xf32>
    tpu.vector_store %arg4[%c0_32, %c8, %c3_33], %53 {strides = array<i32>} : memref<2x22x22xf32, #tpu.memory_space<vmem>>, vector<1x1x16xf32>,
    %54 = vector.extract_strided_slice %7 {offsets = [0, 80], sizes = [1, 16], strides = [1, 1]} : vector<1x256xf32> to vector<1x16xf32>
    %c1_34 = arith.constant 1 : index
    %c8_35 = arith.constant 8 : index
    %c3_36 = arith.constant 3 : index
    %55 = vector.load %arg4[%c1_34, %c8_35, %c3_36] : memref<2x22x22xf32, #tpu.memory_space<vmem>>, vector<1x1x16xf32>
    %56 = vector.shape_cast %55 : vector<1x1x16xf32> to vector<1x16xf32>
    %57 = vector.shape_cast %54 : vector<1x16xf32> to vector<1x1x16xf32>
    tpu.vector_store %arg4[%c1_34, %c8_35, %c3_36], %57 {strides = array<i32>} : memref<2x22x22xf32, #tpu.memory_space<vmem>>, vector<1x1x16xf32>,
    %58 = vector.extract_strided_slice %5 {offsets = [0, 96], sizes = [1, 16], strides = [1, 1]} : vector<1x256xf32> to vector<1x16xf32>
    %c0_37 = arith.constant 0 : index
    %c9 = arith.constant 9 : index
    %c3_38 = arith.constant 3 : index
    %59 = vector.load %arg4[%c0_37, %c9, %c3_38] : memref<2x22x22xf32, #tpu.memory_space<vmem>>, vector<1x1x16xf32>
    %60 = vector.shape_cast %59 : vector<1x1x16xf32> to vector<1x16xf32>
    %61 = vector.shape_cast %58 : vector<1x16xf32> to vector<1x1x16xf32>
    tpu.vector_store %arg4[%c0_37, %c9, %c3_38], %61 {strides = array<i32>} : memref<2x22x22xf32, #tpu.memory_space<vmem>>, vector<1x1x16xf32>,
    %62 = vector.extract_strided_slice %7 {offsets = [0, 96], sizes = [1, 16], strides = [1, 1]} : vector<1x256xf32> to vector<1x16xf32>
    %c1_39 = arith.constant 1 : index
    %c9_40 = arith.constant 9 : index
    %c3_41 = arith.constant 3 : index
    %63 = vector.load %arg4[%c1_39, %c9_40, %c3_41] : memref<2x22x22xf32, #tpu.memory_space<vmem>>, vector<1x1x16xf32>
    %64 = vector.shape_cast %63 : vector<1x1x16xf32> to vector<1x16xf32>
    %65 = vector.shape_cast %62 : vector<1x16xf32> to vector<1x1x16xf32>
    tpu.vector_store %arg4[%c1_39, %c9_40, %c3_41], %65 {strides = array<i32>} : memref<2x22x22xf32, #tpu.memory_space<vmem>>, vector<1x1x16xf32>,
    %66 = vector.extract_strided_slice %5 {offsets = [0, 112], sizes = [1, 16], strides = [1, 1]} : vector<1x256xf32> to vector<1x16xf32>
    %c0_42 = arith.constant 0 : index
    %c10 = arith.constant 10 : index
    %c3_43 = arith.constant 3 : index
    %67 = vector.load %arg4[%c0_42, %c10, %c3_43] : memref<2x22x22xf32, #tpu.memory_space<vmem>>, vector<1x1x16xf32>
    %68 = vector.shape_cast %67 : vector<1x1x16xf32> to vector<1x16xf32>
    %69 = vector.shape_cast %66 : vector<1x16xf32> to vector<1x1x16xf32>
    tpu.vector_store %arg4[%c0_42, %c10, %c3_43], %69 {strides = array<i32>} : memref<2x22x22xf32, #tpu.memory_space<vmem>>, vector<1x1x16xf32>,
    %70 = vector.extract_strided_slice %7 {offsets = [0, 112], sizes = [1, 16], strides = [1, 1]} : vector<1x256xf32> to vector<1x16xf32>
    %c1_44 = arith.constant 1 : index
    %c10_45 = arith.constant 10 : index
    %c3_46 = arith.constant 3 : index
    %71 = vector.load %arg4[%c1_44, %c10_45, %c3_46] : memref<2x22x22xf32, #tpu.memory_space<vmem>>, vector<1x1x16xf32>
    %72 = vector.shape_cast %71 : vector<1x1x16xf32> to vector<1x16xf32>
    %73 = vector.shape_cast %70 : vector<1x16xf32> to vector<1x1x16xf32>
    tpu.vector_store %arg4[%c1_44, %c10_45, %c3_46], %73 {strides = array<i32>} : memref<2x22x22xf32, #tpu.memory_space<vmem>>, vector<1x1x16xf32>,
    %74 = vector.extract_strided_slice %5 {offsets = [0, 128], sizes = [1, 16], strides = [1, 1]} : vector<1x256xf32> to vector<1x16xf32>
    %c0_47 = arith.constant 0 : index
    %c11 = arith.constant 11 : index
    %c3_48 = arith.constant 3 : index
    %75 = vector.load %arg4[%c0_47, %c11, %c3_48] : memref<2x22x22xf32, #tpu.memory_space<vmem>>, vector<1x1x16xf32>
    %76 = vector.shape_cast %75 : vector<1x1x16xf32> to vector<1x16xf32>
    %77 = vector.shape_cast %74 : vector<1x16xf32> to vector<1x1x16xf32>
    tpu.vector_store %arg4[%c0_47, %c11, %c3_48], %77 {strides = array<i32>} : memref<2x22x22xf32, #tpu.memory_space<vmem>>, vector<1x1x16xf32>,
    %78 = vector.extract_strided_slice %7 {offsets = [0, 128], sizes = [1, 16], strides = [1, 1]} : vector<1x256xf32> to vector<1x16xf32>
    %c1_49 = arith.constant 1 : index
    %c11_50 = arith.constant 11 : index
    %c3_51 = arith.constant 3 : index
    %79 = vector.load %arg4[%c1_49, %c11_50, %c3_51] : memref<2x22x22xf32, #tpu.memory_space<vmem>>, vector<1x1x16xf32>
    %80 = vector.shape_cast %79 : vector<1x1x16xf32> to vector<1x16xf32>
    %81 = vector.shape_cast %78 : vector<1x16xf32> to vector<1x1x16xf32>
    tpu.vector_store %arg4[%c1_49, %c11_50, %c3_51], %81 {strides = array<i32>} : memref<2x22x22xf32, #tpu.memory_space<vmem>>, vector<1x1x16xf32>,
    %82 = vector.extract_strided_slice %5 {offsets = [0, 144], sizes = [1, 16], strides = [1, 1]} : vector<1x256xf32> to vector<1x16xf32>
    %c0_52 = arith.constant 0 : index
    %c12 = arith.constant 12 : index
    %c3_53 = arith.constant 3 : index
    %83 = vector.load %arg4[%c0_52, %c12, %c3_53] : memref<2x22x22xf32, #tpu.memory_space<vmem>>, vector<1x1x16xf32>
    %84 = vector.shape_cast %83 : vector<1x1x16xf32> to vector<1x16xf32>
    %85 = vector.shape_cast %82 : vector<1x16xf32> to vector<1x1x16xf32>
    tpu.vector_store %arg4[%c0_52, %c12, %c3_53], %85 {strides = array<i32>} : memref<2x22x22xf32, #tpu.memory_space<vmem>>, vector<1x1x16xf32>,
    %86 = vector.extract_strided_slice %7 {offsets = [0, 144], sizes = [1, 16], strides = [1, 1]} : vector<1x256xf32> to vector<1x16xf32>
    %c1_54 = arith.constant 1 : index
    %c12_55 = arith.constant 12 : index
    %c3_56 = arith.constant 3 : index
    %87 = vector.load %arg4[%c1_54, %c12_55, %c3_56] : memref<2x22x22xf32, #tpu.memory_space<vmem>>, vector<1x1x16xf32>
    %88 = vector.shape_cast %87 : vector<1x1x16xf32> to vector<1x16xf32>
    %89 = vector.shape_cast %86 : vector<1x16xf32> to vector<1x1x16xf32>
    tpu.vector_store %arg4[%c1_54, %c12_55, %c3_56], %89 {strides = array<i32>} : memref<2x22x22xf32, #tpu.memory_space<vmem>>, vector<1x1x16xf32>,
    %90 = vector.extract_strided_slice %5 {offsets = [0, 160], sizes = [1, 16], strides = [1, 1]} : vector<1x256xf32> to vector<1x16xf32>
    %c0_57 = arith.constant 0 : index
    %c13 = arith.constant 13 : index
    %c3_58 = arith.constant 3 : index
    %91 = vector.load %arg4[%c0_57, %c13, %c3_58] : memref<2x22x22xf32, #tpu.memory_space<vmem>>, vector<1x1x16xf32>
    %92 = vector.shape_cast %91 : vector<1x1x16xf32> to vector<1x16xf32>
    %93 = vector.shape_cast %90 : vector<1x16xf32> to vector<1x1x16xf32>
    tpu.vector_store %arg4[%c0_57, %c13, %c3_58], %93 {strides = array<i32>} : memref<2x22x22xf32, #tpu.memory_space<vmem>>, vector<1x1x16xf32>,
    %94 = vector.extract_strided_slice %7 {offsets = [0, 160], sizes = [1, 16], strides = [1, 1]} : vector<1x256xf32> to vector<1x16xf32>
    %c1_59 = arith.constant 1 : index
    %c13_60 = arith.constant 13 : index
    %c3_61 = arith.constant 3 : index
    %95 = vector.load %arg4[%c1_59, %c13_60, %c3_61] : memref<2x22x22xf32, #tpu.memory_space<vmem>>, vector<1x1x16xf32>
    %96 = vector.shape_cast %95 : vector<1x1x16xf32> to vector<1x16xf32>
    %97 = vector.shape_cast %94 : vector<1x16xf32> to vector<1x1x16xf32>
    tpu.vector_store %arg4[%c1_59, %c13_60, %c3_61], %97 {strides = array<i32>} : memref<2x22x22xf32, #tpu.memory_space<vmem>>, vector<1x1x16xf32>,
    %98 = vector.extract_strided_slice %5 {offsets = [0, 176], sizes = [1, 16], strides = [1, 1]} : vector<1x256xf32> to vector<1x16xf32>
    %c0_62 = arith.constant 0 : index
    %c14 = arith.constant 14 : index
    %c3_63 = arith.constant 3 : index
    %99 = vector.load %arg4[%c0_62, %c14, %c3_63] : memref<2x22x22xf32, #tpu.memory_space<vmem>>, vector<1x1x16xf32>
    %100 = vector.shape_cast %99 : vector<1x1x16xf32> to vector<1x16xf32>
    %101 = vector.shape_cast %98 : vector<1x16xf32> to vector<1x1x16xf32>
    tpu.vector_store %arg4[%c0_62, %c14, %c3_63], %101 {strides = array<i32>} : memref<2x22x22xf32, #tpu.memory_space<vmem>>, vector<1x1x16xf32>,
    %102 = vector.extract_strided_slice %7 {offsets = [0, 176], sizes = [1, 16], strides = [1, 1]} : vector<1x256xf32> to vector<1x16xf32>
    %c1_64 = arith.constant 1 : index
    %c14_65 = arith.constant 14 : index
    %c3_66 = arith.constant 3 : index
    %103 = vector.load %arg4[%c1_64, %c14_65, %c3_66] : memref<2x22x22xf32, #tpu.memory_space<vmem>>, vector<1x1x16xf32>
    %104 = vector.shape_cast %103 : vector<1x1x16xf32> to vector<1x16xf32>
    %105 = vector.shape_cast %102 : vector<1x16xf32> to vector<1x1x16xf32>
    tpu.vector_store %arg4[%c1_64, %c14_65, %c3_66], %105 {strides = array<i32>} : memref<2x22x22xf32, #tpu.memory_space<vmem>>, vector<1x1x16xf32>,
    %106 = vector.extract_strided_slice %5 {offsets = [0, 192], sizes = [1, 16], strides = [1, 1]} : vector<1x256xf32> to vector<1x16xf32>
    %c0_67 = arith.constant 0 : index
    %c15 = arith.constant 15 : index
    %c3_68 = arith.constant 3 : index
    %107 = vector.load %arg4[%c0_67, %c15, %c3_68] : memref<2x22x22xf32, #tpu.memory_space<vmem>>, vector<1x1x16xf32>
    %108 = vector.shape_cast %107 : vector<1x1x16xf32> to vector<1x16xf32>
    %109 = vector.shape_cast %106 : vector<1x16xf32> to vector<1x1x16xf32>
    tpu.vector_store %arg4[%c0_67, %c15, %c3_68], %109 {strides = array<i32>} : memref<2x22x22xf32, #tpu.memory_space<vmem>>, vector<1x1x16xf32>,
    %110 = vector.extract_strided_slice %7 {offsets = [0, 192], sizes = [1, 16], strides = [1, 1]} : vector<1x256xf32> to vector<1x16xf32>
    %c1_69 = arith.constant 1 : index
    %c15_70 = arith.constant 15 : index
    %c3_71 = arith.constant 3 : index
    %111 = vector.load %arg4[%c1_69, %c15_70, %c3_71] : memref<2x22x22xf32, #tpu.memory_space<vmem>>, vector<1x1x16xf32>
    %112 = vector.shape_cast %111 : vector<1x1x16xf32> to vector<1x16xf32>
    %113 = vector.shape_cast %110 : vector<1x16xf32> to vector<1x1x16xf32>
    tpu.vector_store %arg4[%c1_69, %c15_70, %c3_71], %113 {strides = array<i32>} : memref<2x22x22xf32, #tpu.memory_space<vmem>>, vector<1x1x16xf32>,
    %114 = vector.extract_strided_slice %5 {offsets = [0, 208], sizes = [1, 16], strides = [1, 1]} : vector<1x256xf32> to vector<1x16xf32>
    %c0_72 = arith.constant 0 : index
    %c16 = arith.constant 16 : index
    %c3_73 = arith.constant 3 : index
    %115 = vector.load %arg4[%c0_72, %c16, %c3_73] : memref<2x22x22xf32, #tpu.memory_space<vmem>>, vector<1x1x16xf32>
    %116 = vector.shape_cast %115 : vector<1x1x16xf32> to vector<1x16xf32>
    %117 = vector.shape_cast %114 : vector<1x16xf32> to vector<1x1x16xf32>
    tpu.vector_store %arg4[%c0_72, %c16, %c3_73], %117 {strides = array<i32>} : memref<2x22x22xf32, #tpu.memory_space<vmem>>, vector<1x1x16xf32>,
    %118 = vector.extract_strided_slice %7 {offsets = [0, 208], sizes = [1, 16], strides = [1, 1]} : vector<1x256xf32> to vector<1x16xf32>
    %c1_74 = arith.constant 1 : index
    %c16_75 = arith.constant 16 : index
    %c3_76 = arith.constant 3 : index
    %119 = vector.load %arg4[%c1_74, %c16_75, %c3_76] : memref<2x22x22xf32, #tpu.memory_space<vmem>>, vector<1x1x16xf32>
    %120 = vector.shape_cast %119 : vector<1x1x16xf32> to vector<1x16xf32>
    %121 = vector.shape_cast %118 : vector<1x16xf32> to vector<1x1x16xf32>
    tpu.vector_store %arg4[%c1_74, %c16_75, %c3_76], %121 {strides = array<i32>} : memref<2x22x22xf32, #tpu.memory_space<vmem>>, vector<1x1x16xf32>,
    %122 = vector.extract_strided_slice %5 {offsets = [0, 224], sizes = [1, 16], strides = [1, 1]} : vector<1x256xf32> to vector<1x16xf32>
    %c0_77 = arith.constant 0 : index
    %c17 = arith.constant 17 : index
    %c3_78 = arith.constant 3 : index
    %123 = vector.load %arg4[%c0_77, %c17, %c3_78] : memref<2x22x22xf32, #tpu.memory_space<vmem>>, vector<1x1x16xf32>
    %124 = vector.shape_cast %123 : vector<1x1x16xf32> to vector<1x16xf32>
    %125 = vector.shape_cast %122 : vector<1x16xf32> to vector<1x1x16xf32>
    tpu.vector_store %arg4[%c0_77, %c17, %c3_78], %125 {strides = array<i32>} : memref<2x22x22xf32, #tpu.memory_space<vmem>>, vector<1x1x16xf32>,
    %126 = vector.extract_strided_slice %7 {offsets = [0, 224], sizes = [1, 16], strides = [1, 1]} : vector<1x256xf32> to vector<1x16xf32>
    %c1_79 = arith.constant 1 : index
    %c17_80 = arith.constant 17 : index
    %c3_81 = arith.constant 3 : index
    %127 = vector.load %arg4[%c1_79, %c17_80, %c3_81] : memref<2x22x22xf32, #tpu.memory_space<vmem>>, vector<1x1x16xf32>
    %128 = vector.shape_cast %127 : vector<1x1x16xf32> to vector<1x16xf32>
    %129 = vector.shape_cast %126 : vector<1x16xf32> to vector<1x1x16xf32>
    tpu.vector_store %arg4[%c1_79, %c17_80, %c3_81], %129 {strides = array<i32>} : memref<2x22x22xf32, #tpu.memory_space<vmem>>, vector<1x1x16xf32>,
    %130 = vector.extract_strided_slice %5 {offsets = [0, 240], sizes = [1, 16], strides = [1, 1]} : vector<1x256xf32> to vector<1x16xf32>
    %c0_82 = arith.constant 0 : index
    %c18 = arith.constant 18 : index
    %c3_83 = arith.constant 3 : index
    %131 = vector.load %arg4[%c0_82, %c18, %c3_83] : memref<2x22x22xf32, #tpu.memory_space<vmem>>, vector<1x1x16xf32>
    %132 = vector.shape_cast %131 : vector<1x1x16xf32> to vector<1x16xf32>
    %133 = vector.shape_cast %130 : vector<1x16xf32> to vector<1x1x16xf32>
    tpu.vector_store %arg4[%c0_82, %c18, %c3_83], %133 {strides = array<i32>} : memref<2x22x22xf32, #tpu.memory_space<vmem>>, vector<1x1x16xf32>,
    %134 = vector.extract_strided_slice %7 {offsets = [0, 240], sizes = [1, 16], strides = [1, 1]} : vector<1x256xf32> to vector<1x16xf32>
    %c1_84 = arith.constant 1 : index
    %c18_85 = arith.constant 18 : index
    %c3_86 = arith.constant 3 : index
    %135 = vector.load %arg4[%c1_84, %c18_85, %c3_86] : memref<2x22x22xf32, #tpu.memory_space<vmem>>, vector<1x1x16xf32>
    %136 = vector.shape_cast %135 : vector<1x1x16xf32> to vector<1x16xf32>
    %137 = vector.shape_cast %134 : vector<1x16xf32> to vector<1x1x16xf32>
    tpu.vector_store %arg4[%c1_84, %c18_85, %c3_86], %137 {strides = array<i32>} : memref<2x22x22xf32, #tpu.memory_space<vmem>>, vector<1x1x16xf32>,
    %cst_87 = arith.constant 0.000000e+00 : f32
    %138 = vector.broadcast %cst_87 : f32 to vector<16x16xf32>
    %c0_88 = arith.constant 0 : index
    %139 = memref.load %arg1[%c0_88] : memref<98xf32, #tpu.memory_space<smem>>
    %c0_89 = arith.constant 0 : index
    %c0_90 = arith.constant 0 : index
    %c0_91 = arith.constant 0 : index
    %140 = vector.load %arg4[%c0_89, %c0_90, %c0_91] : memref<2x22x22xf32, #tpu.memory_space<vmem>>, vector<1x16x16xf32>
    %141 = vector.shape_cast %140 : vector<1x16x16xf32> to vector<16x16xf32>
    %142 = vector.broadcast %139 : f32 to vector<16x16xf32>
    %143 = arith.mulf %142, %141 : vector<16x16xf32>
    %144 = arith.addf %138, %143 : vector<16x16xf32>
    %c1_92 = arith.constant 1 : index
    %145 = memref.load %arg1[%c1_92] : memref<98xf32, #tpu.memory_space<smem>>
    %c0_93 = arith.constant 0 : index
    %c0_94 = arith.constant 0 : index
    %c1_95 = arith.constant 1 : index
    %146 = vector.load %arg4[%c0_93, %c0_94, %c1_95] : memref<2x22x22xf32, #tpu.memory_space<vmem>>, vector<1x16x16xf32>
    %147 = vector.shape_cast %146 : vector<1x16x16xf32> to vector<16x16xf32>
    %148 = vector.broadcast %145 : f32 to vector<16x16xf32>
    %149 = arith.mulf %148, %147 : vector<16x16xf32>
    %150 = arith.addf %144, %149 : vector<16x16xf32>
    %c2 = arith.constant 2 : index
    %151 = memref.load %arg1[%c2] : memref<98xf32, #tpu.memory_space<smem>>
    %c0_96 = arith.constant 0 : index
    %c0_97 = arith.constant 0 : index
    %c2_98 = arith.constant 2 : index
    %152 = vector.load %arg4[%c0_96, %c0_97, %c2_98] : memref<2x22x22xf32, #tpu.memory_space<vmem>>, vector<1x16x16xf32>
    %153 = vector.shape_cast %152 : vector<1x16x16xf32> to vector<16x16xf32>
    %154 = vector.broadcast %151 : f32 to vector<16x16xf32>
    %155 = arith.mulf %154, %153 : vector<16x16xf32>
    %156 = arith.addf %150, %155 : vector<16x16xf32>
    %c3_99 = arith.constant 3 : index
    %157 = memref.load %arg1[%c3_99] : memref<98xf32, #tpu.memory_space<smem>>
    %c0_100 = arith.constant 0 : index
    %c0_101 = arith.constant 0 : index
    %c3_102 = arith.constant 3 : index
    %158 = vector.load %arg4[%c0_100, %c0_101, %c3_102] : memref<2x22x22xf32, #tpu.memory_space<vmem>>, vector<1x16x16xf32>
    %159 = vector.shape_cast %158 : vector<1x16x16xf32> to vector<16x16xf32>
    %160 = vector.broadcast %157 : f32 to vector<16x16xf32>
    %161 = arith.mulf %160, %159 : vector<16x16xf32>
    %162 = arith.addf %156, %161 : vector<16x16xf32>
    %c4_103 = arith.constant 4 : index
    %163 = memref.load %arg1[%c4_103] : memref<98xf32, #tpu.memory_space<smem>>
    %c0_104 = arith.constant 0 : index
    %c0_105 = arith.constant 0 : index
    %c4_106 = arith.constant 4 : index
    %164 = vector.load %arg4[%c0_104, %c0_105, %c4_106] : memref<2x22x22xf32, #tpu.memory_space<vmem>>, vector<1x16x16xf32>
    %165 = vector.shape_cast %164 : vector<1x16x16xf32> to vector<16x16xf32>
    %166 = vector.broadcast %163 : f32 to vector<16x16xf32>
    %167 = arith.mulf %166, %165 : vector<16x16xf32>
    %168 = arith.addf %162, %167 : vector<16x16xf32>
    %c5_107 = arith.constant 5 : index
    %169 = memref.load %arg1[%c5_107] : memref<98xf32, #tpu.memory_space<smem>>
    %c0_108 = arith.constant 0 : index
    %c0_109 = arith.constant 0 : index
    %c5_110 = arith.constant 5 : index
    %170 = vector.load %arg4[%c0_108, %c0_109, %c5_110] : memref<2x22x22xf32, #tpu.memory_space<vmem>>, vector<1x16x16xf32>
    %171 = vector.shape_cast %170 : vector<1x16x16xf32> to vector<16x16xf32>
    %172 = vector.broadcast %169 : f32 to vector<16x16xf32>
    %173 = arith.mulf %172, %171 : vector<16x16xf32>
    %174 = arith.addf %168, %173 : vector<16x16xf32>
    %c6_111 = arith.constant 6 : index
    %175 = memref.load %arg1[%c6_111] : memref<98xf32, #tpu.memory_space<smem>>
    %c0_112 = arith.constant 0 : index
    %c0_113 = arith.constant 0 : index
    %c6_114 = arith.constant 6 : index
    %176 = vector.load %arg4[%c0_112, %c0_113, %c6_114] : memref<2x22x22xf32, #tpu.memory_space<vmem>>, vector<1x16x16xf32>
    %177 = vector.shape_cast %176 : vector<1x16x16xf32> to vector<16x16xf32>
    %178 = vector.broadcast %175 : f32 to vector<16x16xf32>
    %179 = arith.mulf %178, %177 : vector<16x16xf32>
    %180 = arith.addf %174, %179 : vector<16x16xf32>
    %c7_115 = arith.constant 7 : index
    %181 = memref.load %arg1[%c7_115] : memref<98xf32, #tpu.memory_space<smem>>
    %c0_116 = arith.constant 0 : index
    %c1_117 = arith.constant 1 : index
    %c0_118 = arith.constant 0 : index
    %182 = vector.load %arg4[%c0_116, %c1_117, %c0_118] : memref<2x22x22xf32, #tpu.memory_space<vmem>>, vector<1x16x16xf32>
    %183 = vector.shape_cast %182 : vector<1x16x16xf32> to vector<16x16xf32>
    %184 = vector.broadcast %181 : f32 to vector<16x16xf32>
    %185 = arith.mulf %184, %183 : vector<16x16xf32>
    %186 = arith.addf %180, %185 : vector<16x16xf32>
    %c8_119 = arith.constant 8 : index
    %187 = memref.load %arg1[%c8_119] : memref<98xf32, #tpu.memory_space<smem>>
    %c0_120 = arith.constant 0 : index
    %c1_121 = arith.constant 1 : index
    %c1_122 = arith.constant 1 : index
    %188 = vector.load %arg4[%c0_120, %c1_121, %c1_122] : memref<2x22x22xf32, #tpu.memory_space<vmem>>, vector<1x16x16xf32>
    %189 = vector.shape_cast %188 : vector<1x16x16xf32> to vector<16x16xf32>
    %190 = vector.broadcast %187 : f32 to vector<16x16xf32>
    %191 = arith.mulf %190, %189 : vector<16x16xf32>
    %192 = arith.addf %186, %191 : vector<16x16xf32>
    %c9_123 = arith.constant 9 : index
    %193 = memref.load %arg1[%c9_123] : memref<98xf32, #tpu.memory_space<smem>>
    %c0_124 = arith.constant 0 : index
    %c1_125 = arith.constant 1 : index
    %c2_126 = arith.constant 2 : index
    %194 = vector.load %arg4[%c0_124, %c1_125, %c2_126] : memref<2x22x22xf32, #tpu.memory_space<vmem>>, vector<1x16x16xf32>
    %195 = vector.shape_cast %194 : vector<1x16x16xf32> to vector<16x16xf32>
    %196 = vector.broadcast %193 : f32 to vector<16x16xf32>
    %197 = arith.mulf %196, %195 : vector<16x16xf32>
    %198 = arith.addf %192, %197 : vector<16x16xf32>
    %c10_127 = arith.constant 10 : index
    %199 = memref.load %arg1[%c10_127] : memref<98xf32, #tpu.memory_space<smem>>
    %c0_128 = arith.constant 0 : index
    %c1_129 = arith.constant 1 : index
    %c3_130 = arith.constant 3 : index
    %200 = vector.load %arg4[%c0_128, %c1_129, %c3_130] : memref<2x22x22xf32, #tpu.memory_space<vmem>>, vector<1x16x16xf32>
    %201 = vector.shape_cast %200 : vector<1x16x16xf32> to vector<16x16xf32>
    %202 = vector.broadcast %199 : f32 to vector<16x16xf32>
    %203 = arith.mulf %202, %201 : vector<16x16xf32>
    %204 = arith.addf %198, %203 : vector<16x16xf32>
    %c11_131 = arith.constant 11 : index
    %205 = memref.load %arg1[%c11_131] : memref<98xf32, #tpu.memory_space<smem>>
    %c0_132 = arith.constant 0 : index
    %c1_133 = arith.constant 1 : index
    %c4_134 = arith.constant 4 : index
    %206 = vector.load %arg4[%c0_132, %c1_133, %c4_134] : memref<2x22x22xf32, #tpu.memory_space<vmem>>, vector<1x16x16xf32>
    %207 = vector.shape_cast %206 : vector<1x16x16xf32> to vector<16x16xf32>
    %208 = vector.broadcast %205 : f32 to vector<16x16xf32>
    %209 = arith.mulf %208, %207 : vector<16x16xf32>
    %210 = arith.addf %204, %209 : vector<16x16xf32>
    %c12_135 = arith.constant 12 : index
    %211 = memref.load %arg1[%c12_135] : memref<98xf32, #tpu.memory_space<smem>>
    %c0_136 = arith.constant 0 : index
    %c1_137 = arith.constant 1 : index
    %c5_138 = arith.constant 5 : index
    %212 = vector.load %arg4[%c0_136, %c1_137, %c5_138] : memref<2x22x22xf32, #tpu.memory_space<vmem>>, vector<1x16x16xf32>
    %213 = vector.shape_cast %212 : vector<1x16x16xf32> to vector<16x16xf32>
    %214 = vector.broadcast %211 : f32 to vector<16x16xf32>
    %215 = arith.mulf %214, %213 : vector<16x16xf32>
    %216 = arith.addf %210, %215 : vector<16x16xf32>
    %c13_139 = arith.constant 13 : index
    %217 = memref.load %arg1[%c13_139] : memref<98xf32, #tpu.memory_space<smem>>
    %c0_140 = arith.constant 0 : index
    %c1_141 = arith.constant 1 : index
    %c6_142 = arith.constant 6 : index
    %218 = vector.load %arg4[%c0_140, %c1_141, %c6_142] : memref<2x22x22xf32, #tpu.memory_space<vmem>>, vector<1x16x16xf32>
    %219 = vector.shape_cast %218 : vector<1x16x16xf32> to vector<16x16xf32>
    %220 = vector.broadcast %217 : f32 to vector<16x16xf32>
    %221 = arith.mulf %220, %219 : vector<16x16xf32>
    %222 = arith.addf %216, %221 : vector<16x16xf32>
    %c14_143 = arith.constant 14 : index
    %223 = memref.load %arg1[%c14_143] : memref<98xf32, #tpu.memory_space<smem>>
    %c0_144 = arith.constant 0 : index
    %c2_145 = arith.constant 2 : index
    %c0_146 = arith.constant 0 : index
    %224 = vector.load %arg4[%c0_144, %c2_145, %c0_146] : memref<2x22x22xf32, #tpu.memory_space<vmem>>, vector<1x16x16xf32>
    %225 = vector.shape_cast %224 : vector<1x16x16xf32> to vector<16x16xf32>
    %226 = vector.broadcast %223 : f32 to vector<16x16xf32>
    %227 = arith.mulf %226, %225 : vector<16x16xf32>
    %228 = arith.addf %222, %227 : vector<16x16xf32>
    %c15_147 = arith.constant 15 : index
    %229 = memref.load %arg1[%c15_147] : memref<98xf32, #tpu.memory_space<smem>>
    %c0_148 = arith.constant 0 : index
    %c2_149 = arith.constant 2 : index
    %c1_150 = arith.constant 1 : index
    %230 = vector.load %arg4[%c0_148, %c2_149, %c1_150] : memref<2x22x22xf32, #tpu.memory_space<vmem>>, vector<1x16x16xf32>
    %231 = vector.shape_cast %230 : vector<1x16x16xf32> to vector<16x16xf32>
    %232 = vector.broadcast %229 : f32 to vector<16x16xf32>
    %233 = arith.mulf %232, %231 : vector<16x16xf32>
    %234 = arith.addf %228, %233 : vector<16x16xf32>
    %c16_151 = arith.constant 16 : index
    %235 = memref.load %arg1[%c16_151] : memref<98xf32, #tpu.memory_space<smem>>
    %c0_152 = arith.constant 0 : index
    %c2_153 = arith.constant 2 : index
    %c2_154 = arith.constant 2 : index
    %236 = vector.load %arg4[%c0_152, %c2_153, %c2_154] : memref<2x22x22xf32, #tpu.memory_space<vmem>>, vector<1x16x16xf32>
    %237 = vector.shape_cast %236 : vector<1x16x16xf32> to vector<16x16xf32>
    %238 = vector.broadcast %235 : f32 to vector<16x16xf32>
    %239 = arith.mulf %238, %237 : vector<16x16xf32>
    %240 = arith.addf %234, %239 : vector<16x16xf32>
    %c17_155 = arith.constant 17 : index
    %241 = memref.load %arg1[%c17_155] : memref<98xf32, #tpu.memory_space<smem>>
    %c0_156 = arith.constant 0 : index
    %c2_157 = arith.constant 2 : index
    %c3_158 = arith.constant 3 : index
    %242 = vector.load %arg4[%c0_156, %c2_157, %c3_158] : memref<2x22x22xf32, #tpu.memory_space<vmem>>, vector<1x16x16xf32>
    %243 = vector.shape_cast %242 : vector<1x16x16xf32> to vector<16x16xf32>
    %244 = vector.broadcast %241 : f32 to vector<16x16xf32>
    %245 = arith.mulf %244, %243 : vector<16x16xf32>
    %246 = arith.addf %240, %245 : vector<16x16xf32>
    %c18_159 = arith.constant 18 : index
    %247 = memref.load %arg1[%c18_159] : memref<98xf32, #tpu.memory_space<smem>>
    %c0_160 = arith.constant 0 : index
    %c2_161 = arith.constant 2 : index
    %c4_162 = arith.constant 4 : index
    %248 = vector.load %arg4[%c0_160, %c2_161, %c4_162] : memref<2x22x22xf32, #tpu.memory_space<vmem>>, vector<1x16x16xf32>
    %249 = vector.shape_cast %248 : vector<1x16x16xf32> to vector<16x16xf32>
    %250 = vector.broadcast %247 : f32 to vector<16x16xf32>
    %251 = arith.mulf %250, %249 : vector<16x16xf32>
    %252 = arith.addf %246, %251 : vector<16x16xf32>
    %c19 = arith.constant 19 : index
    %253 = memref.load %arg1[%c19] : memref<98xf32, #tpu.memory_space<smem>>
    %c0_163 = arith.constant 0 : index
    %c2_164 = arith.constant 2 : index
    %c5_165 = arith.constant 5 : index
    %254 = vector.load %arg4[%c0_163, %c2_164, %c5_165] : memref<2x22x22xf32, #tpu.memory_space<vmem>>, vector<1x16x16xf32>
    %255 = vector.shape_cast %254 : vector<1x16x16xf32> to vector<16x16xf32>
    %256 = vector.broadcast %253 : f32 to vector<16x16xf32>
    %257 = arith.mulf %256, %255 : vector<16x16xf32>
    %258 = arith.addf %252, %257 : vector<16x16xf32>
    %c20 = arith.constant 20 : index
    %259 = memref.load %arg1[%c20] : memref<98xf32, #tpu.memory_space<smem>>
    %c0_166 = arith.constant 0 : index
    %c2_167 = arith.constant 2 : index
    %c6_168 = arith.constant 6 : index
    %260 = vector.load %arg4[%c0_166, %c2_167, %c6_168] : memref<2x22x22xf32, #tpu.memory_space<vmem>>, vector<1x16x16xf32>
    %261 = vector.shape_cast %260 : vector<1x16x16xf32> to vector<16x16xf32>
    %262 = vector.broadcast %259 : f32 to vector<16x16xf32>
    %263 = arith.mulf %262, %261 : vector<16x16xf32>
    %264 = arith.addf %258, %263 : vector<16x16xf32>
    %c21 = arith.constant 21 : index
    %265 = memref.load %arg1[%c21] : memref<98xf32, #tpu.memory_space<smem>>
    %c0_169 = arith.constant 0 : index
    %c3_170 = arith.constant 3 : index
    %c0_171 = arith.constant 0 : index
    %266 = vector.load %arg4[%c0_169, %c3_170, %c0_171] : memref<2x22x22xf32, #tpu.memory_space<vmem>>, vector<1x16x16xf32>
    %267 = vector.shape_cast %266 : vector<1x16x16xf32> to vector<16x16xf32>
    %268 = vector.broadcast %265 : f32 to vector<16x16xf32>
    %269 = arith.mulf %268, %267 : vector<16x16xf32>
    %270 = arith.addf %264, %269 : vector<16x16xf32>
    %c22 = arith.constant 22 : index
    %271 = memref.load %arg1[%c22] : memref<98xf32, #tpu.memory_space<smem>>
    %c0_172 = arith.constant 0 : index
    %c3_173 = arith.constant 3 : index
    %c1_174 = arith.constant 1 : index
    %272 = vector.load %arg4[%c0_172, %c3_173, %c1_174] : memref<2x22x22xf32, #tpu.memory_space<vmem>>, vector<1x16x16xf32>
    %273 = vector.shape_cast %272 : vector<1x16x16xf32> to vector<16x16xf32>
    %274 = vector.broadcast %271 : f32 to vector<16x16xf32>
    %275 = arith.mulf %274, %273 : vector<16x16xf32>
    %276 = arith.addf %270, %275 : vector<16x16xf32>
    %c23 = arith.constant 23 : index
    %277 = memref.load %arg1[%c23] : memref<98xf32, #tpu.memory_space<smem>>
    %c0_175 = arith.constant 0 : index
    %c3_176 = arith.constant 3 : index
    %c2_177 = arith.constant 2 : index
    %278 = vector.load %arg4[%c0_175, %c3_176, %c2_177] : memref<2x22x22xf32, #tpu.memory_space<vmem>>, vector<1x16x16xf32>
    %279 = vector.shape_cast %278 : vector<1x16x16xf32> to vector<16x16xf32>
    %280 = vector.broadcast %277 : f32 to vector<16x16xf32>
    %281 = arith.mulf %280, %279 : vector<16x16xf32>
    %282 = arith.addf %276, %281 : vector<16x16xf32>
    %c24 = arith.constant 24 : index
    %283 = memref.load %arg1[%c24] : memref<98xf32, #tpu.memory_space<smem>>
    %c0_178 = arith.constant 0 : index
    %c3_179 = arith.constant 3 : index
    %c3_180 = arith.constant 3 : index
    %284 = vector.load %arg4[%c0_178, %c3_179, %c3_180] : memref<2x22x22xf32, #tpu.memory_space<vmem>>, vector<1x16x16xf32>
    %285 = vector.shape_cast %284 : vector<1x16x16xf32> to vector<16x16xf32>
    %286 = vector.broadcast %283 : f32 to vector<16x16xf32>
    %287 = arith.mulf %286, %285 : vector<16x16xf32>
    %288 = arith.addf %282, %287 : vector<16x16xf32>
    %c25 = arith.constant 25 : index
    %289 = memref.load %arg1[%c25] : memref<98xf32, #tpu.memory_space<smem>>
    %c0_181 = arith.constant 0 : index
    %c3_182 = arith.constant 3 : index
    %c4_183 = arith.constant 4 : index
    %290 = vector.load %arg4[%c0_181, %c3_182, %c4_183] : memref<2x22x22xf32, #tpu.memory_space<vmem>>, vector<1x16x16xf32>
    %291 = vector.shape_cast %290 : vector<1x16x16xf32> to vector<16x16xf32>
    %292 = vector.broadcast %289 : f32 to vector<16x16xf32>
    %293 = arith.mulf %292, %291 : vector<16x16xf32>
    %294 = arith.addf %288, %293 : vector<16x16xf32>
    %c26 = arith.constant 26 : index
    %295 = memref.load %arg1[%c26] : memref<98xf32, #tpu.memory_space<smem>>
    %c0_184 = arith.constant 0 : index
    %c3_185 = arith.constant 3 : index
    %c5_186 = arith.constant 5 : index
    %296 = vector.load %arg4[%c0_184, %c3_185, %c5_186] : memref<2x22x22xf32, #tpu.memory_space<vmem>>, vector<1x16x16xf32>
    %297 = vector.shape_cast %296 : vector<1x16x16xf32> to vector<16x16xf32>
    %298 = vector.broadcast %295 : f32 to vector<16x16xf32>
    %299 = arith.mulf %298, %297 : vector<16x16xf32>
    %300 = arith.addf %294, %299 : vector<16x16xf32>
    %c27 = arith.constant 27 : index
    %301 = memref.load %arg1[%c27] : memref<98xf32, #tpu.memory_space<smem>>
    %c0_187 = arith.constant 0 : index
    %c3_188 = arith.constant 3 : index
    %c6_189 = arith.constant 6 : index
    %302 = vector.load %arg4[%c0_187, %c3_188, %c6_189] : memref<2x22x22xf32, #tpu.memory_space<vmem>>, vector<1x16x16xf32>
    %303 = vector.shape_cast %302 : vector<1x16x16xf32> to vector<16x16xf32>
    %304 = vector.broadcast %301 : f32 to vector<16x16xf32>
    %305 = arith.mulf %304, %303 : vector<16x16xf32>
    %306 = arith.addf %300, %305 : vector<16x16xf32>
    %c28 = arith.constant 28 : index
    %307 = memref.load %arg1[%c28] : memref<98xf32, #tpu.memory_space<smem>>
    %c0_190 = arith.constant 0 : index
    %c4_191 = arith.constant 4 : index
    %c0_192 = arith.constant 0 : index
    %308 = vector.load %arg4[%c0_190, %c4_191, %c0_192] : memref<2x22x22xf32, #tpu.memory_space<vmem>>, vector<1x16x16xf32>
    %309 = vector.shape_cast %308 : vector<1x16x16xf32> to vector<16x16xf32>
    %310 = vector.broadcast %307 : f32 to vector<16x16xf32>
    %311 = arith.mulf %310, %309 : vector<16x16xf32>
    %312 = arith.addf %306, %311 : vector<16x16xf32>
    %c29 = arith.constant 29 : index
    %313 = memref.load %arg1[%c29] : memref<98xf32, #tpu.memory_space<smem>>
    %c0_193 = arith.constant 0 : index
    %c4_194 = arith.constant 4 : index
    %c1_195 = arith.constant 1 : index
    %314 = vector.load %arg4[%c0_193, %c4_194, %c1_195] : memref<2x22x22xf32, #tpu.memory_space<vmem>>, vector<1x16x16xf32>
    %315 = vector.shape_cast %314 : vector<1x16x16xf32> to vector<16x16xf32>
    %316 = vector.broadcast %313 : f32 to vector<16x16xf32>
    %317 = arith.mulf %316, %315 : vector<16x16xf32>
    %318 = arith.addf %312, %317 : vector<16x16xf32>
    %c30 = arith.constant 30 : index
    %319 = memref.load %arg1[%c30] : memref<98xf32, #tpu.memory_space<smem>>
    %c0_196 = arith.constant 0 : index
    %c4_197 = arith.constant 4 : index
    %c2_198 = arith.constant 2 : index
    %320 = vector.load %arg4[%c0_196, %c4_197, %c2_198] : memref<2x22x22xf32, #tpu.memory_space<vmem>>, vector<1x16x16xf32>
    %321 = vector.shape_cast %320 : vector<1x16x16xf32> to vector<16x16xf32>
    %322 = vector.broadcast %319 : f32 to vector<16x16xf32>
    %323 = arith.mulf %322, %321 : vector<16x16xf32>
    %324 = arith.addf %318, %323 : vector<16x16xf32>
    %c31 = arith.constant 31 : index
    %325 = memref.load %arg1[%c31] : memref<98xf32, #tpu.memory_space<smem>>
    %c0_199 = arith.constant 0 : index
    %c4_200 = arith.constant 4 : index
    %c3_201 = arith.constant 3 : index
    %326 = vector.load %arg4[%c0_199, %c4_200, %c3_201] : memref<2x22x22xf32, #tpu.memory_space<vmem>>, vector<1x16x16xf32>
    %327 = vector.shape_cast %326 : vector<1x16x16xf32> to vector<16x16xf32>
    %328 = vector.broadcast %325 : f32 to vector<16x16xf32>
    %329 = arith.mulf %328, %327 : vector<16x16xf32>
    %330 = arith.addf %324, %329 : vector<16x16xf32>
    %c32 = arith.constant 32 : index
    %331 = memref.load %arg1[%c32] : memref<98xf32, #tpu.memory_space<smem>>
    %c0_202 = arith.constant 0 : index
    %c4_203 = arith.constant 4 : index
    %c4_204 = arith.constant 4 : index
    %332 = vector.load %arg4[%c0_202, %c4_203, %c4_204] : memref<2x22x22xf32, #tpu.memory_space<vmem>>, vector<1x16x16xf32>
    %333 = vector.shape_cast %332 : vector<1x16x16xf32> to vector<16x16xf32>
    %334 = vector.broadcast %331 : f32 to vector<16x16xf32>
    %335 = arith.mulf %334, %333 : vector<16x16xf32>
    %336 = arith.addf %330, %335 : vector<16x16xf32>
    %c33 = arith.constant 33 : index
    %337 = memref.load %arg1[%c33] : memref<98xf32, #tpu.memory_space<smem>>
    %c0_205 = arith.constant 0 : index
    %c4_206 = arith.constant 4 : index
    %c5_207 = arith.constant 5 : index
    %338 = vector.load %arg4[%c0_205, %c4_206, %c5_207] : memref<2x22x22xf32, #tpu.memory_space<vmem>>, vector<1x16x16xf32>
    %339 = vector.shape_cast %338 : vector<1x16x16xf32> to vector<16x16xf32>
    %340 = vector.broadcast %337 : f32 to vector<16x16xf32>
    %341 = arith.mulf %340, %339 : vector<16x16xf32>
    %342 = arith.addf %336, %341 : vector<16x16xf32>
    %c34 = arith.constant 34 : index
    %343 = memref.load %arg1[%c34] : memref<98xf32, #tpu.memory_space<smem>>
    %c0_208 = arith.constant 0 : index
    %c4_209 = arith.constant 4 : index
    %c6_210 = arith.constant 6 : index
    %344 = vector.load %arg4[%c0_208, %c4_209, %c6_210] : memref<2x22x22xf32, #tpu.memory_space<vmem>>, vector<1x16x16xf32>
    %345 = vector.shape_cast %344 : vector<1x16x16xf32> to vector<16x16xf32>
    %346 = vector.broadcast %343 : f32 to vector<16x16xf32>
    %347 = arith.mulf %346, %345 : vector<16x16xf32>
    %348 = arith.addf %342, %347 : vector<16x16xf32>
    %c35 = arith.constant 35 : index
    %349 = memref.load %arg1[%c35] : memref<98xf32, #tpu.memory_space<smem>>
    %c0_211 = arith.constant 0 : index
    %c5_212 = arith.constant 5 : index
    %c0_213 = arith.constant 0 : index
    %350 = vector.load %arg4[%c0_211, %c5_212, %c0_213] : memref<2x22x22xf32, #tpu.memory_space<vmem>>, vector<1x16x16xf32>
    %351 = vector.shape_cast %350 : vector<1x16x16xf32> to vector<16x16xf32>
    %352 = vector.broadcast %349 : f32 to vector<16x16xf32>
    %353 = arith.mulf %352, %351 : vector<16x16xf32>
    %354 = arith.addf %348, %353 : vector<16x16xf32>
    %c36 = arith.constant 36 : index
    %355 = memref.load %arg1[%c36] : memref<98xf32, #tpu.memory_space<smem>>
    %c0_214 = arith.constant 0 : index
    %c5_215 = arith.constant 5 : index
    %c1_216 = arith.constant 1 : index
    %356 = vector.load %arg4[%c0_214, %c5_215, %c1_216] : memref<2x22x22xf32, #tpu.memory_space<vmem>>, vector<1x16x16xf32>
    %357 = vector.shape_cast %356 : vector<1x16x16xf32> to vector<16x16xf32>
    %358 = vector.broadcast %355 : f32 to vector<16x16xf32>
    %359 = arith.mulf %358, %357 : vector<16x16xf32>
    %360 = arith.addf %354, %359 : vector<16x16xf32>
    %c37 = arith.constant 37 : index
    %361 = memref.load %arg1[%c37] : memref<98xf32, #tpu.memory_space<smem>>
    %c0_217 = arith.constant 0 : index
    %c5_218 = arith.constant 5 : index
    %c2_219 = arith.constant 2 : index
    %362 = vector.load %arg4[%c0_217, %c5_218, %c2_219] : memref<2x22x22xf32, #tpu.memory_space<vmem>>, vector<1x16x16xf32>
    %363 = vector.shape_cast %362 : vector<1x16x16xf32> to vector<16x16xf32>
    %364 = vector.broadcast %361 : f32 to vector<16x16xf32>
    %365 = arith.mulf %364, %363 : vector<16x16xf32>
    %366 = arith.addf %360, %365 : vector<16x16xf32>
    %c38 = arith.constant 38 : index
    %367 = memref.load %arg1[%c38] : memref<98xf32, #tpu.memory_space<smem>>
    %c0_220 = arith.constant 0 : index
    %c5_221 = arith.constant 5 : index
    %c3_222 = arith.constant 3 : index
    %368 = vector.load %arg4[%c0_220, %c5_221, %c3_222] : memref<2x22x22xf32, #tpu.memory_space<vmem>>, vector<1x16x16xf32>
    %369 = vector.shape_cast %368 : vector<1x16x16xf32> to vector<16x16xf32>
    %370 = vector.broadcast %367 : f32 to vector<16x16xf32>
    %371 = arith.mulf %370, %369 : vector<16x16xf32>
    %372 = arith.addf %366, %371 : vector<16x16xf32>
    %c39 = arith.constant 39 : index
    %373 = memref.load %arg1[%c39] : memref<98xf32, #tpu.memory_space<smem>>
    %c0_223 = arith.constant 0 : index
    %c5_224 = arith.constant 5 : index
    %c4_225 = arith.constant 4 : index
    %374 = vector.load %arg4[%c0_223, %c5_224, %c4_225] : memref<2x22x22xf32, #tpu.memory_space<vmem>>, vector<1x16x16xf32>
    %375 = vector.shape_cast %374 : vector<1x16x16xf32> to vector<16x16xf32>
    %376 = vector.broadcast %373 : f32 to vector<16x16xf32>
    %377 = arith.mulf %376, %375 : vector<16x16xf32>
    %378 = arith.addf %372, %377 : vector<16x16xf32>
    %c40 = arith.constant 40 : index
    %379 = memref.load %arg1[%c40] : memref<98xf32, #tpu.memory_space<smem>>
    %c0_226 = arith.constant 0 : index
    %c5_227 = arith.constant 5 : index
    %c5_228 = arith.constant 5 : index
    %380 = vector.load %arg4[%c0_226, %c5_227, %c5_228] : memref<2x22x22xf32, #tpu.memory_space<vmem>>, vector<1x16x16xf32>
    %381 = vector.shape_cast %380 : vector<1x16x16xf32> to vector<16x16xf32>
    %382 = vector.broadcast %379 : f32 to vector<16x16xf32>
    %383 = arith.mulf %382, %381 : vector<16x16xf32>
    %384 = arith.addf %378, %383 : vector<16x16xf32>
    %c41 = arith.constant 41 : index
    %385 = memref.load %arg1[%c41] : memref<98xf32, #tpu.memory_space<smem>>
    %c0_229 = arith.constant 0 : index
    %c5_230 = arith.constant 5 : index
    %c6_231 = arith.constant 6 : index
    %386 = vector.load %arg4[%c0_229, %c5_230, %c6_231] : memref<2x22x22xf32, #tpu.memory_space<vmem>>, vector<1x16x16xf32>
    %387 = vector.shape_cast %386 : vector<1x16x16xf32> to vector<16x16xf32>
    %388 = vector.broadcast %385 : f32 to vector<16x16xf32>
    %389 = arith.mulf %388, %387 : vector<16x16xf32>
    %390 = arith.addf %384, %389 : vector<16x16xf32>
    %c42 = arith.constant 42 : index
    %391 = memref.load %arg1[%c42] : memref<98xf32, #tpu.memory_space<smem>>
    %c0_232 = arith.constant 0 : index
    %c6_233 = arith.constant 6 : index
    %c0_234 = arith.constant 0 : index
    %392 = vector.load %arg4[%c0_232, %c6_233, %c0_234] : memref<2x22x22xf32, #tpu.memory_space<vmem>>, vector<1x16x16xf32>
    %393 = vector.shape_cast %392 : vector<1x16x16xf32> to vector<16x16xf32>
    %394 = vector.broadcast %391 : f32 to vector<16x16xf32>
    %395 = arith.mulf %394, %393 : vector<16x16xf32>
    %396 = arith.addf %390, %395 : vector<16x16xf32>
    %c43 = arith.constant 43 : index
    %397 = memref.load %arg1[%c43] : memref<98xf32, #tpu.memory_space<smem>>
    %c0_235 = arith.constant 0 : index
    %c6_236 = arith.constant 6 : index
    %c1_237 = arith.constant 1 : index
    %398 = vector.load %arg4[%c0_235, %c6_236, %c1_237] : memref<2x22x22xf32, #tpu.memory_space<vmem>>, vector<1x16x16xf32>
    %399 = vector.shape_cast %398 : vector<1x16x16xf32> to vector<16x16xf32>
    %400 = vector.broadcast %397 : f32 to vector<16x16xf32>
    %401 = arith.mulf %400, %399 : vector<16x16xf32>
    %402 = arith.addf %396, %401 : vector<16x16xf32>
    %c44 = arith.constant 44 : index
    %403 = memref.load %arg1[%c44] : memref<98xf32, #tpu.memory_space<smem>>
    %c0_238 = arith.constant 0 : index
    %c6_239 = arith.constant 6 : index
    %c2_240 = arith.constant 2 : index
    %404 = vector.load %arg4[%c0_238, %c6_239, %c2_240] : memref<2x22x22xf32, #tpu.memory_space<vmem>>, vector<1x16x16xf32>
    %405 = vector.shape_cast %404 : vector<1x16x16xf32> to vector<16x16xf32>
    %406 = vector.broadcast %403 : f32 to vector<16x16xf32>
    %407 = arith.mulf %406, %405 : vector<16x16xf32>
    %408 = arith.addf %402, %407 : vector<16x16xf32>
    %c45 = arith.constant 45 : index
    %409 = memref.load %arg1[%c45] : memref<98xf32, #tpu.memory_space<smem>>
    %c0_241 = arith.constant 0 : index
    %c6_242 = arith.constant 6 : index
    %c3_243 = arith.constant 3 : index
    %410 = vector.load %arg4[%c0_241, %c6_242, %c3_243] : memref<2x22x22xf32, #tpu.memory_space<vmem>>, vector<1x16x16xf32>
    %411 = vector.shape_cast %410 : vector<1x16x16xf32> to vector<16x16xf32>
    %412 = vector.broadcast %409 : f32 to vector<16x16xf32>
    %413 = arith.mulf %412, %411 : vector<16x16xf32>
    %414 = arith.addf %408, %413 : vector<16x16xf32>
    %c46 = arith.constant 46 : index
    %415 = memref.load %arg1[%c46] : memref<98xf32, #tpu.memory_space<smem>>
    %c0_244 = arith.constant 0 : index
    %c6_245 = arith.constant 6 : index
    %c4_246 = arith.constant 4 : index
    %416 = vector.load %arg4[%c0_244, %c6_245, %c4_246] : memref<2x22x22xf32, #tpu.memory_space<vmem>>, vector<1x16x16xf32>
    %417 = vector.shape_cast %416 : vector<1x16x16xf32> to vector<16x16xf32>
    %418 = vector.broadcast %415 : f32 to vector<16x16xf32>
    %419 = arith.mulf %418, %417 : vector<16x16xf32>
    %420 = arith.addf %414, %419 : vector<16x16xf32>
    %c47 = arith.constant 47 : index
    %421 = memref.load %arg1[%c47] : memref<98xf32, #tpu.memory_space<smem>>
    %c0_247 = arith.constant 0 : index
    %c6_248 = arith.constant 6 : index
    %c5_249 = arith.constant 5 : index
    %422 = vector.load %arg4[%c0_247, %c6_248, %c5_249] : memref<2x22x22xf32, #tpu.memory_space<vmem>>, vector<1x16x16xf32>
    %423 = vector.shape_cast %422 : vector<1x16x16xf32> to vector<16x16xf32>
    %424 = vector.broadcast %421 : f32 to vector<16x16xf32>
    %425 = arith.mulf %424, %423 : vector<16x16xf32>
    %426 = arith.addf %420, %425 : vector<16x16xf32>
    %c48 = arith.constant 48 : index
    %427 = memref.load %arg1[%c48] : memref<98xf32, #tpu.memory_space<smem>>
    %c0_250 = arith.constant 0 : index
    %c6_251 = arith.constant 6 : index
    %c6_252 = arith.constant 6 : index
    %428 = vector.load %arg4[%c0_250, %c6_251, %c6_252] : memref<2x22x22xf32, #tpu.memory_space<vmem>>, vector<1x16x16xf32>
    %429 = vector.shape_cast %428 : vector<1x16x16xf32> to vector<16x16xf32>
    %430 = vector.broadcast %427 : f32 to vector<16x16xf32>
    %431 = arith.mulf %430, %429 : vector<16x16xf32>
    %432 = arith.addf %426, %431 : vector<16x16xf32>
    %c49 = arith.constant 49 : index
    %433 = memref.load %arg1[%c49] : memref<98xf32, #tpu.memory_space<smem>>
    %c1_253 = arith.constant 1 : index
    %c0_254 = arith.constant 0 : index
    %c0_255 = arith.constant 0 : index
    %434 = vector.load %arg4[%c1_253, %c0_254, %c0_255] : memref<2x22x22xf32, #tpu.memory_space<vmem>>, vector<1x16x16xf32>
    %435 = vector.shape_cast %434 : vector<1x16x16xf32> to vector<16x16xf32>
    %436 = vector.broadcast %433 : f32 to vector<16x16xf32>
    %437 = arith.mulf %436, %435 : vector<16x16xf32>
    %438 = arith.addf %432, %437 : vector<16x16xf32>
    %c50 = arith.constant 50 : index
    %439 = memref.load %arg1[%c50] : memref<98xf32, #tpu.memory_space<smem>>
    %c1_256 = arith.constant 1 : index
    %c0_257 = arith.constant 0 : index
    %c1_258 = arith.constant 1 : index
    %440 = vector.load %arg4[%c1_256, %c0_257, %c1_258] : memref<2x22x22xf32, #tpu.memory_space<vmem>>, vector<1x16x16xf32>
    %441 = vector.shape_cast %440 : vector<1x16x16xf32> to vector<16x16xf32>
    %442 = vector.broadcast %439 : f32 to vector<16x16xf32>
    %443 = arith.mulf %442, %441 : vector<16x16xf32>
    %444 = arith.addf %438, %443 : vector<16x16xf32>
    %c51 = arith.constant 51 : index
    %445 = memref.load %arg1[%c51] : memref<98xf32, #tpu.memory_space<smem>>
    %c1_259 = arith.constant 1 : index
    %c0_260 = arith.constant 0 : index
    %c2_261 = arith.constant 2 : index
    %446 = vector.load %arg4[%c1_259, %c0_260, %c2_261] : memref<2x22x22xf32, #tpu.memory_space<vmem>>, vector<1x16x16xf32>
    %447 = vector.shape_cast %446 : vector<1x16x16xf32> to vector<16x16xf32>
    %448 = vector.broadcast %445 : f32 to vector<16x16xf32>
    %449 = arith.mulf %448, %447 : vector<16x16xf32>
    %450 = arith.addf %444, %449 : vector<16x16xf32>
    %c52 = arith.constant 52 : index
    %451 = memref.load %arg1[%c52] : memref<98xf32, #tpu.memory_space<smem>>
    %c1_262 = arith.constant 1 : index
    %c0_263 = arith.constant 0 : index
    %c3_264 = arith.constant 3 : index
    %452 = vector.load %arg4[%c1_262, %c0_263, %c3_264] : memref<2x22x22xf32, #tpu.memory_space<vmem>>, vector<1x16x16xf32>
    %453 = vector.shape_cast %452 : vector<1x16x16xf32> to vector<16x16xf32>
    %454 = vector.broadcast %451 : f32 to vector<16x16xf32>
    %455 = arith.mulf %454, %453 : vector<16x16xf32>
    %456 = arith.addf %450, %455 : vector<16x16xf32>
    %c53 = arith.constant 53 : index
    %457 = memref.load %arg1[%c53] : memref<98xf32, #tpu.memory_space<smem>>
    %c1_265 = arith.constant 1 : index
    %c0_266 = arith.constant 0 : index
    %c4_267 = arith.constant 4 : index
    %458 = vector.load %arg4[%c1_265, %c0_266, %c4_267] : memref<2x22x22xf32, #tpu.memory_space<vmem>>, vector<1x16x16xf32>
    %459 = vector.shape_cast %458 : vector<1x16x16xf32> to vector<16x16xf32>
    %460 = vector.broadcast %457 : f32 to vector<16x16xf32>
    %461 = arith.mulf %460, %459 : vector<16x16xf32>
    %462 = arith.addf %456, %461 : vector<16x16xf32>
    %c54 = arith.constant 54 : index
    %463 = memref.load %arg1[%c54] : memref<98xf32, #tpu.memory_space<smem>>
    %c1_268 = arith.constant 1 : index
    %c0_269 = arith.constant 0 : index
    %c5_270 = arith.constant 5 : index
    %464 = vector.load %arg4[%c1_268, %c0_269, %c5_270] : memref<2x22x22xf32, #tpu.memory_space<vmem>>, vector<1x16x16xf32>
    %465 = vector.shape_cast %464 : vector<1x16x16xf32> to vector<16x16xf32>
    %466 = vector.broadcast %463 : f32 to vector<16x16xf32>
    %467 = arith.mulf %466, %465 : vector<16x16xf32>
    %468 = arith.addf %462, %467 : vector<16x16xf32>
    %c55 = arith.constant 55 : index
    %469 = memref.load %arg1[%c55] : memref<98xf32, #tpu.memory_space<smem>>
    %c1_271 = arith.constant 1 : index
    %c0_272 = arith.constant 0 : index
    %c6_273 = arith.constant 6 : index
    %470 = vector.load %arg4[%c1_271, %c0_272, %c6_273] : memref<2x22x22xf32, #tpu.memory_space<vmem>>, vector<1x16x16xf32>
    %471 = vector.shape_cast %470 : vector<1x16x16xf32> to vector<16x16xf32>
    %472 = vector.broadcast %469 : f32 to vector<16x16xf32>
    %473 = arith.mulf %472, %471 : vector<16x16xf32>
    %474 = arith.addf %468, %473 : vector<16x16xf32>
    %c56 = arith.constant 56 : index
    %475 = memref.load %arg1[%c56] : memref<98xf32, #tpu.memory_space<smem>>
    %c1_274 = arith.constant 1 : index
    %c1_275 = arith.constant 1 : index
    %c0_276 = arith.constant 0 : index
    %476 = vector.load %arg4[%c1_274, %c1_275, %c0_276] : memref<2x22x22xf32, #tpu.memory_space<vmem>>, vector<1x16x16xf32>
    %477 = vector.shape_cast %476 : vector<1x16x16xf32> to vector<16x16xf32>
    %478 = vector.broadcast %475 : f32 to vector<16x16xf32>
    %479 = arith.mulf %478, %477 : vector<16x16xf32>
    %480 = arith.addf %474, %479 : vector<16x16xf32>
    %c57 = arith.constant 57 : index
    %481 = memref.load %arg1[%c57] : memref<98xf32, #tpu.memory_space<smem>>
    %c1_277 = arith.constant 1 : index
    %c1_278 = arith.constant 1 : index
    %c1_279 = arith.constant 1 : index
    %482 = vector.load %arg4[%c1_277, %c1_278, %c1_279] : memref<2x22x22xf32, #tpu.memory_space<vmem>>, vector<1x16x16xf32>
    %483 = vector.shape_cast %482 : vector<1x16x16xf32> to vector<16x16xf32>
    %484 = vector.broadcast %481 : f32 to vector<16x16xf32>
    %485 = arith.mulf %484, %483 : vector<16x16xf32>
    %486 = arith.addf %480, %485 : vector<16x16xf32>
    %c58 = arith.constant 58 : index
    %487 = memref.load %arg1[%c58] : memref<98xf32, #tpu.memory_space<smem>>
    %c1_280 = arith.constant 1 : index
    %c1_281 = arith.constant 1 : index
    %c2_282 = arith.constant 2 : index
    %488 = vector.load %arg4[%c1_280, %c1_281, %c2_282] : memref<2x22x22xf32, #tpu.memory_space<vmem>>, vector<1x16x16xf32>
    %489 = vector.shape_cast %488 : vector<1x16x16xf32> to vector<16x16xf32>
    %490 = vector.broadcast %487 : f32 to vector<16x16xf32>
    %491 = arith.mulf %490, %489 : vector<16x16xf32>
    %492 = arith.addf %486, %491 : vector<16x16xf32>
    %c59 = arith.constant 59 : index
    %493 = memref.load %arg1[%c59] : memref<98xf32, #tpu.memory_space<smem>>
    %c1_283 = arith.constant 1 : index
    %c1_284 = arith.constant 1 : index
    %c3_285 = arith.constant 3 : index
    %494 = vector.load %arg4[%c1_283, %c1_284, %c3_285] : memref<2x22x22xf32, #tpu.memory_space<vmem>>, vector<1x16x16xf32>
    %495 = vector.shape_cast %494 : vector<1x16x16xf32> to vector<16x16xf32>
    %496 = vector.broadcast %493 : f32 to vector<16x16xf32>
    %497 = arith.mulf %496, %495 : vector<16x16xf32>
    %498 = arith.addf %492, %497 : vector<16x16xf32>
    %c60 = arith.constant 60 : index
    %499 = memref.load %arg1[%c60] : memref<98xf32, #tpu.memory_space<smem>>
    %c1_286 = arith.constant 1 : index
    %c1_287 = arith.constant 1 : index
    %c4_288 = arith.constant 4 : index
    %500 = vector.load %arg4[%c1_286, %c1_287, %c4_288] : memref<2x22x22xf32, #tpu.memory_space<vmem>>, vector<1x16x16xf32>
    %501 = vector.shape_cast %500 : vector<1x16x16xf32> to vector<16x16xf32>
    %502 = vector.broadcast %499 : f32 to vector<16x16xf32>
    %503 = arith.mulf %502, %501 : vector<16x16xf32>
    %504 = arith.addf %498, %503 : vector<16x16xf32>
    %c61 = arith.constant 61 : index
    %505 = memref.load %arg1[%c61] : memref<98xf32, #tpu.memory_space<smem>>
    %c1_289 = arith.constant 1 : index
    %c1_290 = arith.constant 1 : index
    %c5_291 = arith.constant 5 : index
    %506 = vector.load %arg4[%c1_289, %c1_290, %c5_291] : memref<2x22x22xf32, #tpu.memory_space<vmem>>, vector<1x16x16xf32>
    %507 = vector.shape_cast %506 : vector<1x16x16xf32> to vector<16x16xf32>
    %508 = vector.broadcast %505 : f32 to vector<16x16xf32>
    %509 = arith.mulf %508, %507 : vector<16x16xf32>
    %510 = arith.addf %504, %509 : vector<16x16xf32>
    %c62 = arith.constant 62 : index
    %511 = memref.load %arg1[%c62] : memref<98xf32, #tpu.memory_space<smem>>
    %c1_292 = arith.constant 1 : index
    %c1_293 = arith.constant 1 : index
    %c6_294 = arith.constant 6 : index
    %512 = vector.load %arg4[%c1_292, %c1_293, %c6_294] : memref<2x22x22xf32, #tpu.memory_space<vmem>>, vector<1x16x16xf32>
    %513 = vector.shape_cast %512 : vector<1x16x16xf32> to vector<16x16xf32>
    %514 = vector.broadcast %511 : f32 to vector<16x16xf32>
    %515 = arith.mulf %514, %513 : vector<16x16xf32>
    %516 = arith.addf %510, %515 : vector<16x16xf32>
    %c63 = arith.constant 63 : index
    %517 = memref.load %arg1[%c63] : memref<98xf32, #tpu.memory_space<smem>>
    %c1_295 = arith.constant 1 : index
    %c2_296 = arith.constant 2 : index
    %c0_297 = arith.constant 0 : index
    %518 = vector.load %arg4[%c1_295, %c2_296, %c0_297] : memref<2x22x22xf32, #tpu.memory_space<vmem>>, vector<1x16x16xf32>
    %519 = vector.shape_cast %518 : vector<1x16x16xf32> to vector<16x16xf32>
    %520 = vector.broadcast %517 : f32 to vector<16x16xf32>
    %521 = arith.mulf %520, %519 : vector<16x16xf32>
    %522 = arith.addf %516, %521 : vector<16x16xf32>
    %c64 = arith.constant 64 : index
    %523 = memref.load %arg1[%c64] : memref<98xf32, #tpu.memory_space<smem>>
    %c1_298 = arith.constant 1 : index
    %c2_299 = arith.constant 2 : index
    %c1_300 = arith.constant 1 : index
    %524 = vector.load %arg4[%c1_298, %c2_299, %c1_300] : memref<2x22x22xf32, #tpu.memory_space<vmem>>, vector<1x16x16xf32>
    %525 = vector.shape_cast %524 : vector<1x16x16xf32> to vector<16x16xf32>
    %526 = vector.broadcast %523 : f32 to vector<16x16xf32>
    %527 = arith.mulf %526, %525 : vector<16x16xf32>
    %528 = arith.addf %522, %527 : vector<16x16xf32>
    %c65 = arith.constant 65 : index
    %529 = memref.load %arg1[%c65] : memref<98xf32, #tpu.memory_space<smem>>
    %c1_301 = arith.constant 1 : index
    %c2_302 = arith.constant 2 : index
    %c2_303 = arith.constant 2 : index
    %530 = vector.load %arg4[%c1_301, %c2_302, %c2_303] : memref<2x22x22xf32, #tpu.memory_space<vmem>>, vector<1x16x16xf32>
    %531 = vector.shape_cast %530 : vector<1x16x16xf32> to vector<16x16xf32>
    %532 = vector.broadcast %529 : f32 to vector<16x16xf32>
    %533 = arith.mulf %532, %531 : vector<16x16xf32>
    %534 = arith.addf %528, %533 : vector<16x16xf32>
    %c66 = arith.constant 66 : index
    %535 = memref.load %arg1[%c66] : memref<98xf32, #tpu.memory_space<smem>>
    %c1_304 = arith.constant 1 : index
    %c2_305 = arith.constant 2 : index
    %c3_306 = arith.constant 3 : index
    %536 = vector.load %arg4[%c1_304, %c2_305, %c3_306] : memref<2x22x22xf32, #tpu.memory_space<vmem>>, vector<1x16x16xf32>
    %537 = vector.shape_cast %536 : vector<1x16x16xf32> to vector<16x16xf32>
    %538 = vector.broadcast %535 : f32 to vector<16x16xf32>
    %539 = arith.mulf %538, %537 : vector<16x16xf32>
    %540 = arith.addf %534, %539 : vector<16x16xf32>
    %c67 = arith.constant 67 : index
    %541 = memref.load %arg1[%c67] : memref<98xf32, #tpu.memory_space<smem>>
    %c1_307 = arith.constant 1 : index
    %c2_308 = arith.constant 2 : index
    %c4_309 = arith.constant 4 : index
    %542 = vector.load %arg4[%c1_307, %c2_308, %c4_309] : memref<2x22x22xf32, #tpu.memory_space<vmem>>, vector<1x16x16xf32>
    %543 = vector.shape_cast %542 : vector<1x16x16xf32> to vector<16x16xf32>
    %544 = vector.broadcast %541 : f32 to vector<16x16xf32>
    %545 = arith.mulf %544, %543 : vector<16x16xf32>
    %546 = arith.addf %540, %545 : vector<16x16xf32>
    %c68 = arith.constant 68 : index
    %547 = memref.load %arg1[%c68] : memref<98xf32, #tpu.memory_space<smem>>
    %c1_310 = arith.constant 1 : index
    %c2_311 = arith.constant 2 : index
    %c5_312 = arith.constant 5 : index
    %548 = vector.load %arg4[%c1_310, %c2_311, %c5_312] : memref<2x22x22xf32, #tpu.memory_space<vmem>>, vector<1x16x16xf32>
    %549 = vector.shape_cast %548 : vector<1x16x16xf32> to vector<16x16xf32>
    %550 = vector.broadcast %547 : f32 to vector<16x16xf32>
    %551 = arith.mulf %550, %549 : vector<16x16xf32>
    %552 = arith.addf %546, %551 : vector<16x16xf32>
    %c69 = arith.constant 69 : index
    %553 = memref.load %arg1[%c69] : memref<98xf32, #tpu.memory_space<smem>>
    %c1_313 = arith.constant 1 : index
    %c2_314 = arith.constant 2 : index
    %c6_315 = arith.constant 6 : index
    %554 = vector.load %arg4[%c1_313, %c2_314, %c6_315] : memref<2x22x22xf32, #tpu.memory_space<vmem>>, vector<1x16x16xf32>
    %555 = vector.shape_cast %554 : vector<1x16x16xf32> to vector<16x16xf32>
    %556 = vector.broadcast %553 : f32 to vector<16x16xf32>
    %557 = arith.mulf %556, %555 : vector<16x16xf32>
    %558 = arith.addf %552, %557 : vector<16x16xf32>
    %c70 = arith.constant 70 : index
    %559 = memref.load %arg1[%c70] : memref<98xf32, #tpu.memory_space<smem>>
    %c1_316 = arith.constant 1 : index
    %c3_317 = arith.constant 3 : index
    %c0_318 = arith.constant 0 : index
    %560 = vector.load %arg4[%c1_316, %c3_317, %c0_318] : memref<2x22x22xf32, #tpu.memory_space<vmem>>, vector<1x16x16xf32>
    %561 = vector.shape_cast %560 : vector<1x16x16xf32> to vector<16x16xf32>
    %562 = vector.broadcast %559 : f32 to vector<16x16xf32>
    %563 = arith.mulf %562, %561 : vector<16x16xf32>
    %564 = arith.addf %558, %563 : vector<16x16xf32>
    %c71 = arith.constant 71 : index
    %565 = memref.load %arg1[%c71] : memref<98xf32, #tpu.memory_space<smem>>
    %c1_319 = arith.constant 1 : index
    %c3_320 = arith.constant 3 : index
    %c1_321 = arith.constant 1 : index
    %566 = vector.load %arg4[%c1_319, %c3_320, %c1_321] : memref<2x22x22xf32, #tpu.memory_space<vmem>>, vector<1x16x16xf32>
    %567 = vector.shape_cast %566 : vector<1x16x16xf32> to vector<16x16xf32>
    %568 = vector.broadcast %565 : f32 to vector<16x16xf32>
    %569 = arith.mulf %568, %567 : vector<16x16xf32>
    %570 = arith.addf %564, %569 : vector<16x16xf32>
    %c72 = arith.constant 72 : index
    %571 = memref.load %arg1[%c72] : memref<98xf32, #tpu.memory_space<smem>>
    %c1_322 = arith.constant 1 : index
    %c3_323 = arith.constant 3 : index
    %c2_324 = arith.constant 2 : index
    %572 = vector.load %arg4[%c1_322, %c3_323, %c2_324] : memref<2x22x22xf32, #tpu.memory_space<vmem>>, vector<1x16x16xf32>
    %573 = vector.shape_cast %572 : vector<1x16x16xf32> to vector<16x16xf32>
    %574 = vector.broadcast %571 : f32 to vector<16x16xf32>
    %575 = arith.mulf %574, %573 : vector<16x16xf32>
    %576 = arith.addf %570, %575 : vector<16x16xf32>
    %c73 = arith.constant 73 : index
    %577 = memref.load %arg1[%c73] : memref<98xf32, #tpu.memory_space<smem>>
    %c1_325 = arith.constant 1 : index
    %c3_326 = arith.constant 3 : index
    %c3_327 = arith.constant 3 : index
    %578 = vector.load %arg4[%c1_325, %c3_326, %c3_327] : memref<2x22x22xf32, #tpu.memory_space<vmem>>, vector<1x16x16xf32>
    %579 = vector.shape_cast %578 : vector<1x16x16xf32> to vector<16x16xf32>
    %580 = vector.broadcast %577 : f32 to vector<16x16xf32>
    %581 = arith.mulf %580, %579 : vector<16x16xf32>
    %582 = arith.addf %576, %581 : vector<16x16xf32>
    %c74 = arith.constant 74 : index
    %583 = memref.load %arg1[%c74] : memref<98xf32, #tpu.memory_space<smem>>
    %c1_328 = arith.constant 1 : index
    %c3_329 = arith.constant 3 : index
    %c4_330 = arith.constant 4 : index
    %584 = vector.load %arg4[%c1_328, %c3_329, %c4_330] : memref<2x22x22xf32, #tpu.memory_space<vmem>>, vector<1x16x16xf32>
    %585 = vector.shape_cast %584 : vector<1x16x16xf32> to vector<16x16xf32>
    %586 = vector.broadcast %583 : f32 to vector<16x16xf32>
    %587 = arith.mulf %586, %585 : vector<16x16xf32>
    %588 = arith.addf %582, %587 : vector<16x16xf32>
    %c75 = arith.constant 75 : index
    %589 = memref.load %arg1[%c75] : memref<98xf32, #tpu.memory_space<smem>>
    %c1_331 = arith.constant 1 : index
    %c3_332 = arith.constant 3 : index
    %c5_333 = arith.constant 5 : index
    %590 = vector.load %arg4[%c1_331, %c3_332, %c5_333] : memref<2x22x22xf32, #tpu.memory_space<vmem>>, vector<1x16x16xf32>
    %591 = vector.shape_cast %590 : vector<1x16x16xf32> to vector<16x16xf32>
    %592 = vector.broadcast %589 : f32 to vector<16x16xf32>
    %593 = arith.mulf %592, %591 : vector<16x16xf32>
    %594 = arith.addf %588, %593 : vector<16x16xf32>
    %c76 = arith.constant 76 : index
    %595 = memref.load %arg1[%c76] : memref<98xf32, #tpu.memory_space<smem>>
    %c1_334 = arith.constant 1 : index
    %c3_335 = arith.constant 3 : index
    %c6_336 = arith.constant 6 : index
    %596 = vector.load %arg4[%c1_334, %c3_335, %c6_336] : memref<2x22x22xf32, #tpu.memory_space<vmem>>, vector<1x16x16xf32>
    %597 = vector.shape_cast %596 : vector<1x16x16xf32> to vector<16x16xf32>
    %598 = vector.broadcast %595 : f32 to vector<16x16xf32>
    %599 = arith.mulf %598, %597 : vector<16x16xf32>
    %600 = arith.addf %594, %599 : vector<16x16xf32>
    %c77 = arith.constant 77 : index
    %601 = memref.load %arg1[%c77] : memref<98xf32, #tpu.memory_space<smem>>
    %c1_337 = arith.constant 1 : index
    %c4_338 = arith.constant 4 : index
    %c0_339 = arith.constant 0 : index
    %602 = vector.load %arg4[%c1_337, %c4_338, %c0_339] : memref<2x22x22xf32, #tpu.memory_space<vmem>>, vector<1x16x16xf32>
    %603 = vector.shape_cast %602 : vector<1x16x16xf32> to vector<16x16xf32>
    %604 = vector.broadcast %601 : f32 to vector<16x16xf32>
    %605 = arith.mulf %604, %603 : vector<16x16xf32>
    %606 = arith.addf %600, %605 : vector<16x16xf32>
    %c78 = arith.constant 78 : index
    %607 = memref.load %arg1[%c78] : memref<98xf32, #tpu.memory_space<smem>>
    %c1_340 = arith.constant 1 : index
    %c4_341 = arith.constant 4 : index
    %c1_342 = arith.constant 1 : index
    %608 = vector.load %arg4[%c1_340, %c4_341, %c1_342] : memref<2x22x22xf32, #tpu.memory_space<vmem>>, vector<1x16x16xf32>
    %609 = vector.shape_cast %608 : vector<1x16x16xf32> to vector<16x16xf32>
    %610 = vector.broadcast %607 : f32 to vector<16x16xf32>
    %611 = arith.mulf %610, %609 : vector<16x16xf32>
    %612 = arith.addf %606, %611 : vector<16x16xf32>
    %c79 = arith.constant 79 : index
    %613 = memref.load %arg1[%c79] : memref<98xf32, #tpu.memory_space<smem>>
    %c1_343 = arith.constant 1 : index
    %c4_344 = arith.constant 4 : index
    %c2_345 = arith.constant 2 : index
    %614 = vector.load %arg4[%c1_343, %c4_344, %c2_345] : memref<2x22x22xf32, #tpu.memory_space<vmem>>, vector<1x16x16xf32>
    %615 = vector.shape_cast %614 : vector<1x16x16xf32> to vector<16x16xf32>
    %616 = vector.broadcast %613 : f32 to vector<16x16xf32>
    %617 = arith.mulf %616, %615 : vector<16x16xf32>
    %618 = arith.addf %612, %617 : vector<16x16xf32>
    %c80 = arith.constant 80 : index
    %619 = memref.load %arg1[%c80] : memref<98xf32, #tpu.memory_space<smem>>
    %c1_346 = arith.constant 1 : index
    %c4_347 = arith.constant 4 : index
    %c3_348 = arith.constant 3 : index
    %620 = vector.load %arg4[%c1_346, %c4_347, %c3_348] : memref<2x22x22xf32, #tpu.memory_space<vmem>>, vector<1x16x16xf32>
    %621 = vector.shape_cast %620 : vector<1x16x16xf32> to vector<16x16xf32>
    %622 = vector.broadcast %619 : f32 to vector<16x16xf32>
    %623 = arith.mulf %622, %621 : vector<16x16xf32>
    %624 = arith.addf %618, %623 : vector<16x16xf32>
    %c81 = arith.constant 81 : index
    %625 = memref.load %arg1[%c81] : memref<98xf32, #tpu.memory_space<smem>>
    %c1_349 = arith.constant 1 : index
    %c4_350 = arith.constant 4 : index
    %c4_351 = arith.constant 4 : index
    %626 = vector.load %arg4[%c1_349, %c4_350, %c4_351] : memref<2x22x22xf32, #tpu.memory_space<vmem>>, vector<1x16x16xf32>
    %627 = vector.shape_cast %626 : vector<1x16x16xf32> to vector<16x16xf32>
    %628 = vector.broadcast %625 : f32 to vector<16x16xf32>
    %629 = arith.mulf %628, %627 : vector<16x16xf32>
    %630 = arith.addf %624, %629 : vector<16x16xf32>
    %c82 = arith.constant 82 : index
    %631 = memref.load %arg1[%c82] : memref<98xf32, #tpu.memory_space<smem>>
    %c1_352 = arith.constant 1 : index
    %c4_353 = arith.constant 4 : index
    %c5_354 = arith.constant 5 : index
    %632 = vector.load %arg4[%c1_352, %c4_353, %c5_354] : memref<2x22x22xf32, #tpu.memory_space<vmem>>, vector<1x16x16xf32>
    %633 = vector.shape_cast %632 : vector<1x16x16xf32> to vector<16x16xf32>
    %634 = vector.broadcast %631 : f32 to vector<16x16xf32>
    %635 = arith.mulf %634, %633 : vector<16x16xf32>
    %636 = arith.addf %630, %635 : vector<16x16xf32>
    %c83 = arith.constant 83 : index
    %637 = memref.load %arg1[%c83] : memref<98xf32, #tpu.memory_space<smem>>
    %c1_355 = arith.constant 1 : index
    %c4_356 = arith.constant 4 : index
    %c6_357 = arith.constant 6 : index
    %638 = vector.load %arg4[%c1_355, %c4_356, %c6_357] : memref<2x22x22xf32, #tpu.memory_space<vmem>>, vector<1x16x16xf32>
    %639 = vector.shape_cast %638 : vector<1x16x16xf32> to vector<16x16xf32>
    %640 = vector.broadcast %637 : f32 to vector<16x16xf32>
    %641 = arith.mulf %640, %639 : vector<16x16xf32>
    %642 = arith.addf %636, %641 : vector<16x16xf32>
    %c84 = arith.constant 84 : index
    %643 = memref.load %arg1[%c84] : memref<98xf32, #tpu.memory_space<smem>>
    %c1_358 = arith.constant 1 : index
    %c5_359 = arith.constant 5 : index
    %c0_360 = arith.constant 0 : index
    %644 = vector.load %arg4[%c1_358, %c5_359, %c0_360] : memref<2x22x22xf32, #tpu.memory_space<vmem>>, vector<1x16x16xf32>
    %645 = vector.shape_cast %644 : vector<1x16x16xf32> to vector<16x16xf32>
    %646 = vector.broadcast %643 : f32 to vector<16x16xf32>
    %647 = arith.mulf %646, %645 : vector<16x16xf32>
    %648 = arith.addf %642, %647 : vector<16x16xf32>
    %c85 = arith.constant 85 : index
    %649 = memref.load %arg1[%c85] : memref<98xf32, #tpu.memory_space<smem>>
    %c1_361 = arith.constant 1 : index
    %c5_362 = arith.constant 5 : index
    %c1_363 = arith.constant 1 : index
    %650 = vector.load %arg4[%c1_361, %c5_362, %c1_363] : memref<2x22x22xf32, #tpu.memory_space<vmem>>, vector<1x16x16xf32>
    %651 = vector.shape_cast %650 : vector<1x16x16xf32> to vector<16x16xf32>
    %652 = vector.broadcast %649 : f32 to vector<16x16xf32>
    %653 = arith.mulf %652, %651 : vector<16x16xf32>
    %654 = arith.addf %648, %653 : vector<16x16xf32>
    %c86 = arith.constant 86 : index
    %655 = memref.load %arg1[%c86] : memref<98xf32, #tpu.memory_space<smem>>
    %c1_364 = arith.constant 1 : index
    %c5_365 = arith.constant 5 : index
    %c2_366 = arith.constant 2 : index
    %656 = vector.load %arg4[%c1_364, %c5_365, %c2_366] : memref<2x22x22xf32, #tpu.memory_space<vmem>>, vector<1x16x16xf32>
    %657 = vector.shape_cast %656 : vector<1x16x16xf32> to vector<16x16xf32>
    %658 = vector.broadcast %655 : f32 to vector<16x16xf32>
    %659 = arith.mulf %658, %657 : vector<16x16xf32>
    %660 = arith.addf %654, %659 : vector<16x16xf32>
    %c87 = arith.constant 87 : index
    %661 = memref.load %arg1[%c87] : memref<98xf32, #tpu.memory_space<smem>>
    %c1_367 = arith.constant 1 : index
    %c5_368 = arith.constant 5 : index
    %c3_369 = arith.constant 3 : index
    %662 = vector.load %arg4[%c1_367, %c5_368, %c3_369] : memref<2x22x22xf32, #tpu.memory_space<vmem>>, vector<1x16x16xf32>
    %663 = vector.shape_cast %662 : vector<1x16x16xf32> to vector<16x16xf32>
    %664 = vector.broadcast %661 : f32 to vector<16x16xf32>
    %665 = arith.mulf %664, %663 : vector<16x16xf32>
    %666 = arith.addf %660, %665 : vector<16x16xf32>
    %c88 = arith.constant 88 : index
    %667 = memref.load %arg1[%c88] : memref<98xf32, #tpu.memory_space<smem>>
    %c1_370 = arith.constant 1 : index
    %c5_371 = arith.constant 5 : index
    %c4_372 = arith.constant 4 : index
    %668 = vector.load %arg4[%c1_370, %c5_371, %c4_372] : memref<2x22x22xf32, #tpu.memory_space<vmem>>, vector<1x16x16xf32>
    %669 = vector.shape_cast %668 : vector<1x16x16xf32> to vector<16x16xf32>
    %670 = vector.broadcast %667 : f32 to vector<16x16xf32>
    %671 = arith.mulf %670, %669 : vector<16x16xf32>
    %672 = arith.addf %666, %671 : vector<16x16xf32>
    %c89 = arith.constant 89 : index
    %673 = memref.load %arg1[%c89] : memref<98xf32, #tpu.memory_space<smem>>
    %c1_373 = arith.constant 1 : index
    %c5_374 = arith.constant 5 : index
    %c5_375 = arith.constant 5 : index
    %674 = vector.load %arg4[%c1_373, %c5_374, %c5_375] : memref<2x22x22xf32, #tpu.memory_space<vmem>>, vector<1x16x16xf32>
    %675 = vector.shape_cast %674 : vector<1x16x16xf32> to vector<16x16xf32>
    %676 = vector.broadcast %673 : f32 to vector<16x16xf32>
    %677 = arith.mulf %676, %675 : vector<16x16xf32>
    %678 = arith.addf %672, %677 : vector<16x16xf32>
    %c90 = arith.constant 90 : index
    %679 = memref.load %arg1[%c90] : memref<98xf32, #tpu.memory_space<smem>>
    %c1_376 = arith.constant 1 : index
    %c5_377 = arith.constant 5 : index
    %c6_378 = arith.constant 6 : index
    %680 = vector.load %arg4[%c1_376, %c5_377, %c6_378] : memref<2x22x22xf32, #tpu.memory_space<vmem>>, vector<1x16x16xf32>
    %681 = vector.shape_cast %680 : vector<1x16x16xf32> to vector<16x16xf32>
    %682 = vector.broadcast %679 : f32 to vector<16x16xf32>
    %683 = arith.mulf %682, %681 : vector<16x16xf32>
    %684 = arith.addf %678, %683 : vector<16x16xf32>
    %c91 = arith.constant 91 : index
    %685 = memref.load %arg1[%c91] : memref<98xf32, #tpu.memory_space<smem>>
    %c1_379 = arith.constant 1 : index
    %c6_380 = arith.constant 6 : index
    %c0_381 = arith.constant 0 : index
    %686 = vector.load %arg4[%c1_379, %c6_380, %c0_381] : memref<2x22x22xf32, #tpu.memory_space<vmem>>, vector<1x16x16xf32>
    %687 = vector.shape_cast %686 : vector<1x16x16xf32> to vector<16x16xf32>
    %688 = vector.broadcast %685 : f32 to vector<16x16xf32>
    %689 = arith.mulf %688, %687 : vector<16x16xf32>
    %690 = arith.addf %684, %689 : vector<16x16xf32>
    %c92 = arith.constant 92 : index
    %691 = memref.load %arg1[%c92] : memref<98xf32, #tpu.memory_space<smem>>
    %c1_382 = arith.constant 1 : index
    %c6_383 = arith.constant 6 : index
    %c1_384 = arith.constant 1 : index
    %692 = vector.load %arg4[%c1_382, %c6_383, %c1_384] : memref<2x22x22xf32, #tpu.memory_space<vmem>>, vector<1x16x16xf32>
    %693 = vector.shape_cast %692 : vector<1x16x16xf32> to vector<16x16xf32>
    %694 = vector.broadcast %691 : f32 to vector<16x16xf32>
    %695 = arith.mulf %694, %693 : vector<16x16xf32>
    %696 = arith.addf %690, %695 : vector<16x16xf32>
    %c93 = arith.constant 93 : index
    %697 = memref.load %arg1[%c93] : memref<98xf32, #tpu.memory_space<smem>>
    %c1_385 = arith.constant 1 : index
    %c6_386 = arith.constant 6 : index
    %c2_387 = arith.constant 2 : index
    %698 = vector.load %arg4[%c1_385, %c6_386, %c2_387] : memref<2x22x22xf32, #tpu.memory_space<vmem>>, vector<1x16x16xf32>
    %699 = vector.shape_cast %698 : vector<1x16x16xf32> to vector<16x16xf32>
    %700 = vector.broadcast %697 : f32 to vector<16x16xf32>
    %701 = arith.mulf %700, %699 : vector<16x16xf32>
    %702 = arith.addf %696, %701 : vector<16x16xf32>
    %c94 = arith.constant 94 : index
    %703 = memref.load %arg1[%c94] : memref<98xf32, #tpu.memory_space<smem>>
    %c1_388 = arith.constant 1 : index
    %c6_389 = arith.constant 6 : index
    %c3_390 = arith.constant 3 : index
    %704 = vector.load %arg4[%c1_388, %c6_389, %c3_390] : memref<2x22x22xf32, #tpu.memory_space<vmem>>, vector<1x16x16xf32>
    %705 = vector.shape_cast %704 : vector<1x16x16xf32> to vector<16x16xf32>
    %706 = vector.broadcast %703 : f32 to vector<16x16xf32>
    %707 = arith.mulf %706, %705 : vector<16x16xf32>
    %708 = arith.addf %702, %707 : vector<16x16xf32>
    %c95 = arith.constant 95 : index
    %709 = memref.load %arg1[%c95] : memref<98xf32, #tpu.memory_space<smem>>
    %c1_391 = arith.constant 1 : index
    %c6_392 = arith.constant 6 : index
    %c4_393 = arith.constant 4 : index
    %710 = vector.load %arg4[%c1_391, %c6_392, %c4_393] : memref<2x22x22xf32, #tpu.memory_space<vmem>>, vector<1x16x16xf32>
    %711 = vector.shape_cast %710 : vector<1x16x16xf32> to vector<16x16xf32>
    %712 = vector.broadcast %709 : f32 to vector<16x16xf32>
    %713 = arith.mulf %712, %711 : vector<16x16xf32>
    %714 = arith.addf %708, %713 : vector<16x16xf32>
    %c96 = arith.constant 96 : index
    %715 = memref.load %arg1[%c96] : memref<98xf32, #tpu.memory_space<smem>>
    %c1_394 = arith.constant 1 : index
    %c6_395 = arith.constant 6 : index
    %c5_396 = arith.constant 5 : index
    %716 = vector.load %arg4[%c1_394, %c6_395, %c5_396] : memref<2x22x22xf32, #tpu.memory_space<vmem>>, vector<1x16x16xf32>
    %717 = vector.shape_cast %716 : vector<1x16x16xf32> to vector<16x16xf32>
    %718 = vector.broadcast %715 : f32 to vector<16x16xf32>
    %719 = arith.mulf %718, %717 : vector<16x16xf32>
    %720 = arith.addf %714, %719 : vector<16x16xf32>
    %c97 = arith.constant 97 : index
    %721 = memref.load %arg1[%c97] : memref<98xf32, #tpu.memory_space<smem>>
    %c1_397 = arith.constant 1 : index
    %c6_398 = arith.constant 6 : index
    %c6_399 = arith.constant 6 : index
    %722 = vector.load %arg4[%c1_397, %c6_398, %c6_399] : memref<2x22x22xf32, #tpu.memory_space<vmem>>, vector<1x16x16xf32>
    %723 = vector.shape_cast %722 : vector<1x16x16xf32> to vector<16x16xf32>
    %724 = vector.broadcast %721 : f32 to vector<16x16xf32>
    %725 = arith.mulf %724, %723 : vector<16x16xf32>
    %726 = arith.addf %720, %725 : vector<16x16xf32>
    %727 = arith.negf %726 : vector<16x16xf32>
    %728 = math.exp %727 : vector<16x16xf32>
    %cst_400 = arith.constant 1.000000e+00 : f32
    %729 = vector.broadcast %cst_400 : f32 to vector<16x16xf32>
    %730 = arith.addf %729, %728 : vector<16x16xf32>
    %731 = arith.divf %729, %730 : vector<16x16xf32>
    %732 = vector.extract_strided_slice %731 {offsets = [0, 0], sizes = [1, 16], strides = [1, 1]} : vector<16x16xf32> to vector<1x16xf32>
    %c0_401 = arith.constant 0 : index
    %c0_402 = arith.constant 0 : index
    %733 = vector.load %arg5[%c0_401, %c0_402] : memref<1x256xf32, #tpu.memory_space<vmem>>, vector<1x16xf32>
    tpu.vector_store %arg5[%c0_401, %c0_402], %732 {strides = array<i32>} : memref<1x256xf32, #tpu.memory_space<vmem>>, vector<1x16xf32>,
    %734 = vector.extract_strided_slice %731 {offsets = [1, 0], sizes = [1, 16], strides = [1, 1]} : vector<16x16xf32> to vector<1x16xf32>
    %c0_403 = arith.constant 0 : index
    %c16_404 = arith.constant 16 : index
    %735 = vector.load %arg5[%c0_403, %c16_404] : memref<1x256xf32, #tpu.memory_space<vmem>>, vector<1x16xf32>
    tpu.vector_store %arg5[%c0_403, %c16_404], %734 {strides = array<i32>} : memref<1x256xf32, #tpu.memory_space<vmem>>, vector<1x16xf32>,
    %736 = vector.extract_strided_slice %731 {offsets = [2, 0], sizes = [1, 16], strides = [1, 1]} : vector<16x16xf32> to vector<1x16xf32>
    %c0_405 = arith.constant 0 : index
    %c32_406 = arith.constant 32 : index
    %737 = vector.load %arg5[%c0_405, %c32_406] : memref<1x256xf32, #tpu.memory_space<vmem>>, vector<1x16xf32>
    tpu.vector_store %arg5[%c0_405, %c32_406], %736 {strides = array<i32>} : memref<1x256xf32, #tpu.memory_space<vmem>>, vector<1x16xf32>,
    %738 = vector.extract_strided_slice %731 {offsets = [3, 0], sizes = [1, 16], strides = [1, 1]} : vector<16x16xf32> to vector<1x16xf32>
    %c0_407 = arith.constant 0 : index
    %c48_408 = arith.constant 48 : index
    %739 = vector.load %arg5[%c0_407, %c48_408] : memref<1x256xf32, #tpu.memory_space<vmem>>, vector<1x16xf32>
    tpu.vector_store %arg5[%c0_407, %c48_408], %738 {strides = array<i32>} : memref<1x256xf32, #tpu.memory_space<vmem>>, vector<1x16xf32>,
    %740 = vector.extract_strided_slice %731 {offsets = [4, 0], sizes = [1, 16], strides = [1, 1]} : vector<16x16xf32> to vector<1x16xf32>
    %c0_409 = arith.constant 0 : index
    %c64_410 = arith.constant 64 : index
    %741 = vector.load %arg5[%c0_409, %c64_410] : memref<1x256xf32, #tpu.memory_space<vmem>>, vector<1x16xf32>
    tpu.vector_store %arg5[%c0_409, %c64_410], %740 {strides = array<i32>} : memref<1x256xf32, #tpu.memory_space<vmem>>, vector<1x16xf32>,
    %742 = vector.extract_strided_slice %731 {offsets = [5, 0], sizes = [1, 16], strides = [1, 1]} : vector<16x16xf32> to vector<1x16xf32>
    %c0_411 = arith.constant 0 : index
    %c80_412 = arith.constant 80 : index
    %743 = vector.load %arg5[%c0_411, %c80_412] : memref<1x256xf32, #tpu.memory_space<vmem>>, vector<1x16xf32>
    tpu.vector_store %arg5[%c0_411, %c80_412], %742 {strides = array<i32>} : memref<1x256xf32, #tpu.memory_space<vmem>>, vector<1x16xf32>,
    %744 = vector.extract_strided_slice %731 {offsets = [6, 0], sizes = [1, 16], strides = [1, 1]} : vector<16x16xf32> to vector<1x16xf32>
    %c0_413 = arith.constant 0 : index
    %c96_414 = arith.constant 96 : index
    %745 = vector.load %arg5[%c0_413, %c96_414] : memref<1x256xf32, #tpu.memory_space<vmem>>, vector<1x16xf32>
    tpu.vector_store %arg5[%c0_413, %c96_414], %744 {strides = array<i32>} : memref<1x256xf32, #tpu.memory_space<vmem>>, vector<1x16xf32>,
    %746 = vector.extract_strided_slice %731 {offsets = [7, 0], sizes = [1, 16], strides = [1, 1]} : vector<16x16xf32> to vector<1x16xf32>
    %c0_415 = arith.constant 0 : index
    %c112 = arith.constant 112 : index
    %747 = vector.load %arg5[%c0_415, %c112] : memref<1x256xf32, #tpu.memory_space<vmem>>, vector<1x16xf32>
    tpu.vector_store %arg5[%c0_415, %c112], %746 {strides = array<i32>} : memref<1x256xf32, #tpu.memory_space<vmem>>, vector<1x16xf32>,
    %748 = vector.extract_strided_slice %731 {offsets = [8, 0], sizes = [1, 16], strides = [1, 1]} : vector<16x16xf32> to vector<1x16xf32>
    %c0_416 = arith.constant 0 : index
    %c128 = arith.constant 128 : index
    %749 = vector.load %arg5[%c0_416, %c128] : memref<1x256xf32, #tpu.memory_space<vmem>>, vector<1x16xf32>
    tpu.vector_store %arg5[%c0_416, %c128], %748 {strides = array<i32>} : memref<1x256xf32, #tpu.memory_space<vmem>>, vector<1x16xf32>,
    %750 = vector.extract_strided_slice %731 {offsets = [9, 0], sizes = [1, 16], strides = [1, 1]} : vector<16x16xf32> to vector<1x16xf32>
    %c0_417 = arith.constant 0 : index
    %c144 = arith.constant 144 : index
    %751 = vector.load %arg5[%c0_417, %c144] : memref<1x256xf32, #tpu.memory_space<vmem>>, vector<1x16xf32>
    tpu.vector_store %arg5[%c0_417, %c144], %750 {strides = array<i32>} : memref<1x256xf32, #tpu.memory_space<vmem>>, vector<1x16xf32>,
    %752 = vector.extract_strided_slice %731 {offsets = [10, 0], sizes = [1, 16], strides = [1, 1]} : vector<16x16xf32> to vector<1x16xf32>
    %c0_418 = arith.constant 0 : index
    %c160 = arith.constant 160 : index
    %753 = vector.load %arg5[%c0_418, %c160] : memref<1x256xf32, #tpu.memory_space<vmem>>, vector<1x16xf32>
    tpu.vector_store %arg5[%c0_418, %c160], %752 {strides = array<i32>} : memref<1x256xf32, #tpu.memory_space<vmem>>, vector<1x16xf32>,
    %754 = vector.extract_strided_slice %731 {offsets = [11, 0], sizes = [1, 16], strides = [1, 1]} : vector<16x16xf32> to vector<1x16xf32>
    %c0_419 = arith.constant 0 : index
    %c176 = arith.constant 176 : index
    %755 = vector.load %arg5[%c0_419, %c176] : memref<1x256xf32, #tpu.memory_space<vmem>>, vector<1x16xf32>
    tpu.vector_store %arg5[%c0_419, %c176], %754 {strides = array<i32>} : memref<1x256xf32, #tpu.memory_space<vmem>>, vector<1x16xf32>,
    %756 = vector.extract_strided_slice %731 {offsets = [12, 0], sizes = [1, 16], strides = [1, 1]} : vector<16x16xf32> to vector<1x16xf32>
    %c0_420 = arith.constant 0 : index
    %c192 = arith.constant 192 : index
    %757 = vector.load %arg5[%c0_420, %c192] : memref<1x256xf32, #tpu.memory_space<vmem>>, vector<1x16xf32>
    tpu.vector_store %arg5[%c0_420, %c192], %756 {strides = array<i32>} : memref<1x256xf32, #tpu.memory_space<vmem>>, vector<1x16xf32>,
    %758 = vector.extract_strided_slice %731 {offsets = [13, 0], sizes = [1, 16], strides = [1, 1]} : vector<16x16xf32> to vector<1x16xf32>
    %c0_421 = arith.constant 0 : index
    %c208 = arith.constant 208 : index
    %759 = vector.load %arg5[%c0_421, %c208] : memref<1x256xf32, #tpu.memory_space<vmem>>, vector<1x16xf32>
    tpu.vector_store %arg5[%c0_421, %c208], %758 {strides = array<i32>} : memref<1x256xf32, #tpu.memory_space<vmem>>, vector<1x16xf32>,
    %760 = vector.extract_strided_slice %731 {offsets = [14, 0], sizes = [1, 16], strides = [1, 1]} : vector<16x16xf32> to vector<1x16xf32>
    %c0_422 = arith.constant 0 : index
    %c224 = arith.constant 224 : index
    %761 = vector.load %arg5[%c0_422, %c224] : memref<1x256xf32, #tpu.memory_space<vmem>>, vector<1x16xf32>
    tpu.vector_store %arg5[%c0_422, %c224], %760 {strides = array<i32>} : memref<1x256xf32, #tpu.memory_space<vmem>>, vector<1x16xf32>,
    %762 = vector.extract_strided_slice %731 {offsets = [15, 0], sizes = [1, 16], strides = [1, 1]} : vector<16x16xf32> to vector<1x16xf32>
    %c0_423 = arith.constant 0 : index
    %c240 = arith.constant 240 : index
    %763 = vector.load %arg5[%c0_423, %c240] : memref<1x256xf32, #tpu.memory_space<vmem>>, vector<1x16xf32>
    tpu.vector_store %arg5[%c0_423, %c240], %762 {strides = array<i32>} : memref<1x256xf32, #tpu.memory_space<vmem>>, vector<1x16xf32>,
    %c0_424 = arith.constant 0 : index
    %c0_425 = arith.constant 0 : index
    %764 = vector.load %arg5[%c0_424, %c0_425] : memref<1x256xf32, #tpu.memory_space<vmem>>, vector<1x256xf32>
    %765 = vector.broadcast %764 : vector<1x256xf32> to vector<4x256xf32>
    %766 = arith.mulf %1, %765 : vector<4x256xf32>
    %c0_426 = arith.constant 0 : index
    %c0_427 = arith.constant 0 : index
    %c0_428 = arith.constant 0 : index
    %767 = vector.load %arg3[%c0_426, %c0_427, %c0_428] : memref<1x4x256xf32, #tpu.memory_space<vmem>>, vector<1x4x256xf32>
    %768 = vector.shape_cast %767 : vector<1x4x256xf32> to vector<4x256xf32>
    %769 = vector.shape_cast %766 : vector<4x256xf32> to vector<1x4x256xf32>
    tpu.vector_store %arg3[%c0_426, %c0_427, %c0_428], %769 {strides = array<i32>} : memref<1x4x256xf32, #tpu.memory_space<vmem>>, vector<1x4x256xf32>,
    return
  }
  func.func @transform_0(%arg0: i32) -> i32 {
    %c0_i32 = arith.constant 0 : i32
    %c0_i32_0 = arith.constant 0 : i32
    return %c0_i32 : i32
  }
  func.func @transform_1(%arg0: i32) -> (i32, i32, i32) {
    %c0_i32 = arith.constant 0 : i32
    %c0_i32_0 = arith.constant 0 : i32
    %c0_i32_1 = arith.constant 0 : i32
    return %arg0, %c0_i32, %c0_i32_0 : i32, i32, i32
  }
  func.func @transform_2(%arg0: i32) -> (i32, i32, i32) {
    %c0_i32 = arith.constant 0 : i32
    %c0_i32_0 = arith.constant 0 : i32
    %c0_i32_1 = arith.constant 0 : i32
    return %arg0, %c0_i32, %c0_i32_0 : i32, i32, i32
  }
}

</mosaic_0001>

<bundles_post_ra>
// kernel: spatial_attention_forward.1
= control target key start
LH: loop header
LB: loop body
LE: loop exit
PB: predicated region body
PF: predicated region fallthrough
CT: control target
= control target key end

     0   :  { %7 = vsyncpa [#allocation5], 0  ;;  %s2131_s9 = smov 0   ;;  %s3136_s0 = inlined_call_operand.vmem [shape: f32[98], index: 0, kind: input, shape index: {}]   ;;  %s3137_s1 = inlined_call_operand.vmem [shape: f32[2,4,256], index: 1, kind: input, shape index: {}, may-alias: {1,2}]   ;;  %s3138_s2 = inlined_call_operand.vmem [shape: f32[2,4,256], index: 2, kind: output, shape index: {}, may-alias: {1,2}]  }
   0x1 LB: > { %s2137_s10 = sadd.s32 4294967295, %s2090_s9   ;;  %p1901_p0 = scmp.ge.s32.totalorder %s2090_s9, 1  ;;  %s2090_s9 = sphi %s2131_s9, %s13_s9  }
   0x2   : > { %p91_p1 = scmp.lt.s32.totalorder %s2090_s9, 3  ;;  %s104_s13 = sshll.u32 %s3136_s0, 4  ;;  %s105_s13 = int_to_ptr.vmem [resolvable:$true] %s104_s13 }
   0x3   : > { %p2021_p3 = scmp.eq.s32.totalorder %s2137_s10, 0  ;;  %s2065_s15 = scalar_lea.vmem %s105_s13, 16 }
   0x4   : > { %p2144_p2 = pnand %p1901_p0, %p91_p1  ;;  %p2066_p6 = scmp.ne.s32.totalorder %s105_s13, %s2065_s15 }
   0x5   : > { %p2073_p10 = scmp.lt.s32.totalorder %s105_s13, %s105_s13  ;;  %p2074_p11 = scmp.lt.s32.totalorder %s2065_s15, %s2065_s15 }
   0x6   : > { %p2017_p4 = pneg %p2144_p2 }
   0x7   : > { %p2075_p12 = por %p2074_p11, %p2073_p10 }
   0x8   : > { %p2018_p5 = pnand %p2021_p3, %p2017_p4 }
   0xa   : > { %p2067_p7 = pneg %p2018_p5 }
   0xc   : > { %p2068_p8 = pnand %p2067_p7, %p2066_p6 }
   0xe   : > { %p2069_p9 = pneg %p2068_p8 }
  0x10   : > { %p2076_p13 = pnand %p2075_p12, %p2069_p9 }
  0x12   : > { %2079 = shalt.err (!%p2076_p13)
}
  0x13   : > { %s2092_s16 = smov [#allocation4]   ;;  %125 = sbr.rel (%p2144_p2) target bundleno = 834 (0x342), region = 28 }
  0x14   : > { %2020 = dma.vmem_to_smem (!%p2018_p5), %s105_s13, 16, %s2092_s16, [#allocation5]  }
  0x1a   : > { %2085 = dma.done.wait (%p2021_p3), [#allocation5], 16  }
  0x1b   : > { %2087 = vsyncadd (%p2021_p3), [#allocation5], 4294967280 }
  0x1c   : > { %131 = sfence }
  0x1d   : > { %p148_p0 = scmp.lt.s32.totalorder %s2137_s10, 1  ;;  %vm193_vm0 = vcmask 179200   ;;  %v2093_v0 = vmov 0.0   ;;  %vm162_vm1 = vcmask 1043456   ;;  %s2094_s21 = smov 99   ;;  %vm196_vm2 = vcmask 177152  }
  0x1e   : > { %194 = vst.msk [vmem:[#allocation2] sm:$0xff] %vm193_vm0, %v2093_v0  ;;  %195 = vst.msk [vmem:[#allocation2 + $0x8] sm:$0xff] %vm193_vm0, %v2093_v0  ;;  %s2095_s22 = smov 3   ;;  %s2096_s23 = smov 83   ;;  %vm205_vm3 = vcmask 147480  }
  0x1f   : > { %198 = vst.msk [vmem:[#allocation2 + $0x18] sm:$0xff] %vm193_vm0, %v2093_v0  ;;  %199 = vst.msk [vmem:[#allocation2 + $0x20] sm:$0xff] %vm193_vm0, %v2093_v0  ;;  %s3179_s10 = smov (!%p148_p0, %s2137_s10), 1  ;;  %s2097_s24 = smov 115  }
  0x20   : > { %s2011_s17 = sshll.u32 %s3179_s10, 3  ;;  %s2098_s25 = smov 51   ;;  %197 = vst.msk [vmem:[#allocation2 + $0x10] sm:$0x3f] %vm196_vm2, %v2093_v0  ;;  %200 = vst.msk [vmem:[#allocation2 + $0x28] sm:$0x3f] %vm196_vm2, %v2093_v0 }
  0x21   : > { %s2169_s20 = scalar_lea.vmem %s3137_s1, %s2011_s17  ;;  %s2099_s26 = smov 67  }
  0x22   : > { %v158_v1 = vld [vmem:[%s2169_s20] sm:$0xff]  ;;  %s2100_s27 = smov 19   ;;  %s2101_s28 = smov 35  }
  0x23   : > { %v163_v2 = vsel %vm162_vm1, %v158_v1, 0.0  ;;  %v160_v3 = vcombine.high %v158_v1, %v158_v1  ;;  %v179_v16 = vsel %vm162_vm1, %v158_v1, -inf  ;;  %s2212_s29 = sld [smem:[#allocation4 + $0x1]]  ;;  %s2216_s30 = sld [smem:[#allocation4 + $0x2]] }
  0x24   : > { %v164_v4 = vrot.slane %v163_v2, 4  ;;  %v180_v18 = vrot.slane %v179_v16, 4  ;;  %s2221_s3 = sld [smem:[#allocation4 + $0x3]]  ;;  %s2229_s4 = sld [smem:[#allocation4 + $0x4]] }
  0x25   : > { %v170_v5 = vsel %vm162_vm1, %v160_v3, 0.0  ;;  %v186_v24 = vsel %vm162_vm1, %v160_v3, -inf  ;;  %s2102_s5 = smov 127   ;;  %s2236_s6 = sld [smem:[#allocation4 + $0x5]] }
  0x26   : > { %v165_v6 = vadd.f32 %v164_v4, %v163_v2  ;;  %v171_v7 = vrot.slane %v170_v5, 4  ;;  %v181_v20 = vmax.f32 %v179_v16, %v180_v18  ;;  %v187_v26 = vrot.slane %v186_v24, 4  ;;  %s2103_s7 = smov 126   ;;  %s2243_s8 = sld [smem:[#allocation4 + $0x6]] }
  0x27   : > { %s2104_s11 = smov 125   ;;  %s2250_s12 = sld [smem:[#allocation4 + $0x8]] }
  0x28   : > { %v166_v8 = vrot.slane %v165_v6, 2  ;;  %v172_v10 = vadd.f32 %v171_v7, %v170_v5  ;;  %v182_v22 = vrot.slane %v181_v20, 2  ;;  %v188_v28 = vmax.f32 %v186_v24, %v187_v26  ;;  %s2105_s13 = smov 124   ;;  %s2260_s14 = sld [smem:[#allocation4 + $0x9]] }
  0x29   : > { %v344_v41 = vstv %s2212_s29  ;;  %v358_v46 = vstv %s2216_s30  ;;  %s2106_s15 = smov 123   ;;  %s2271_s16 = sld [smem:[#allocation4 + $0xa]] }
  0x2a   : > { %v167_v9 = vadd.f32 %v166_v8, %v165_v6  ;;  %v173_v13 = vrot.slane %v172_v10, 2  ;;  %v183_v23 = vmax.f32 %v181_v20, %v182_v22  ;;  %v189_v29 = vrot.slane %v188_v28, 2  ;;  %s2107_s18 = smov 122   ;;  %s2280_s19 = sld [smem:[#allocation4 + $0xb]] }
  0x2b   : > { %v372_v50 = vstv %s2221_s3  ;;  %v386_v54 = vstv %s2229_s4  ;;  %v400_v58 = vstv %s2236_s6  ;;  %s2359_s29 = sld [smem:[#allocation4 + $0x16]]  ;;  %s2366_s30 = sld [smem:[#allocation4 + $0x17]] }
  0x2c   : > { %v168_v11 = vrot.slane %v167_v9, 1  ;;  %v174_v15 = vadd.f32 %v173_v13, %v172_v10  ;;  %v184_v25 = vrot.slane %v183_v23, 1  ;;  %v190_v30 = vmax.f32 %v188_v28, %v189_v29  ;;  %s2375_s3 = sld [smem:[#allocation4 + $0x18]]  ;;  %s2382_s4 = sld [smem:[#allocation4 + $0x19]] }
  0x2d   : > { %v414_v0 = vstv %s2243_s8  ;;  %v436_v6 = vstv %s2250_s12  ;;  %s2389_s6 = sld [smem:[#allocation4 + $0x1a]]  ;;  %s2396_s8 = sld [smem:[#allocation4 + $0x1b]] }
  0x2e   : > { %v169_v12 = vadd.f32 %v168_v11, %v167_v9  ;;  %v175_v17 = vrot.slane %v174_v15, 1  ;;  %v185_v27 = vmax.f32 %v183_v23, %v184_v25  ;;  %v191_v31 = vrot.slane %v190_v30, 1  ;;  %s2405_s12 = sld [smem:[#allocation4 + $0x1d]] }
  0x2f   : > { %v450_v11 = vstv %s2260_s14  ;;  %v464_v16 = vstv %s2271_s16  ;;  %s2412_s14 = sld [smem:[#allocation4 + $0x1e]]  ;;  %s2421_s16 = sld [smem:[#allocation4 + $0x1f]] }
  0x30   : > { %v177_v14 = vmul.f32 0.25, %v169_v12  ;;  %v176_v19 = vadd.f32 %v175_v17, %v174_v15  ;;  %v192_v32 = vmax.f32 %v190_v30, %v191_v31 }
  0x32   : > { %221 = vrot.lane.b32.xlu1 %v177_v14, %s2094_s21  ;;  %202 = vrot.lane.b32.xlu0 %v177_v14, %s2095_s22  ;;  %v178_v21 = vmul.f32 0.25, %v176_v19 }
  0x36   : > { %229 = vrot.lane.b32.xlu1 %v177_v14, %s2096_s23  ;;  %213 = vrot.lane.b32.xlu0 %v177_v14, %s2097_s24 }
  0x3a   : > { %245 = vrot.lane.b32.xlu1 %v177_v14, %s2098_s25  ;;  %237 = vrot.lane.b32.xlu0 %v177_v14, %s2099_s26 }
  0x3e   : > { %261 = vrot.lane.b32.xlu1 %v177_v14, %s2100_s27  ;;  %253 = vrot.lane.b32.xlu0 %v177_v14, %s2101_s28 }
  0x42   : > { %279 = vrot.lane.b32.xlu1 %v178_v21, %s2097_s24  ;;  %270 = vrot.lane.b32.xlu0 %v178_v21, %s2095_s22 }
  0x46   : > { %295 = vrot.lane.b32.xlu1 %v178_v21, %s2096_s23  ;;  %287 = vrot.lane.b32.xlu0 %v178_v21, %s2094_s21 }
  0x4a   : > { %311 = vrot.lane.b32.xlu1 %v178_v21, %s2098_s25  ;;  %303 = vrot.lane.b32.xlu0 %v178_v21, %s2099_s26 }
  0x4e   : > { %319 = vrot.lane.b32.xlu0 %v178_v21, %s2101_s28  ;;  %208 = vrot.lane.b32.xlu1 %v185_v27, %s2095_s22 }
  0x52   : > { %217 = vrot.lane.b32.xlu0 %v185_v27, %s2097_s24  ;;  %225 = vrot.lane.b32.xlu1 %v185_v27, %s2094_s21 }
  0x56   : > { %233 = vrot.lane.b32.xlu0 %v185_v27, %s2096_s23  ;;  %241 = vrot.lane.b32.xlu1 %v185_v27, %s2099_s26 }
  0x5a   : > { %327 = vrot.lane.b32.xlu0 %v178_v21, %s2100_s27  ;;  %249 = vrot.lane.b32.xlu1 %v185_v27, %s2098_s25  ;;  %v478_v21 = vstv %s2280_s19  ;;  %s2428_s19 = sld [smem:[#allocation4 + $0x20]] }
  0x5e   : > { %257 = vrot.lane.b32.xlu0 %v185_v27, %s2101_s28  ;;  %265 = vrot.lane.b32.xlu1 %v185_v27, %s2100_s27 }
  0x62   : > { %275 = vrot.lane.b32.xlu0 %v192_v32, %s2095_s22  ;;  %283 = vrot.lane.b32.xlu1 %v192_v32, %s2097_s24  ;;  %s2298_s22 = sld [smem:[#allocation4 + $0xd]]  ;;  %s2318_s24 = sld [smem:[#allocation4 + $0x10]] }
  0x66   : > { %291 = vrot.lane.b32.xlu0 %v192_v32, %s2094_s21  ;;  %299 = vrot.lane.b32.xlu1 %v192_v32, %s2096_s23  ;;  %s2289_s21 = sld [smem:[#allocation4 + $0xc]]  ;;  %s2309_s23 = sld [smem:[#allocation4 + $0xf]] }
  0x6a   : > { %307 = vrot.lane.b32.xlu0 %v192_v32, %s2099_s26  ;;  %315 = vrot.lane.b32.xlu1 %v192_v32, %s2098_s25  ;;  %s2329_s25 = sld [smem:[#allocation4 + $0x11]]  ;;  %s2336_s26 = sld [smem:[#allocation4 + $0x12]] }
  0x6c   : > { %v492_v27 = vstv %s2289_s21  ;;  %s2435_s21 = sld [smem:[#allocation4 + $0x21]] }
  0x6e   : > { %323 = vrot.lane.b32.xlu0 %v192_v32, %s2101_s28  ;;  %331 = vrot.lane.b32.xlu1 %v192_v32, %s2100_s27  ;;  %v506_v32 = vstv %s2298_s22  ;;  %s2343_s27 = sld [smem:[#allocation4 + $0x13]]  ;;  %s2350_s28 = sld [smem:[#allocation4 + $0x14]] }
  0x6f   : > { %s2442_s22 = sld [smem:[#allocation4 + $0x22]] }
  0xa4   : > { %v222_v33 = vpop.permute.xlu1 %221  ;;  %v203_v34 = vpop.permute.xlu0 %202 }
  0xa5   : > { %224 = vst.msk [vmem:[#allocation2 + $0x5] sm:$0x1] %vm205_vm3, %v222_v33  ;;  %206 = vst.msk [vmem:[#allocation2 + $0x3] sm:$0x1] %vm205_vm3, %v203_v34 }
  0xa8   : > { %v230_v35 = vpop.permute.xlu1 %229  ;;  %v214_v36 = vpop.permute.xlu0 %213 }
  0xa9   : > { %232 = vst.msk [vmem:[#allocation2 + $0x6] sm:$0x1] %vm205_vm3, %v230_v35  ;;  %216 = vst.msk [vmem:[#allocation2 + $0x4] sm:$0x1] %vm205_vm3, %v214_v36 }
  0xac   : > { %v246_v37 = vpop.permute.xlu1 %245  ;;  %v238_v38 = vpop.permute.xlu0 %237 }
  0xad   : > { %248 = vst.msk [vmem:[#allocation2 + $0x8] sm:$0x1] %vm205_vm3, %v246_v37  ;;  %240 = vst.msk [vmem:[#allocation2 + $0x7] sm:$0x1] %vm205_vm3, %v238_v38  ;;  %v528_v38 = vstv %s2309_s23  ;;  %s2451_s23 = sld [smem:[#allocation4 + $0x24]] }
  0xb0   : > { %v262_v39 = vpop.permute.xlu1 %261  ;;  %v254_v40 = vpop.permute.xlu0 %253 }
  0xb1   : > { %264 = vst.msk [vmem:[#allocation2 + $0xa] sm:$0x1] %vm205_vm3, %v262_v39  ;;  %256 = vst.msk [vmem:[#allocation2 + $0x9] sm:$0x1] %vm205_vm3, %v254_v40 }
  0xb4   : > { %v2223_v42 = vld [vmem:[#allocation2] sm:$0xff]  ;;  %v280_v43 = vpop.permute.xlu1 %279  ;;  %v271_v44 = vpop.permute.xlu0 %270 }
  0xb5   : > { %282 = vst.msk [vmem:[#allocation2 + $0xc] sm:$0x1] %vm205_vm3, %v280_v43  ;;  %273 = vst.msk [vmem:[#allocation2 + $0xb] sm:$0x1] %vm205_vm3, %v271_v44  ;;  %v345_v45 = vmul.f32 %v344_v41, %v2223_v42  ;;  %v359_v49 = vmul.f32 %v358_v46, %v2223_v42  ;;  %v373_v53 = vmul.f32 %v372_v50, %v2223_v42  ;;  %v2268_v5 = vld [vmem:[#allocation2 + $0x1] sm:$0xff] }
  0xb6   : > { %v387_v57 = vmul.f32 %v386_v54, %v2223_v42  ;;  %v401_v62 = vmul.f32 %v400_v58, %v2223_v42  ;;  %v415_v3 = vmul.f32 %v414_v0, %v2223_v42  ;;  %v437_v9 = vmul.f32 %v436_v6, %v2268_v5 }
  0xb7   : > { %349 = vrot.lane.b32.xlu0 %v345_v45, %s2102_s5  ;;  %v451_v14 = vmul.f32 %v450_v11, %v2268_v5  ;;  %v465_v19 = vmul.f32 %v464_v16, %v2268_v5  ;;  %v479_v24 = vmul.f32 %v478_v21, %v2268_v5  ;;  %v493_v30 = vmul.f32 %v492_v27, %v2268_v5 }
  0xb8   : > { %v296_v47 = vpop.permute.xlu1 %295  ;;  %v288_v48 = vpop.permute.xlu0 %287  ;;  %v507_v35 = vmul.f32 %v506_v32, %v2268_v5  ;;  %v2326_v37 = vld [vmem:[#allocation2 + $0x2] sm:$0xff]  ;;  %v556_v45 = vstv %s2329_s25  ;;  %s2460_s25 = sld [smem:[#allocation4]] }
  0xb9   : > { %298 = vst.msk [vmem:[#allocation2 + $0xe] sm:$0x1] %vm205_vm3, %v296_v47  ;;  %290 = vst.msk [vmem:[#allocation2 + $0xd] sm:$0x1] %vm205_vm3, %v288_v48  ;;  %v529_v39 = vmul.f32 %v528_v38, %v2326_v37  ;;  %v570_v48 = vstv %s2336_s26  ;;  %s2469_s26 = sld [smem:[#allocation4 + $0x26]] }
  0xbb   : > { %363 = vrot.lane.b32.xlu0 %v359_v49, %s2103_s7  ;;  %v571_v49 = vmul.f32 %v570_v48, %v2326_v37 }
  0xbc   : > { %v312_v51 = vpop.permute.xlu1 %311  ;;  %v304_v52 = vpop.permute.xlu0 %303 }
  0xbd   : > { %314 = vst.msk [vmem:[#allocation2 + $0x10] sm:$0x1] %vm205_vm3, %v312_v51  ;;  %306 = vst.msk [vmem:[#allocation2 + $0xf] sm:$0x1] %vm205_vm3, %v304_v52  ;;  %v584_v52 = vstv %s2343_s27  ;;  %s2476_s27 = sld [smem:[#allocation4 + $0x27]] }
  0xbf   : > { %377 = vrot.lane.b32.xlu0 %v373_v53, %s2104_s11  ;;  %v585_v53 = vmul.f32 %v584_v52, %v2326_v37 }
  0xc0   : > { %v320_v55 = vpop.permute.xlu0 %319  ;;  %v209_v56 = vpop.permute.xlu1 %208 }
  0xc1   : > { %322 = vst.msk [vmem:[#allocation2 + $0x11] sm:$0x1] %vm205_vm3, %v320_v55  ;;  %212 = vst.msk [vmem:[#allocation2 + $0x1b] sm:$0x1] %vm205_vm3, %v209_v56  ;;  %v598_v55 = vstv %s2350_s28  ;;  %s2485_s28 = sld [smem:[#allocation4 + $0x28]] }
  0xc2   : > { %v599_v56 = vmul.f32 %v598_v55, %v2326_v37 }
  0xc3   : > { %391 = vrot.lane.b32.xlu0 %v387_v57, %s2105_s13 }
  0xc4   : > { %v2253_v59 = vld [vmem:[#allocation2 + $0x8] sm:$0xff]  ;;  %v218_v60 = vpop.permute.xlu0 %217  ;;  %v226_v61 = vpop.permute.xlu1 %225 }
  0xc5   : > { %220 = vst.msk [vmem:[#allocation2 + $0x1c] sm:$0x1] %vm205_vm3, %v218_v60  ;;  %v346_v63 = vmul.f32 %v344_v41, %v2253_v59  ;;  %228 = vst.msk [vmem:[#allocation2 + $0x1d] sm:$0x1] %vm205_vm3, %v226_v61  ;;  %v360_v4 = vmul.f32 %v358_v46, %v2253_v59  ;;  %v374_v10 = vmul.f32 %v372_v50, %v2253_v59  ;;  %v2306_v26 = vld [vmem:[#allocation2 + $0x9] sm:$0xff]  ;;  %v542_v41 = vstv %s2318_s24  ;;  %s2458_s24 = sld [smem:[#allocation4 + $0x25]] }
  0xc6   : > { %v388_v15 = vmul.f32 %v386_v54, %v2253_v59  ;;  %v402_v20 = vmul.f32 %v400_v58, %v2253_v59  ;;  %v416_v25 = vmul.f32 %v414_v0, %v2253_v59  ;;  %v438_v31 = vmul.f32 %v436_v6, %v2306_v26  ;;  %v2372_v58 = vld [vmem:[#allocation2 + $0x3] sm:$0xff] }
  0xc7   : > { %405 = vrot.lane.b32.xlu0 %v401_v62, %s2106_s15  ;;  %351 = vrot.lane.b32.xlu1 %v346_v63, %s2102_s5  ;;  %v452_v36 = vmul.f32 %v450_v11, %v2306_v26  ;;  %v466_v40 = vmul.f32 %v464_v16, %v2306_v26  ;;  %v543_v43 = vmul.f32 %v542_v41, %v2326_v37  ;;  %v620_v60 = vstv %s2359_s29  ;;  %v2418_v16 = vld [vmem:[#allocation2 + $0x4] sm:$0xff]  ;;  %s2487_s29 = sld [smem:[#allocation4 + $0x7]] }
  0xc8   : > { %v234_v1 = vpop.permute.xlu0 %233  ;;  %v242_v2 = vpop.permute.xlu1 %241  ;;  %v480_v44 = vmul.f32 %v478_v21, %v2306_v26  ;;  %v557_v46 = vmul.f32 %v556_v45, %v2326_v37  ;;  %v494_v47 = vmul.f32 %v492_v27, %v2306_v26  ;;  %v508_v50 = vmul.f32 %v506_v32, %v2306_v26  ;;  %v2356_v51 = vld [vmem:[#allocation2 + $0xa] sm:$0xff] }
  0xc9   : > { %236 = vst.msk [vmem:[#allocation2 + $0x1e] sm:$0x1] %vm205_vm3, %v234_v1  ;;  %244 = vst.msk [vmem:[#allocation2 + $0x1f] sm:$0x1] %vm205_vm3, %v242_v2  ;;  %v530_v54 = vmul.f32 %v528_v38, %v2356_v51  ;;  %v544_v57 = vmul.f32 %v542_v41, %v2356_v51  ;;  %v621_v61 = vmul.f32 %v620_v60, %v2372_v58  ;;  %v634_v63 = vstv %s2366_s30  ;;  %s2494_s30 = sld [smem:[#allocation4 + $0x29]] }
  0xca   : > { %v558_v62 = vmul.f32 %v556_v45, %v2356_v51  ;;  %v635_v0 = vmul.f32 %v634_v63, %v2372_v58  ;;  %v572_v1 = vmul.f32 %v570_v48, %v2356_v51  ;;  %v648_v2 = vstv %s2375_s3  ;;  %s2503_s3 = sld [smem:[#allocation4 + $0x2b]] }
  0xcb   : > { %419 = vrot.lane.b32.xlu0 %v415_v3, %s2107_s18  ;;  %365 = vrot.lane.b32.xlu1 %v360_v4, %s2103_s7  ;;  %v649_v3 = vmul.f32 %v648_v2, %v2372_v58  ;;  %v586_v4 = vmul.f32 %v584_v52, %v2356_v51  ;;  %v662_v6 = vstv %s2382_s4  ;;  %v754_v27 = vstv %s2428_s19  ;;  %s2512_s4 = sld [smem:[#allocation4 + $0x2c]]  ;;  %s2555_s19 = sld [smem:[#allocation4 + $0x32]] }
  0xcc   : > { %v328_v7 = vpop.permute.xlu0 %327  ;;  %v250_v8 = vpop.permute.xlu1 %249  ;;  %v818_v45 = vstv %s2458_s24  ;;  %v832_v52 = vstv %s2469_s26  ;;  %s2587_s24 = sld [smem:[#allocation4 + $0x36]]  ;;  %s2597_s26 = sld [smem:[#allocation4 + $0x37]] }
  0xcd   : > { %330 = vst.msk [vmem:[#allocation2 + $0x12] sm:$0x1] %vm205_vm3, %v328_v7  ;;  %252 = vst.msk [vmem:[#allocation2 + $0x20] sm:$0x1] %vm205_vm3, %v250_v8  ;;  %v663_v7 = vmul.f32 %v662_v6, %v2372_v58  ;;  %v600_v8 = vmul.f32 %v598_v55, %v2356_v51 }
  0xcf   : > { %441 = vrot.lane.b32.xlu0 %v437_v9, %s2102_s5  ;;  %379 = vrot.lane.b32.xlu1 %v374_v10, %s2104_s11  ;;  %v676_v10 = vstv %s2389_s6  ;;  %s2522_s6 = sld [smem:[#allocation4 + $0x2d]] }
  0xd0   : > { %v258_v12 = vpop.permute.xlu0 %257  ;;  %v266_v13 = vpop.permute.xlu1 %265  ;;  %v677_v11 = vmul.f32 %v676_v10, %v2372_v58 }
  0xd1   : > { %260 = vst.msk [vmem:[#allocation2 + $0x21] sm:$0x1] %vm205_vm3, %v258_v12  ;;  %268 = vst.msk [vmem:[#allocation2 + $0x22] sm:$0x1] %vm205_vm3, %v266_v13  ;;  %v690_v13 = vstv %s2396_s8  ;;  %s2529_s8 = sld [smem:[#allocation4 + $0x2e]] }
  0xd3   : > { %455 = vrot.lane.b32.xlu0 %v451_v14, %s2103_s7  ;;  %393 = vrot.lane.b32.xlu1 %v388_v15, %s2105_s13  ;;  %v691_v14 = vmul.f32 %v690_v13, %v2372_v58 }
  0xd4   : > { %v276_v17 = vpop.permute.xlu0 %275  ;;  %v284_v18 = vpop.permute.xlu1 %283  ;;  %v2402_v9 = vld [vmem:[#allocation2 + $0xb] sm:$0xff] }
  0xd5   : > { %278 = vst.msk [vmem:[#allocation2 + $0x23] sm:$0x1] %vm205_vm3, %v276_v17  ;;  %286 = vst.msk [vmem:[#allocation2 + $0x24] sm:$0x1] %vm205_vm3, %v284_v18  ;;  %v622_v12 = vmul.f32 %v620_v60, %v2402_v9  ;;  %v636_v15 = vmul.f32 %v634_v63, %v2402_v9  ;;  %v712_v17 = vstv %s2405_s12  ;;  %v846_v60 = vstv %s2476_s27  ;;  %s2536_s12 = sld [smem:[#allocation4 + $0x2f]]  ;;  %s2606_s27 = sld [smem:[#allocation4 + $0x39]] }
  0xd6   : > { %v713_v18 = vmul.f32 %v712_v17, %v2418_v16 }
  0xd7   : > { %469 = vrot.lane.b32.xlu0 %v465_v19, %s2104_s11  ;;  %407 = vrot.lane.b32.xlu1 %v402_v20, %s2106_s15  ;;  %v650_v19 = vmul.f32 %v648_v2, %v2402_v9  ;;  %v726_v20 = vstv %s2412_s14  ;;  %s2538_s14 = sld [smem:[#allocation4 + $0xe]] }
  0xd8   : > { %v292_v22 = vpop.permute.xlu0 %291  ;;  %v300_v23 = vpop.permute.xlu1 %299  ;;  %v727_v21 = vmul.f32 %v726_v20, %v2418_v16 }
  0xd9   : > { %294 = vst.msk [vmem:[#allocation2 + $0x25] sm:$0x1] %vm205_vm3, %v292_v22  ;;  %302 = vst.msk [vmem:[#allocation2 + $0x26] sm:$0x1] %vm205_vm3, %v300_v23  ;;  %v664_v22 = vmul.f32 %v662_v6, %v2402_v9  ;;  %v740_v23 = vstv %s2421_s16  ;;  %s2546_s16 = sld [smem:[#allocation4 + $0x30]] }
  0xdb   : > { %483 = vrot.lane.b32.xlu0 %v479_v24, %s2105_s13  ;;  %421 = vrot.lane.b32.xlu1 %v416_v25, %s2107_s18  ;;  %v741_v24 = vmul.f32 %v740_v23, %v2418_v16  ;;  %v678_v25 = vmul.f32 %v676_v10, %v2402_v9 }
  0xdc   : > { %v308_v28 = vpop.permute.xlu0 %307  ;;  %v316_v29 = vpop.permute.xlu1 %315 }
  0xdd   : > { %310 = vst.msk [vmem:[#allocation2 + $0x27] sm:$0x1] %vm205_vm3, %v308_v28  ;;  %318 = vst.msk [vmem:[#allocation2 + $0x28] sm:$0x1] %vm205_vm3, %v316_v29  ;;  %v755_v28 = vmul.f32 %v754_v27, %v2418_v16  ;;  %v692_v29 = vmul.f32 %v690_v13, %v2402_v9 }
  0xdf   : > { %497 = vrot.lane.b32.xlu0 %v493_v30, %s2106_s15  ;;  %443 = vrot.lane.b32.xlu1 %v438_v31, %s2102_s5  ;;  %v2448_v30 = vld [vmem:[#allocation2 + $0xc] sm:$0xff]  ;;  %v768_v31 = vstv %s2435_s21  ;;  %s2564_s21 = sld [smem:[#allocation4 + $0x33]] }
  0xe0   : > { %v324_v33 = vpop.permute.xlu0 %323  ;;  %v332_v34 = vpop.permute.xlu1 %331  ;;  %v769_v32 = vmul.f32 %v768_v31, %v2418_v16  ;;  %v728_v38 = vmul.f32 %v726_v20, %v2448_v30 }
  0xe1   : > { %326 = vst.msk [vmem:[#allocation2 + $0x29] sm:$0x1] %vm205_vm3, %v324_v33  ;;  %334 = vst.msk [vmem:[#allocation2 + $0x2a] sm:$0x1] %vm205_vm3, %v332_v34  ;;  %v714_v33 = vmul.f32 %v712_v17, %v2448_v30  ;;  %v782_v34 = vstv %s2442_s22  ;;  %s2573_s22 = sld [smem:[#allocation4 + $0x34]] }
  0xe3   : > { %511 = vrot.lane.b32.xlu0 %v507_v35, %s2107_s18  ;;  %457 = vrot.lane.b32.xlu1 %v452_v36, %s2103_s7  ;;  %v783_v36 = vmul.f32 %v782_v34, %v2418_v16 }
  0xe7   : > { %533 = vrot.lane.b32.xlu0 %v529_v39, %s2102_s5  ;;  %471 = vrot.lane.b32.xlu1 %v466_v40, %s2104_s11  ;;  %v2466_v39 = vld [vmem:[#allocation2 + $0x5] sm:$0xff]  ;;  %v804_v40 = vstv %s2451_s23  ;;  %s2580_s23 = sld [smem:[#allocation4 + $0x35]] }
  0xe8   : > { %v819_v48 = vmul.f32 %v818_v45, %v2466_v39  ;;  %v833_v55 = vmul.f32 %v832_v52, %v2466_v39  ;;  %v847_v63 = vmul.f32 %v846_v60, %v2466_v39 }
  0xeb   : > { %547 = vrot.lane.b32.xlu0 %v543_v43, %s2103_s7  ;;  %485 = vrot.lane.b32.xlu1 %v480_v44, %s2105_s13  ;;  %v805_v43 = vmul.f32 %v804_v40, %v2466_v39  ;;  %v742_v44 = vmul.f32 %v740_v23, %v2448_v30 }
  0xef   : > { %561 = vrot.lane.b32.xlu0 %v557_v46, %s2104_s11  ;;  %499 = vrot.lane.b32.xlu1 %v494_v47, %s2106_s15  ;;  %v338_v46 = vstv %s2460_s25  ;;  %s2589_s25 = sld [smem:[#allocation4 + $0x15]] }
  0xf3   : > { %575 = vrot.lane.b32.xlu0 %v571_v49, %s2105_s13  ;;  %513 = vrot.lane.b32.xlu1 %v508_v50, %s2107_s18  ;;  %v756_v49 = vmul.f32 %v754_v27, %v2448_v30  ;;  %v339_v50 = vmul.f32 %v338_v46, %v2223_v42 }
  0xf7   : > { %589 = vrot.lane.b32.xlu0 %v585_v53, %s2106_s15  ;;  %535 = vrot.lane.b32.xlu1 %v530_v54, %s2102_s5 }
  0xfb   : > { %603 = vrot.lane.b32.xlu0 %v599_v56, %s2107_s18  ;;  %549 = vrot.lane.b32.xlu1 %v544_v57, %s2103_s7  ;;  %v770_v56 = vmul.f32 %v768_v31, %v2448_v30  ;;  %v910_v31 = vstv %s2512_s4  ;;  %s2640_s4 = sld [smem:[#allocation4 + $0x1c]] }
  0xff   : > { %625 = vrot.lane.b32.xlu0 %v621_v61, %s2102_s5  ;;  %563 = vrot.lane.b32.xlu1 %v558_v62, %s2104_s11 }
 0x103   : > { %639 = vrot.lane.b32.xlu0 %v635_v0, %s2103_s7  ;;  %577 = vrot.lane.b32.xlu1 %v572_v1, %s2105_s13  ;;  %v784_v0 = vmul.f32 %v782_v34, %v2448_v30  ;;  %v2500_v1 = vld [vmem:[#allocation2 + $0xd] sm:$0xff] }
 0x104   : > { %v820_v20 = vmul.f32 %v818_v45, %v2500_v1 }
 0x107   : > { %653 = vrot.lane.b32.xlu0 %v649_v3, %s2104_s11  ;;  %591 = vrot.lane.b32.xlu1 %v586_v4, %s2106_s15  ;;  %v860_v3 = vstv %s2485_s28  ;;  %v430_v4 = vstv %s2487_s29  ;;  %s2615_s28 = sld [smem:[#allocation4 + $0x3a]]  ;;  %s2624_s29 = sld [smem:[#allocation4 + $0x3b]] }
 0x108   : > { %v861_v10 = vmul.f32 %v860_v3, %v2466_v39 }
 0x10b   : > { %667 = vrot.lane.b32.xlu0 %v663_v7, %s2105_s13  ;;  %605 = vrot.lane.b32.xlu1 %v600_v8, %s2107_s18 }
 0x10f   : > { %681 = vrot.lane.b32.xlu0 %v677_v11, %s2106_s15  ;;  %627 = vrot.lane.b32.xlu1 %v622_v12, %s2102_s5  ;;  %v806_v11 = vmul.f32 %v804_v40, %v2500_v1  ;;  %v431_v12 = vmul.f32 %v430_v4, %v2268_v5  ;;  %v340_v5 = vmul.f32 %v338_v46, %v2253_v59 }
 0x110   : > { %v862_v46 = vmul.f32 %v860_v3, %v2500_v1 }
 0x113   : > { %695 = vrot.lane.b32.xlu0 %v691_v14, %s2107_s18  ;;  %641 = vrot.lane.b32.xlu1 %v636_v15, %s2103_s7  ;;  %v874_v14 = vstv %s2494_s30  ;;  %s2631_s30 = sld [smem:[#allocation4 + $0x3c]] }
 0x117   : > { %717 = vrot.lane.b32.xlu0 %v713_v18, %s2102_s5  ;;  %655 = vrot.lane.b32.xlu1 %v650_v19, %s2104_s11  ;;  %v875_v19 = vmul.f32 %v874_v14, %v2466_v39 }
 0x11b   : > { %731 = vrot.lane.b32.xlu0 %v727_v21, %s2103_s7  ;;  %669 = vrot.lane.b32.xlu1 %v664_v22, %s2105_s13  ;;  %v2518_v21 = vld [vmem:[#allocation2 + $0x6] sm:$0xff]  ;;  %v896_v22 = vstv %s2503_s3  ;;  %s2638_s3 = sld [smem:[#allocation4 + $0x3d]] }
 0x11c   : > { %v897_v27 = vmul.f32 %v896_v22, %v2518_v21  ;;  %v911_v34 = vmul.f32 %v910_v31, %v2518_v21 }
 0x11f   : > { %745 = vrot.lane.b32.xlu0 %v741_v24, %s2104_s11  ;;  %683 = vrot.lane.b32.xlu1 %v678_v25, %s2106_s15 }
 0x123   : > { %759 = vrot.lane.b32.xlu0 %v755_v28, %s2105_s13  ;;  %697 = vrot.lane.b32.xlu1 %v692_v29, %s2107_s18  ;;  %v834_v28 = vmul.f32 %v832_v52, %v2500_v1 }
 0x127   : > { %773 = vrot.lane.b32.xlu0 %v769_v32, %s2106_s15  ;;  %719 = vrot.lane.b32.xlu1 %v714_v33, %s2102_s5 }
 0x129   : > { %v350_v35 = vpop.permute.xlu0 %349 }
 0x12a   : > { %v355_v53 = vadd.f32 %v350_v35, %v339_v50  ;;  %v848_v35 = vmul.f32 %v846_v60, %v2500_v1  ;;  %v938_v50 = vstv %s2529_s8  ;;  %s2657_s8 = sld [smem:[#allocation4 + $0x40]] }
 0x12b   : > { %787 = vrot.lane.b32.xlu0 %v783_v36, %s2107_s18  ;;  %733 = vrot.lane.b32.xlu1 %v728_v38, %s2103_s7  ;;  %v924_v38 = vstv %s2522_s6  ;;  %s2648_s6 = sld [smem:[#allocation4 + $0x3e]] }
 0x12c   : > { %v925_v45 = vmul.f32 %v924_v38, %v2518_v21 }
 0x12d   : > { %v364_v41 = vpop.permute.xlu0 %363 }
 0x12e   : > { %v369_v57 = vadd.f32 %v364_v41, %v355_v53 }
 0x12f   : > { %809 = vrot.lane.b32.xlu0 %v805_v43, %s2102_s5  ;;  %747 = vrot.lane.b32.xlu1 %v742_v44, %s2104_s11 }
 0x131   : > { %v378_v47 = vpop.permute.xlu0 %377 }
 0x132   : > { %v383_v42 = vadd.f32 %v378_v47, %v369_v57  ;;  %v432_v47 = vmul.f32 %v430_v4, %v2306_v26  ;;  %v876_v57 = vmul.f32 %v874_v14, %v2500_v1  ;;  %v2552_v26 = vld [vmem:[#allocation2 + $0xe] sm:$0xff]  ;;  %v2570_v14 = vld [vmem:[#allocation2 + $0x18] sm:$0xff] }
 0x133   : > { %823 = vrot.lane.b32.xlu0 %v819_v48, %s2103_s7  ;;  %761 = vrot.lane.b32.xlu1 %v756_v49, %s2105_s13  ;;  %v898_v3 = vmul.f32 %v896_v22, %v2552_v26  ;;  %v1002_v22 = vstv %s2564_s21  ;;  %s2691_s21 = sld [smem:[#allocation4 + $0x23]] }
 0x135   : > { %v392_v54 = vpop.permute.xlu0 %391 }
 0x136   : > { %v397_v2 = vadd.f32 %v392_v54, %v383_v42  ;;  %v952_v42 = vstv %s2536_s12  ;;  %s2666_s12 = sld [smem:[#allocation4 + $0x41]] }
 0x137   : > { %837 = vrot.lane.b32.xlu0 %v833_v55, %s2104_s11  ;;  %775 = vrot.lane.b32.xlu1 %v770_v56, %s2106_s15  ;;  %v939_v56 = vmul.f32 %v938_v50, %v2518_v21 }
 0x139   : > { %v352_v61 = vpop.permute.xlu1 %351  ;;  %v406_v62 = vpop.permute.xlu0 %405 }
 0x13a   : > { %v411_v6 = vadd.f32 %v406_v62, %v397_v2  ;;  %v356_v23 = vadd.f32 %v352_v61, %v340_v5  ;;  %v522_v61 = vstv %s2538_s14  ;;  %v953_v2 = vmul.f32 %v952_v42, %v2518_v21  ;;  %s2675_s14 = sld [smem:[#allocation4 + $0x42]] }
 0x13b   : > { %851 = vrot.lane.b32.xlu0 %v847_v63, %s2105_s13  ;;  %789 = vrot.lane.b32.xlu1 %v784_v0, %s2107_s18  ;;  %v523_v4 = vmul.f32 %v522_v61, %v2326_v37 }
 0x13d   : > { %v366_v7 = vpop.permute.xlu1 %365  ;;  %v420_v8 = vpop.permute.xlu0 %419 }
 0x13e   : > { %v425_v13 = vadd.f32 %v420_v8, %v411_v6  ;;  %v370_v29 = vadd.f32 %v366_v7, %v356_v23  ;;  %v966_v7 = vstv %s2546_s16  ;;  %s2682_s16 = sld [smem:[#allocation4 + $0x43]] }
 0x13f   : > { %865 = vrot.lane.b32.xlu0 %v861_v10, %s2106_s15  ;;  %811 = vrot.lane.b32.xlu1 %v806_v11, %s2102_s5 }
 0x140   : > { %v433_v15 = vadd.f32 %v431_v12, %v425_v13  ;;  %v967_v12 = vmul.f32 %v966_v7, %v2518_v21  ;;  %v912_v13 = vmul.f32 %v910_v31, %v2552_v26  ;;  %v1016_v31 = vstv %s2573_s22  ;;  %s2699_s22 = sld [smem:[#allocation4 + $0x45]] }
 0x141   : > { %v380_v17 = vpop.permute.xlu1 %379  ;;  %v442_v18 = vpop.permute.xlu0 %441 }
 0x142   : > { %v384_v59 = vadd.f32 %v380_v17, %v370_v29  ;;  %v447_v40 = vadd.f32 %v442_v18, %v433_v15  ;;  %v988_v15 = vstv %s2555_s19  ;;  %s2689_s19 = sld [smem:[#allocation4 + $0x44]] }
 0x143   : > { %879 = vrot.lane.b32.xlu0 %v875_v19, %s2107_s18  ;;  %825 = vrot.lane.b32.xlu1 %v820_v20, %s2103_s7  ;;  %v989_v19 = vmul.f32 %v988_v15, %v2570_v14  ;;  %v926_v20 = vmul.f32 %v924_v38, %v2552_v26  ;;  %v524_v38 = vmul.f32 %v522_v61, %v2356_v51 }
 0x145   : > { %v394_v24 = vpop.permute.xlu1 %393  ;;  %v456_v25 = vpop.permute.xlu0 %455 }
 0x146   : > { %v398_v36 = vadd.f32 %v394_v24, %v384_v59  ;;  %v461_v48 = vadd.f32 %v456_v25, %v447_v40 }
 0x147   : > { %901 = vrot.lane.b32.xlu0 %v897_v27, %s2102_s5  ;;  %839 = vrot.lane.b32.xlu1 %v834_v28, %s2104_s11  ;;  %v940_v27 = vmul.f32 %v938_v50, %v2552_v26  ;;  %v1003_v28 = vmul.f32 %v1002_v22, %v2570_v14  ;;  %v1044_v50 = vstv %s2587_s24  ;;  %s2717_s24 = sld [smem:[#allocation4 + $0x48]] }
 0x149   : > { %v408_v32 = vpop.permute.xlu1 %407  ;;  %v470_v33 = vpop.permute.xlu0 %469 }
 0x14a   : > { %v412_v41 = vadd.f32 %v408_v32, %v398_v36  ;;  %v475_v52 = vadd.f32 %v470_v33, %v461_v48  ;;  %v1017_v36 = vmul.f32 %v1016_v31, %v2570_v14  ;;  %v968_v48 = vmul.f32 %v966_v7, %v2552_v26 }
 0x14b   : > { %915 = vrot.lane.b32.xlu0 %v911_v34, %s2103_s7  ;;  %853 = vrot.lane.b32.xlu1 %v848_v35, %s2105_s13  ;;  %v954_v35 = vmul.f32 %v952_v42, %v2552_v26  ;;  %v1080_v7 = vstv %s2606_s27  ;;  %s2740_s27 = sld [smem:[#allocation4 + $0x4b]] }
 0x14d   : > { %v422_v43 = vpop.permute.xlu1 %421  ;;  %v484_v44 = vpop.permute.xlu0 %483 }
 0x14e   : > { %v426_v49 = vadd.f32 %v422_v43, %v412_v41  ;;  %v489_v60 = vadd.f32 %v484_v44, %v475_v52  ;;  %v1030_v43 = vstv %s2580_s23  ;;  %v2604_v52 = vld [vmem:[#allocation2 + $0x20] sm:$0xff]  ;;  %s2708_s23 = sld [smem:[#allocation4 + $0x47]] }
 0x14f   : > { %929 = vrot.lane.b32.xlu0 %v925_v45, %s2104_s11  ;;  %867 = vrot.lane.b32.xlu1 %v862_v46, %s2106_s15 }
 0x150   : > { %v434_v53 = vadd.f32 %v432_v47, %v426_v49  ;;  %v1031_v49 = vmul.f32 %v1030_v43, %v2570_v14 }
 0x151   : > { %v444_v54 = vpop.permute.xlu1 %443  ;;  %v498_v55 = vpop.permute.xlu0 %497 }
 0x152   : > { %v503_v62 = vadd.f32 %v498_v55, %v489_v60  ;;  %v448_v37 = vadd.f32 %v444_v54, %v434_v53  ;;  %v614_v53 = vstv %s2589_s25  ;;  %v990_v60 = vmul.f32 %v988_v15, %v2604_v52  ;;  %s2726_s25 = sld [smem:[#allocation4 + $0x49]] }
 0x153   : > { %943 = vrot.lane.b32.xlu0 %v939_v56, %s2105_s13  ;;  %881 = vrot.lane.b32.xlu1 %v876_v57, %s2107_s18  ;;  %v1045_v57 = vmul.f32 %v1044_v50, %v2570_v14  ;;  %v615_v42 = vmul.f32 %v614_v53, %v2372_v58  ;;  %v1094_v15 = vstv %s2615_s28  ;;  %s2742_s28 = sld [smem:[#allocation4 + $0x2a]] }
 0x155   : > { %v458_v63 = vpop.permute.xlu1 %457  ;;  %v512_v0 = vpop.permute.xlu0 %511 }
 0x156   : > { %v517_v6 = vadd.f32 %v512_v0, %v503_v62  ;;  %v462_v5 = vadd.f32 %v458_v63, %v448_v37  ;;  %v1058_v62 = vstv %s2597_s26  ;;  %s2733_s26 = sld [smem:[#allocation4 + $0x4a]] }
 0x157   : > { %957 = vrot.lane.b32.xlu0 %v953_v2, %s2106_s15  ;;  %903 = vrot.lane.b32.xlu1 %v898_v3, %s2102_s5  ;;  %v1004_v3 = vmul.f32 %v1002_v22, %v2604_v52  ;;  %v1108_v22 = vstv %s2624_s29  ;;  %s2750_s29 = sld [smem:[#allocation4 + $0x4c]] }
 0x158   : > { %v525_v8 = vadd.f32 %v523_v4, %v517_v6  ;;  %v1059_v4 = vmul.f32 %v1058_v62, %v2570_v14  ;;  %v2621_v6 = vld [vmem:[#allocation2 + $0x19] sm:$0xff] }
 0x159   : > { %v472_v10 = vpop.permute.xlu1 %471  ;;  %v534_v11 = vpop.permute.xlu0 %533 }
 0x15a   : > { %v476_v23 = vadd.f32 %v472_v10, %v462_v5  ;;  %v539_v59 = vadd.f32 %v534_v11, %v525_v8  ;;  %v1018_v11 = vmul.f32 %v1016_v31, %v2604_v52  ;;  %v616_v31 = vmul.f32 %v614_v53, %v2402_v9 }
 0x15b   : > { %971 = vrot.lane.b32.xlu0 %v967_v12, %s2107_s18  ;;  %917 = vrot.lane.b32.xlu1 %v912_v13, %s2103_s7  ;;  %v1081_v12 = vmul.f32 %v1080_v7, %v2621_v6 }
 0x15d   : > { %v486_v17 = vpop.permute.xlu1 %485  ;;  %v548_v18 = vpop.permute.xlu0 %547 }
 0x15e   : > { %v490_v29 = vadd.f32 %v486_v17, %v476_v23  ;;  %v553_v40 = vadd.f32 %v548_v18, %v539_v59 }
 0x15f   : > { %993 = vrot.lane.b32.xlu0 %v989_v19, %s2102_s5  ;;  %931 = vrot.lane.b32.xlu1 %v926_v20, %s2104_s11  ;;  %v1032_v19 = vmul.f32 %v1030_v43, %v2604_v52  ;;  %v1095_v20 = vmul.f32 %v1094_v15, %v2621_v6  ;;  %v2654_v43 = vld [vmem:[#allocation2 + $0x21] sm:$0xff] }
 0x161   : > { %v500_v24 = vpop.permute.xlu1 %499  ;;  %v562_v25 = vpop.permute.xlu0 %561 }
 0x162   : > { %v504_v32 = vadd.f32 %v500_v24, %v490_v29  ;;  %v567_v44 = vadd.f32 %v562_v25, %v553_v40  ;;  %v1109_v29 = vmul.f32 %v1108_v22, %v2621_v6  ;;  %v1060_v40 = vmul.f32 %v1058_v62, %v2604_v52 }
 0x163   : > { %945 = vrot.lane.b32.xlu1 %v940_v27, %s2105_s13  ;;  %1007 = vrot.lane.b32.xlu0 %v1003_v28, %s2103_s7  ;;  %v1046_v28 = vmul.f32 %v1044_v50, %v2604_v52  ;;  %v1172_v62 = vstv %s2657_s8  ;;  %s2791_s8 = sld [smem:[#allocation4 + $0x52]] }
 0x165   : > { %v514_v33 = vpop.permute.xlu1 %513  ;;  %v576_v34 = vpop.permute.xlu0 %575 }
 0x166   : > { %v518_v41 = vadd.f32 %v514_v33, %v504_v32  ;;  %v581_v51 = vadd.f32 %v576_v34, %v567_v44  ;;  %v1122_v33 = vstv %s2631_s30  ;;  %v1136_v44 = vstv %s2638_s3  ;;  %s2759_s30 = sld [smem:[#allocation4 + $0x4e]]  ;;  %s2768_s3 = sld [smem:[#allocation4 + $0x4f]] }
 0x167   : > { %959 = vrot.lane.b32.xlu1 %v954_v35, %s2106_s15  ;;  %1021 = vrot.lane.b32.xlu0 %v1017_v36, %s2104_s11 }
 0x168   : > { %v526_v45 = vadd.f32 %v524_v38, %v518_v41  ;;  %v1123_v41 = vmul.f32 %v1122_v33, %v2621_v6 }
 0x169   : > { %v536_v46 = vpop.permute.xlu1 %535  ;;  %v590_v47 = vpop.permute.xlu0 %589 }
 0x16a   : > { %v595_v54 = vadd.f32 %v590_v47, %v581_v51  ;;  %v540_v58 = vadd.f32 %v536_v46, %v526_v45  ;;  %v706_v45 = vstv %s2640_s4  ;;  %v1137_v51 = vmul.f32 %v1136_v44, %v2621_v6  ;;  %s2777_s4 = sld [smem:[#allocation4 + $0x50]] }
 0x16b   : > { %973 = vrot.lane.b32.xlu1 %v968_v48, %s2107_s18  ;;  %1035 = vrot.lane.b32.xlu0 %v1031_v49, %s2105_s13  ;;  %v1082_v49 = vmul.f32 %v1080_v7, %v2654_v43  ;;  %v707_v50 = vmul.f32 %v706_v45, %v2418_v16  ;;  %v1186_v7 = vstv %s2666_s12  ;;  %s2795_s12 = sld [smem:[#allocation4 + $0x31]] }
 0x16d   : > { %v550_v55 = vpop.permute.xlu1 %549  ;;  %v604_v56 = vpop.permute.xlu0 %603 }
 0x16e   : > { %v609_v61 = vadd.f32 %v604_v56, %v595_v54  ;;  %v554_v13 = vadd.f32 %v550_v55, %v540_v58  ;;  %v1150_v54 = vstv %s2648_s6  ;;  %s2784_s6 = sld [smem:[#allocation4 + $0x51]] }
 0x16f   : > { %1049 = vrot.lane.b32.xlu0 %v1045_v57, %s2106_s15  ;;  %995 = vrot.lane.b32.xlu1 %v990_v60, %s2102_s5  ;;  %v1096_v60 = vmul.f32 %v1094_v15, %v2654_v43  ;;  %v1200_v15 = vstv %s2675_s14  ;;  %s2801_s14 = sld [smem:[#allocation4 + $0x53]] }
 0x170   : > { %v617_v63 = vadd.f32 %v615_v42, %v609_v61  ;;  %v1151_v42 = vmul.f32 %v1150_v54, %v2621_v6  ;;  %v2672_v61 = vld [vmem:[#allocation2 + $0x1a] sm:$0xff] }
 0x171   : > { %v564_v0 = vpop.permute.xlu1 %563  ;;  %v626_v2 = vpop.permute.xlu0 %625 }
 0x172   : > { %v568_v37 = vadd.f32 %v564_v0, %v554_v13  ;;  %v631_v23 = vadd.f32 %v626_v2, %v617_v63  ;;  %v1110_v2 = vmul.f32 %v1108_v22, %v2654_v43  ;;  %v708_v22 = vmul.f32 %v706_v45, %v2448_v30 }
 0x173   : > { %1009 = vrot.lane.b32.xlu1 %v1004_v3, %s2103_s7  ;;  %1063 = vrot.lane.b32.xlu0 %v1059_v4, %s2107_s18  ;;  %v1173_v3 = vmul.f32 %v1172_v62, %v2672_v61 }
 0x175   : > { %v578_v8 = vpop.permute.xlu1 %577  ;;  %v640_v10 = vpop.permute.xlu0 %639 }
 0x176   : > { %v582_v5 = vadd.f32 %v578_v8, %v568_v37  ;;  %v645_v59 = vadd.f32 %v640_v10, %v631_v23 }
 0x177   : > { %1023 = vrot.lane.b32.xlu1 %v1018_v11, %s2104_s11  ;;  %1085 = vrot.lane.b32.xlu0 %v1081_v12, %s2102_s5  ;;  %v1124_v11 = vmul.f32 %v1122_v33, %v2654_v43  ;;  %v1187_v12 = vmul.f32 %v1186_v7, %v2672_v61  ;;  %v2705_v33 = vld [vmem:[#allocation2 + $0x22] sm:$0xff] }
 0x179   : > { %v592_v17 = vpop.permute.xlu1 %591  ;;  %v654_v18 = vpop.permute.xlu0 %653 }
 0x17a   : > { %v596_v24 = vadd.f32 %v592_v17, %v582_v5  ;;  %v659_v34 = vadd.f32 %v654_v18, %v645_v59  ;;  %v1201_v5 = vmul.f32 %v1200_v15, %v2672_v61  ;;  %v1152_v59 = vmul.f32 %v1150_v54, %v2654_v43 }
 0x17b   : > { %1037 = vrot.lane.b32.xlu1 %v1032_v19, %s2105_s13  ;;  %1099 = vrot.lane.b32.xlu0 %v1095_v20, %s2103_s7  ;;  %v1138_v20 = vmul.f32 %v1136_v44, %v2654_v43  ;;  %v1264_v54 = vstv %s2708_s23  ;;  %s2842_s23 = sld [smem:[#allocation4 + $0x59]] }
 0x17d   : > { %v606_v25 = vpop.permute.xlu1 %605  ;;  %v668_v27 = vpop.permute.xlu0 %667 }
 0x17e   : > { %v610_v32 = vadd.f32 %v606_v25, %v596_v24  ;;  %v673_v9 = vadd.f32 %v668_v27, %v659_v34  ;;  %v1214_v25 = vstv %s2682_s16  ;;  %v1228_v34 = vstv %s2689_s19  ;;  %s2810_s16 = sld [smem:[#allocation4 + $0x55]]  ;;  %s2819_s19 = sld [smem:[#allocation4 + $0x56]] }
 0x17f   : > { %1051 = vrot.lane.b32.xlu1 %v1046_v28, %s2106_s15  ;;  %1113 = vrot.lane.b32.xlu0 %v1109_v29, %s2104_s11 }
 0x180   : > { %v618_v35 = vadd.f32 %v616_v31, %v610_v32  ;;  %v1215_v32 = vmul.f32 %v1214_v25, %v2672_v61 }
 0x181   : > { %v628_v36 = vpop.permute.xlu1 %627  ;;  %v682_v38 = vpop.permute.xlu0 %681 }
 0x182   : > { %v687_v46 = vadd.f32 %v682_v38, %v673_v9  ;;  %v632_v16 = vadd.f32 %v628_v36, %v618_v35  ;;  %v798_v35 = vstv %s2691_s21  ;;  %v1229_v9 = vmul.f32 %v1228_v34, %v2672_v61  ;;  %s2828_s21 = sld [smem:[#allocation4 + $0x57]] }
 0x183   : > { %1065 = vrot.lane.b32.xlu1 %v1060_v40, %s2107_s18  ;;  %1127 = vrot.lane.b32.xlu0 %v1123_v41, %s2105_s13  ;;  %v1174_v41 = vmul.f32 %v1172_v62, %v2705_v33  ;;  %v799_v44 = vmul.f32 %v798_v35, %v2466_v39  ;;  %v1278_v62 = vstv %s2717_s24  ;;  %s2846_s24 = sld [smem:[#allocation4 + $0x38]] }
 0x185   : > { %v642_v47 = vpop.permute.xlu1 %641  ;;  %v696_v48 = vpop.permute.xlu0 %695 }
 0x186   : > { %v701_v53 = vadd.f32 %v696_v48, %v687_v46  ;;  %v646_v4 = vadd.f32 %v642_v47, %v632_v16  ;;  %v1242_v46 = vstv %s2699_s22  ;;  %s2835_s22 = sld [smem:[#allocation4 + $0x58]] }
 0x187   : > { %1087 = vrot.lane.b32.xlu1 %v1082_v49, %s2102_s5  ;;  %1141 = vrot.lane.b32.xlu0 %v1137_v51, %s2106_s15  ;;  %v1188_v51 = vmul.f32 %v1186_v7, %v2705_v33  ;;  %v1292_v7 = vstv %s2726_s25  ;;  %s2852_s25 = sld [smem:[#allocation4 + $0x5a]] }
 0x188   : > { %v709_v55 = vadd.f32 %v707_v50, %v701_v53  ;;  %v1243_v50 = vmul.f32 %v1242_v46, %v2672_v61  ;;  %v2723_v53 = vld [vmem:[#allocation2 + $0x1b] sm:$0xff] }
 0x189   : > { %v656_v56 = vpop.permute.xlu1 %655  ;;  %v718_v57 = vpop.permute.xlu0 %717 }
 0x18a   : > { %v660_v58 = vadd.f32 %v656_v56, %v646_v4  ;;  %v723_v37 = vadd.f32 %v718_v57, %v709_v55  ;;  %v1202_v57 = vmul.f32 %v1200_v15, %v2705_v33  ;;  %v800_v15 = vmul.f32 %v798_v35, %v2500_v1 }
 0x18b   : > { %1101 = vrot.lane.b32.xlu1 %v1096_v60, %s2103_s7  ;;  %1155 = vrot.lane.b32.xlu0 %v1151_v42, %s2107_s18  ;;  %v1265_v60 = vmul.f32 %v1264_v54, %v2723_v53 }
 0x18d   : > { %v670_v63 = vpop.permute.xlu1 %669  ;;  %v732_v0 = vpop.permute.xlu0 %731 }
 0x18e   : > { %v674_v13 = vadd.f32 %v670_v63, %v660_v58  ;;  %v737_v23 = vadd.f32 %v732_v0, %v723_v37 }
 0x18f   : > { %1115 = vrot.lane.b32.xlu1 %v1110_v2, %s2104_s11  ;;  %1177 = vrot.lane.b32.xlu0 %v1173_v3, %s2102_s5  ;;  %v1216_v2 = vmul.f32 %v1214_v25, %v2705_v33  ;;  %v1279_v3 = vmul.f32 %v1278_v62, %v2723_v53  ;;  %v2756_v25 = vld [vmem:[#allocation2 + $0x23] sm:$0xff] }
 0x191   : > { %v684_v8 = vpop.permute.xlu1 %683  ;;  %v746_v10 = vpop.permute.xlu0 %745 }
 0x192   : > { %v688_v17 = vadd.f32 %v684_v8, %v674_v13  ;;  %v751_v27 = vadd.f32 %v746_v10, %v737_v23  ;;  %v1293_v13 = vmul.f32 %v1292_v7, %v2723_v53  ;;  %v1244_v23 = vmul.f32 %v1242_v46, %v2705_v33 }
 0x193   : > { %1129 = vrot.lane.b32.xlu1 %v1124_v11, %s2105_s13  ;;  %1191 = vrot.lane.b32.xlu0 %v1187_v12, %s2103_s7  ;;  %v1230_v12 = vmul.f32 %v1228_v34, %v2705_v33  ;;  %v1356_v46 = vstv %s2759_s30  ;;  %s2893_s30 = sld [smem:[#allocation4 + $0x60]] }
 0x195   : > { %v698_v18 = vpop.permute.xlu1 %697  ;;  %v760_v19 = vpop.permute.xlu0 %759 }
 0x196   : > { %v702_v24 = vadd.f32 %v698_v18, %v688_v17  ;;  %v765_v30 = vadd.f32 %v760_v19, %v751_v27  ;;  %v1306_v18 = vstv %s2733_s26  ;;  %v1320_v27 = vstv %s2740_s27  ;;  %s2861_s26 = sld [smem:[#allocation4 + $0x5c]]  ;;  %s2870_s27 = sld [smem:[#allocation4 + $0x5d]] }
 0x197   : > { %1143 = vrot.lane.b32.xlu1 %v1138_v20, %s2106_s15  ;;  %1205 = vrot.lane.b32.xlu0 %v1201_v5, %s2104_s11 }
 0x198   : > { %v710_v28 = vadd.f32 %v708_v22, %v702_v24  ;;  %v1307_v24 = vmul.f32 %v1306_v18, %v2723_v53 }
 0x199   : > { %v720_v29 = vpop.permute.xlu1 %719  ;;  %v774_v31 = vpop.permute.xlu0 %773 }
 0x19a   : > { %v779_v36 = vadd.f32 %v774_v31, %v765_v30  ;;  %v724_v39 = vadd.f32 %v720_v29, %v710_v28  ;;  %v890_v28 = vstv %s2742_s28  ;;  %v1321_v30 = vmul.f32 %v1320_v27, %v2723_v53  ;;  %s2879_s28 = sld [smem:[#allocation4 + $0x5e]] }
 0x19b   : > { %1157 = vrot.lane.b32.xlu1 %v1152_v59, %s2107_s18  ;;  %1219 = vrot.lane.b32.xlu0 %v1215_v32, %s2105_s13  ;;  %v1266_v32 = vmul.f32 %v1264_v54, %v2756_v25  ;;  %v891_v34 = vmul.f32 %v890_v28, %v2518_v21  ;;  %v1370_v54 = vstv %s2768_s3  ;;  %s2897_s3 = sld [smem:[#allocation4 + $0x3f]] }
 0x19d   : > { %v734_v38 = vpop.permute.xlu1 %733  ;;  %v788_v40 = vpop.permute.xlu0 %787 }
 0x19e   : > { %v793_v45 = vadd.f32 %v788_v40, %v779_v36  ;;  %v738_v42 = vadd.f32 %v734_v38, %v724_v39  ;;  %v1334_v36 = vstv %s2750_s29  ;;  %s2886_s29 = sld [smem:[#allocation4 + $0x5f]] }
 0x19f   : > { %1179 = vrot.lane.b32.xlu1 %v1174_v41, %s2102_s5  ;;  %1233 = vrot.lane.b32.xlu0 %v1229_v9, %s2106_s15  ;;  %v1280_v9 = vmul.f32 %v1278_v62, %v2756_v25  ;;  %v1384_v62 = vstv %s2777_s4  ;;  %s2903_s4 = sld [smem:[#allocation4 + $0x61]] }
 0x1a0   : > { %v801_v47 = vadd.f32 %v799_v44, %v793_v45  ;;  %v1335_v44 = vmul.f32 %v1334_v36, %v2723_v53  ;;  %v2774_v45 = vld [vmem:[#allocation2 + $0x1c] sm:$0xff] }
 0x1a1   : > { %v748_v48 = vpop.permute.xlu1 %747  ;;  %v810_v49 = vpop.permute.xlu0 %809 }
 0x1a2   : > { %v752_v16 = vadd.f32 %v748_v48, %v738_v42  ;;  %v815_v58 = vadd.f32 %v810_v49, %v801_v47  ;;  %v1294_v49 = vmul.f32 %v1292_v7, %v2756_v25  ;;  %v892_v7 = vmul.f32 %v890_v28, %v2552_v26 }
 0x1a3   : > { %1193 = vrot.lane.b32.xlu1 %v1188_v51, %s2103_s7  ;;  %1247 = vrot.lane.b32.xlu0 %v1243_v50, %s2107_s18  ;;  %v1357_v51 = vmul.f32 %v1356_v46, %v2774_v45 }
 0x1a5   : > { %v762_v55 = vpop.permute.xlu1 %761  ;;  %v824_v56 = vpop.permute.xlu0 %823 }
 0x1a6   : > { %v766_v4 = vadd.f32 %v762_v55, %v752_v16  ;;  %v829_v37 = vadd.f32 %v824_v56, %v815_v58 }
 0x1a7   : > { %1207 = vrot.lane.b32.xlu1 %v1202_v57, %s2104_s11  ;;  %1269 = vrot.lane.b32.xlu0 %v1265_v60, %s2102_s5  ;;  %v1308_v57 = vmul.f32 %v1306_v18, %v2756_v25  ;;  %v1371_v60 = vmul.f32 %v1370_v54, %v2774_v45  ;;  %v2807_v18 = vld [vmem:[#allocation2 + $0x24] sm:$0xff] }
 0x1a9   : > { %v776_v63 = vpop.permute.xlu1 %775  ;;  %v838_v0 = vpop.permute.xlu0 %837 }
 0x1aa   : > { %v780_v8 = vadd.f32 %v776_v63, %v766_v4  ;;  %v843_v19 = vadd.f32 %v838_v0, %v829_v37  ;;  %v1385_v4 = vmul.f32 %v1384_v62, %v2774_v45  ;;  %v1336_v37 = vmul.f32 %v1334_v36, %v2756_v25  ;;  %v2825_v36 = vld [vmem:[#allocation2 + $0x1d] sm:$0xff] }
 0x1ab   : > { %1221 = vrot.lane.b32.xlu1 %v1216_v2, %s2105_s13  ;;  %1283 = vrot.lane.b32.xlu0 %v1279_v3, %s2103_s7  ;;  %v1322_v3 = vmul.f32 %v1320_v27, %v2756_v25 }
 0x1ad   : > { %v790_v10 = vpop.permute.xlu1 %789  ;;  %v852_v11 = vpop.permute.xlu0 %851 }
 0x1ae   : > { %v794_v17 = vadd.f32 %v790_v10, %v780_v8  ;;  %v857_v1 = vadd.f32 %v852_v11, %v843_v19  ;;  %v1398_v10 = vstv %s2784_s6  ;;  %v1412_v19 = vstv %s2791_s8  ;;  %s2111_s6 = smov 64   ;;  %s2112_s8 = smov 48  }
 0x1af   : > { %1235 = vrot.lane.b32.xlu1 %v1230_v12, %s2106_s15  ;;  %1297 = vrot.lane.b32.xlu0 %v1293_v13, %s2104_s11 }
 0x1b0   : > { %v802_v20 = vadd.f32 %v800_v15, %v794_v17  ;;  %v1399_v17 = vmul.f32 %v1398_v10, %v2774_v45 }
 0x1b1   : > { %v812_v5 = vpop.permute.xlu1 %811  ;;  %v866_v22 = vpop.permute.xlu0 %865 }
 0x1b2   : > { %v871_v29 = vadd.f32 %v866_v22, %v857_v1  ;;  %v816_v21 = vadd.f32 %v812_v5, %v802_v20  ;;  %v982_v20 = vstv %s2795_s12  ;;  %v1413_v1 = vmul.f32 %v1412_v19, %v2774_v45  ;;  %s2113_s12 = smov 80  }
 0x1b3   : > { %1249 = vrot.lane.b32.xlu1 %v1244_v23, %s2107_s18  ;;  %1311 = vrot.lane.b32.xlu0 %v1307_v24, %s2105_s13  ;;  %v1358_v24 = vmul.f32 %v1356_v46, %v2807_v18  ;;  %v983_v27 = vmul.f32 %v982_v20, %v2570_v14  ;;  %v1448_v14 = vstv %s2810_s16  ;;  %s2115_s16 = smov 112  }
 0x1b5   : > { %v826_v31 = vpop.permute.xlu1 %825  ;;  %v880_v59 = vpop.permute.xlu0 %879 }
 0x1b6   : > { %v885_v35 = vadd.f32 %v880_v59, %v871_v29  ;;  %v830_v50 = vadd.f32 %v826_v31, %v816_v21  ;;  %v1426_v29 = vstv %s2801_s14  ;;  %s2114_s14 = smov 96  }
 0x1b7   : > { %1271 = vrot.lane.b32.xlu1 %v1266_v32, %s2102_s5  ;;  %1325 = vrot.lane.b32.xlu0 %v1321_v30, %s2106_s15  ;;  %v1372_v30 = vmul.f32 %v1370_v54, %v2807_v18 }
 0x1b8   : > { %v893_v38 = vadd.f32 %v891_v34, %v885_v35  ;;  %v1427_v34 = vmul.f32 %v1426_v29, %v2774_v45 }
 0x1b9   : > { %v840_v40 = vpop.permute.xlu1 %839  ;;  %v902_v41 = vpop.permute.xlu0 %901 }
 0x1ba   : > { %v844_v39 = vadd.f32 %v840_v40, %v830_v50  ;;  %v907_v16 = vadd.f32 %v902_v41, %v893_v38  ;;  %v1400_v50 = vmul.f32 %v1398_v10, %v2807_v18 }
 0x1bb   : > { %1285 = vrot.lane.b32.xlu1 %v1280_v9, %s2103_s7  ;;  %1339 = vrot.lane.b32.xlu0 %v1335_v44, %s2107_s18  ;;  %v1386_v9 = vmul.f32 %v1384_v62, %v2807_v18  ;;  %v1449_v44 = vmul.f32 %v1448_v14, %v2825_v36  ;;  %v1414_v62 = vmul.f32 %v1412_v19, %v2807_v18 }
 0x1bd   : > { %v854_v47 = vpop.permute.xlu1 %853  ;;  %v916_v48 = vpop.permute.xlu0 %915 }
 0x1be   : > { %v858_v42 = vadd.f32 %v854_v47, %v844_v39  ;;  %v921_v58 = vadd.f32 %v916_v48, %v907_v16  ;;  %v1462_v47 = vstv %s2819_s19 }
 0x1bf   : > { %1299 = vrot.lane.b32.xlu1 %v1294_v49, %s2104_s11  ;;  %1361 = vrot.lane.b32.xlu0 %v1357_v51, %s2102_s5  ;;  %v1463_v54 = vmul.f32 %v1462_v47, %v2825_v36 }
 0x1c1   : > { %v868_v55 = vpop.permute.xlu1 %867  ;;  %v930_v56 = vpop.permute.xlu0 %929 }
 0x1c2   : > { %v872_v63 = vadd.f32 %v868_v55, %v858_v42  ;;  %v935_v11 = vadd.f32 %v930_v56, %v921_v58  ;;  %v1476_v56 = vstv %s2828_s21 }
 0x1c3   : > { %1313 = vrot.lane.b32.xlu1 %v1308_v57, %s2105_s13  ;;  %1375 = vrot.lane.b32.xlu0 %v1371_v60, %s2103_s7  ;;  %v1477_v16 = vmul.f32 %v1476_v56, %v2825_v36 }
 0x1c5   : > { %v882_v0 = vpop.permute.xlu1 %881  ;;  %v944_v2 = vpop.permute.xlu0 %943 }
 0x1c6   : > { %v886_v8 = vadd.f32 %v882_v0, %v872_v63  ;;  %v949_v26 = vadd.f32 %v944_v2, %v935_v11  ;;  %v984_v0 = vmul.f32 %v982_v20, %v2604_v52  ;;  %v1504_v52 = vstv %s2842_s23 }
 0x1c7   : > { %1327 = vrot.lane.b32.xlu1 %v1322_v3, %s2106_s15  ;;  %1389 = vrot.lane.b32.xlu0 %v1385_v4, %s2104_s11  ;;  %v1490_v3 = vstv %s2835_s22  ;;  %v1505_v19 = vmul.f32 %v1504_v52, %v2825_v36  ;;  %s157_s22 = scalar_lea.vmem %s3138_s2, %s2011_s17 }
 0x1c8   : > { %v894_v12 = vadd.f32 %v892_v7, %v886_v8  ;;  %v1428_v8 = vmul.f32 %v1426_v29, %v2807_v18  ;;  %v1491_v10 = vmul.f32 %v1490_v3, %v2825_v36 }
 0x1c9   : > { %v904_v13 = vpop.permute.xlu1 %903  ;;  %v958_v15 = vpop.permute.xlu0 %957 }
 0x1ca   : > { %v963_v5 = vadd.f32 %v958_v15, %v949_v26  ;;  %v908_v38 = vadd.f32 %v904_v13, %v894_v12  ;;  %v2858_v12 = vld [vmem:[#allocation2 + $0x25] sm:$0xff]  ;;  %v1074_v13 = vstv %s2846_s24 }
 0x1cb   : > { %1341 = vrot.lane.b32.xlu1 %v1336_v37, %s2107_s18  ;;  %1403 = vrot.lane.b32.xlu0 %v1399_v17, %s2105_s13  ;;  %v1450_v26 = vmul.f32 %v1448_v14, %v2858_v12 }
 0x1cd   : > { %v918_v22 = vpop.permute.xlu1 %917  ;;  %v972_v23 = vpop.permute.xlu0 %971 }
 0x1ce   : > { %v977_v28 = vadd.f32 %v972_v23, %v963_v5  ;;  %v922_v46 = vadd.f32 %v918_v22, %v908_v38  ;;  %v1075_v5 = vmul.f32 %v1074_v13, %v2621_v6  ;;  %v1518_v23 = vstv %s2852_s25 }
 0x1cf   : > { %1363 = vrot.lane.b32.xlu1 %v1358_v24, %s2102_s5  ;;  %1417 = vrot.lane.b32.xlu0 %v1413_v1, %s2106_s15  ;;  %v1519_v29 = vmul.f32 %v1518_v23, %v2825_v36  ;;  %v1540_v6 = vstv %s2861_s26  ;;  %v1554_v38 = vstv %s2870_s27 }
 0x1d0   : > { %v985_v31 = vadd.f32 %v983_v27, %v977_v28  ;;  %v1464_v28 = vmul.f32 %v1462_v47, %v2858_v12 }
 0x1d1   : > { %v932_v59 = vpop.permute.xlu1 %931  ;;  %v994_v32 = vpop.permute.xlu0 %993 }
 0x1d2   : > { %v999_v35 = vadd.f32 %v994_v32, %v985_v31  ;;  %v936_v48 = vadd.f32 %v932_v59, %v922_v46  ;;  %v2876_v59 = vld [vmem:[#allocation2 + $0x1e] sm:$0xff]  ;;  %v1568_v46 = vstv %s2879_s28 }
 0x1d3   : > { %1377 = vrot.lane.b32.xlu1 %v1372_v30, %s2103_s7  ;;  %1431 = vrot.lane.b32.xlu0 %v1427_v34, %s2107_s18  ;;  %v1478_v34 = vmul.f32 %v1476_v56, %v2858_v12  ;;  %v1582_v56 = vstv %s2886_s29 }
 0x1d5   : > { %v946_v40 = vpop.permute.xlu1 %945  ;;  %v1008_v41 = vpop.permute.xlu0 %1007 }
 0x1d6   : > { %v1013_v21 = vadd.f32 %v1008_v41, %v999_v35  ;;  %v950_v39 = vadd.f32 %v946_v40, %v936_v48  ;;  %v1541_v35 = vmul.f32 %v1540_v6, %v2876_v59 }
 0x1d7   : > { %1391 = vrot.lane.b32.xlu1 %v1386_v9, %s2104_s11  ;;  %1453 = vrot.lane.b32.xlu0 %v1449_v44, %s2102_s5  ;;  %v1492_v9 = vmul.f32 %v1490_v3, %v2858_v12  ;;  %v1555_v44 = vmul.f32 %v1554_v38, %v2876_v59  ;;  %v1166_v3 = vstv %s2897_s3 }
 0x1d9   : > { %v960_v49 = vpop.permute.xlu1 %959  ;;  %v1022_v51 = vpop.permute.xlu0 %1021 }
 0x1da   : > { %v1027_v55 = vadd.f32 %v1022_v51, %v1013_v21  ;;  %v964_v57 = vadd.f32 %v960_v49, %v950_v39  ;;  %v1506_v51 = vmul.f32 %v1504_v52, %v2858_v12  ;;  %v1076_v39 = vmul.f32 %v1074_v13, %v2654_v43  ;;  %v2909_v43 = vld [vmem:[#allocation2 + $0x26] sm:$0xff] }
 0x1db   : > { %1405 = vrot.lane.b32.xlu1 %v1400_v50, %s2105_s13  ;;  %1467 = vrot.lane.b32.xlu0 %v1463_v54, %s2103_s7  ;;  %v1569_v50 = vmul.f32 %v1568_v46, %v2876_v59  ;;  %v1610_v13 = vstv %s2903_s4 }
 0x1dd   : > { %v974_v60 = vpop.permute.xlu1 %973  ;;  %v1036_v42 = vpop.permute.xlu0 %1035 }
 0x1de   : > { %v978_v63 = vadd.f32 %v974_v60, %v964_v57  ;;  %v1041_v2 = vadd.f32 %v1036_v42, %v1027_v55 }
 0x1df   : > { %1419 = vrot.lane.b32.xlu1 %v1414_v62, %s2106_s15  ;;  %1481 = vrot.lane.b32.xlu0 %v1477_v16, %s2104_s11  ;;  %v1520_v16 = vmul.f32 %v1518_v23, %v2858_v12 }
 0x1e0   : > { %v986_v4 = vadd.f32 %v984_v0, %v978_v63  ;;  %v1583_v63 = vmul.f32 %v1582_v56, %v2876_v59 }
 0x1e1   : > { %v996_v7 = vpop.permute.xlu1 %995  ;;  %v1050_v58 = vpop.permute.xlu0 %1049 }
 0x1e2   : > { %v1000_v11 = vadd.f32 %v996_v7, %v986_v4  ;;  %v1055_v15 = vadd.f32 %v1050_v58, %v1041_v2  ;;  %v1596_v2 = vstv %s2893_s30 }
 0x1e3   : > { %1433 = vrot.lane.b32.xlu1 %v1428_v8, %s2107_s18  ;;  %1495 = vrot.lane.b32.xlu0 %v1491_v10, %s2105_s13  ;;  %v1542_v8 = vmul.f32 %v1540_v6, %v2909_v43  ;;  %v1597_v10 = vmul.f32 %v1596_v2, %v2876_v59 }
 0x1e5   : > { %v1010_v37 = vpop.permute.xlu1 %1009  ;;  %v1064_v17 = vpop.permute.xlu0 %1063 }
 0x1e6   : > { %v1014_v20 = vadd.f32 %v1010_v37, %v1000_v11  ;;  %v1069_v22 = vadd.f32 %v1064_v17, %v1055_v15  ;;  %v1167_v11 = vmul.f32 %v1166_v3, %v2672_v61 }
 0x1e7   : > { %1455 = vrot.lane.b32.xlu1 %v1450_v26, %s2102_s5  ;;  %1509 = vrot.lane.b32.xlu0 %v1505_v19, %s2106_s15  ;;  %v1556_v26 = vmul.f32 %v1554_v38, %v2909_v43  ;;  %v1611_v19 = vmul.f32 %v1610_v13, %v2876_v59  ;;  %v1168_v38 = vmul.f32 %v1166_v3, %v2705_v33 }
 0x1e8   : > { %v1077_v24 = vadd.f32 %v1075_v5, %v1069_v22  ;;  %v1570_v22 = vmul.f32 %v1568_v46, %v2909_v43  ;;  %v1612_v46 = vmul.f32 %v1610_v13, %v2909_v43 }
 0x1e9   : > { %v1024_v1 = vpop.permute.xlu1 %1023  ;;  %v1086_v27 = vpop.permute.xlu0 %1085 }
 0x1ea   : > { %v1028_v31 = vadd.f32 %v1024_v1, %v1014_v20  ;;  %v1091_v21 = vadd.f32 %v1086_v27, %v1077_v24 }
 0x1eb   : > { %1469 = vrot.lane.b32.xlu1 %v1464_v28, %s2103_s7  ;;  %1523 = vrot.lane.b32.xlu0 %v1519_v29, %s2107_s18  ;;  %v1584_v28 = vmul.f32 %v1582_v56, %v2909_v43 }
 0x1ed   : > { %v1038_v32 = vpop.permute.xlu1 %1037  ;;  %v1100_v30 = vpop.permute.xlu0 %1099 }
 0x1ee   : > { %v1042_v14 = vadd.f32 %v1038_v32, %v1028_v31  ;;  %v1105_v54 = vadd.f32 %v1100_v30, %v1091_v21 }
 0x1ef   : > { %1483 = vrot.lane.b32.xlu1 %v1478_v34, %s2104_s11  ;;  %1545 = vrot.lane.b32.xlu0 %v1541_v35, %s2102_s5  ;;  %v1598_v34 = vmul.f32 %v1596_v2, %v2909_v43 }
 0x1f1   : > { %v1052_v40 = vpop.permute.xlu1 %1051  ;;  %v1114_v41 = vpop.permute.xlu0 %1113 }
 0x1f2   : > { %v1056_v47 = vadd.f32 %v1052_v40, %v1042_v14  ;;  %v1119_v57 = vadd.f32 %v1114_v41, %v1105_v54 }
 0x1f3   : > { %1497 = vrot.lane.b32.xlu1 %v1492_v9, %s2105_s13  ;;  %1559 = vrot.lane.b32.xlu0 %v1555_v44, %s2103_s7 }
 0x1f5   : > { %v1066_v48 = vpop.permute.xlu1 %1065  ;;  %v1128_v49 = vpop.permute.xlu0 %1127 }
 0x1f6   : > { %v1070_v55 = vadd.f32 %v1066_v48, %v1056_v47  ;;  %v1133_v0 = vadd.f32 %v1128_v49, %v1119_v57 }
 0x1f7   : > { %1511 = vrot.lane.b32.xlu1 %v1506_v51, %s2106_s15  ;;  %1573 = vrot.lane.b32.xlu0 %v1569_v50, %s2104_s11 }
 0x1f8   : > { %v1078_v60 = vadd.f32 %v1076_v39, %v1070_v55 }
 0x1f9   : > { %v1088_v42 = vpop.permute.xlu1 %1087  ;;  %v1142_v62 = vpop.permute.xlu0 %1141 }
 0x1fa   : > { %v1147_v4 = vadd.f32 %v1142_v62, %v1133_v0  ;;  %v1092_v20 = vadd.f32 %v1088_v42, %v1078_v60 }
 0x1fb   : > { %1525 = vrot.lane.b32.xlu1 %v1520_v16, %s2107_s18  ;;  %1587 = vrot.lane.b32.xlu0 %v1583_v63, %s2105_s13 }
 0x1fd   : > { %v1102_v7 = vpop.permute.xlu1 %1101  ;;  %v1156_v58 = vpop.permute.xlu0 %1155 }
 0x1fe   : > { %v1161_v52 = vadd.f32 %v1156_v58, %v1147_v4  ;;  %v1106_v23 = vadd.f32 %v1102_v7, %v1092_v20 }
 0x1ff   : > { %1547 = vrot.lane.b32.xlu1 %v1542_v8, %s2102_s5  ;;  %1601 = vrot.lane.b32.xlu0 %v1597_v10, %s2106_s15  ;;  %s2929_s5 = sld [smem:[#allocation4 + $0x46]] }
 0x200   : > { %v1169_v15 = vadd.f32 %v1167_v11, %v1161_v52 }
 0x201   : > { %v1116_v37 = vpop.permute.xlu1 %1115  ;;  %v1178_v17 = vpop.permute.xlu0 %1177 }
 0x202   : > { %v1120_v24 = vadd.f32 %v1116_v37, %v1106_v23  ;;  %v1183_v31 = vadd.f32 %v1178_v17, %v1169_v15 }
 0x203   : > { %1561 = vrot.lane.b32.xlu1 %v1556_v26, %s2103_s7  ;;  %1615 = vrot.lane.b32.xlu0 %v1611_v19, %s2107_s18  ;;  %s2938_s7 = sld [smem:[#allocation4 + $0x4d]] }
 0x205   : > { %v1130_v5 = vpop.permute.xlu1 %1129  ;;  %v1192_v61 = vpop.permute.xlu0 %1191  ;;  %v1258_v47 = vstv %s2929_s5 }
 0x206   : > { %v1134_v29 = vadd.f32 %v1130_v5, %v1120_v24  ;;  %v1197_v35 = vadd.f32 %v1192_v61, %v1183_v31  ;;  %v1259_v54 = vmul.f32 %v1258_v47, %v2723_v53  ;;  %v1260_v8 = vmul.f32 %v1258_v47, %v2756_v25 }
 0x207   : > { %1575 = vrot.lane.b32.xlu1 %v1570_v22, %s2104_s11  ;;  %s2943_s11 = sld [smem:[#allocation4 + $0x54]] }
 0x209   : > { %v1144_v1 = vpop.permute.xlu1 %1143  ;;  %v1206_v27 = vpop.permute.xlu0 %1205  ;;  %v1350_v37 = vstv %s2938_s7 }
 0x20a   : > { %v1148_v6 = vadd.f32 %v1144_v1, %v1134_v29  ;;  %v1211_v40 = vadd.f32 %v1206_v27, %v1197_v35  ;;  %v1351_v5 = vmul.f32 %v1350_v37, %v2774_v45 }
 0x20b   : > { %1589 = vrot.lane.b32.xlu1 %v1584_v28, %s2105_s13  ;;  %s2948_s13 = sld [smem:[#allocation4 + $0x5b]] }
 0x20d   : > { %v1158_v32 = vpop.permute.xlu1 %1157  ;;  %v1220_v30 = vpop.permute.xlu0 %1219 }
 0x20e   : > { %v1162_v14 = vadd.f32 %v1158_v32, %v1148_v6  ;;  %v1225_v21 = vadd.f32 %v1220_v30, %v1211_v40 }
 0x20f   : > { %1603 = vrot.lane.b32.xlu1 %v1598_v34, %s2106_s15  ;;  %s2109_s15 = smov 16  }
 0x210   : > { %v1170_v41 = vadd.f32 %v1168_v38, %v1162_v14  ;;  %v1352_v38 = vmul.f32 %v1350_v37, %v2807_v18 }
 0x211   : > { %v1180_v9 = vpop.permute.xlu1 %1179  ;;  %v1234_v44 = vpop.permute.xlu0 %1233 }
 0x212   : > { %v1239_v48 = vadd.f32 %v1234_v44, %v1225_v21  ;;  %v1184_v56 = vadd.f32 %v1180_v9, %v1170_v41  ;;  %v1442_v21 = vstv %s2943_s11 }
 0x213   : > { %1617 = vrot.lane.b32.xlu1 %v1612_v46, %s2107_s18  ;;  %s2110_s18 = smov 32  }
 0x215   : > { %v1194_v49 = vpop.permute.xlu1 %1193  ;;  %v1248_v51 = vpop.permute.xlu0 %1247 }
 0x216   : > { %v1253_v50 = vadd.f32 %v1248_v51, %v1239_v48  ;;  %v1198_v42 = vadd.f32 %v1194_v49, %v1184_v56 }
 0x218   : > { %v1261_v39 = vadd.f32 %v1259_v54, %v1253_v50  ;;  %v1443_v50 = vmul.f32 %v1442_v21, %v2825_v36 }
 0x219   : > { %v1208_v33 = vpop.permute.xlu1 %1207  ;;  %v1270_v55 = vpop.permute.xlu0 %1269 }
 0x21a   : > { %v1212_v62 = vadd.f32 %v1208_v33, %v1198_v42  ;;  %v1275_v2 = vadd.f32 %v1270_v55, %v1261_v39 }
 0x21d   : > { %v1222_v57 = vpop.permute.xlu1 %1221  ;;  %v1284_v60 = vpop.permute.xlu0 %1283 }
 0x21e   : > { %v1226_v0 = vadd.f32 %v1222_v57, %v1212_v62  ;;  %v1289_v58 = vadd.f32 %v1284_v60, %v1275_v2 }
 0x221   : > { %v1236_v16 = vpop.permute.xlu1 %1235  ;;  %v1298_v63 = vpop.permute.xlu0 %1297 }
 0x222   : > { %v1240_v3 = vadd.f32 %v1236_v16, %v1226_v0  ;;  %v1303_v10 = vadd.f32 %v1298_v63, %v1289_v58 }
 0x225   : > { %v1250_v4 = vpop.permute.xlu1 %1249  ;;  %v1312_v7 = vpop.permute.xlu0 %1311 }
 0x226   : > { %v1254_v53 = vadd.f32 %v1250_v4, %v1240_v3  ;;  %v1317_v15 = vadd.f32 %v1312_v7, %v1303_v10  ;;  %v1444_v7 = vmul.f32 %v1442_v21, %v2858_v12 }
 0x228   : > { %v1262_v11 = vadd.f32 %v1260_v8, %v1254_v53 }
 0x229   : > { %v1272_v52 = vpop.permute.xlu1 %1271  ;;  %v1326_v13 = vpop.permute.xlu0 %1325 }
 0x22a   : > { %v1331_v17 = vadd.f32 %v1326_v13, %v1317_v15  ;;  %v1276_v24 = vadd.f32 %v1272_v52, %v1262_v11  ;;  %v1534_v52 = vstv %s2948_s13 }
 0x22d   : > { %v1286_v26 = vpop.permute.xlu1 %1285  ;;  %v1340_v19 = vpop.permute.xlu0 %1339 }
 0x22e   : > { %v1345_v20 = vadd.f32 %v1340_v19, %v1331_v17  ;;  %v1290_v28 = vadd.f32 %v1286_v26, %v1276_v24  ;;  %v1535_v26 = vmul.f32 %v1534_v52, %v2876_v59 }
 0x230   : > { %v1353_v61 = vadd.f32 %v1351_v5, %v1345_v20 }
 0x231   : > { %v1300_v22 = vpop.permute.xlu1 %1299  ;;  %v1362_v23 = vpop.permute.xlu0 %1361 }
 0x232   : > { %v1304_v25 = vadd.f32 %v1300_v22, %v1290_v28  ;;  %v1367_v32 = vadd.f32 %v1362_v23, %v1353_v61 }
 0x235   : > { %v1314_v1 = vpop.permute.xlu1 %1313  ;;  %v1376_v27 = vpop.permute.xlu0 %1375 }
 0x236   : > { %v1318_v6 = vadd.f32 %v1314_v1, %v1304_v25  ;;  %v1381_v14 = vadd.f32 %v1376_v27, %v1367_v32 }
 0x239   : > { %v1328_v29 = vpop.permute.xlu1 %1327  ;;  %v1390_v31 = vpop.permute.xlu0 %1389 }
 0x23a   : > { %v1332_v30 = vadd.f32 %v1328_v29, %v1318_v6  ;;  %v1395_v40 = vadd.f32 %v1390_v31, %v1381_v14 }
 0x23d   : > { %v1342_v34 = vpop.permute.xlu1 %1341  ;;  %v1404_v35 = vpop.permute.xlu0 %1403 }
 0x23e   : > { %v1346_v45 = vadd.f32 %v1342_v34, %v1332_v30  ;;  %v1409_v46 = vadd.f32 %v1404_v35, %v1395_v40  ;;  %v1536_v34 = vmul.f32 %v1534_v52, %v2909_v43 }
 0x240   : > { %v1354_v41 = vadd.f32 %v1352_v38, %v1346_v45 }
 0x241   : > { %v1364_v9 = vpop.permute.xlu1 %1363  ;;  %v1418_v44 = vpop.permute.xlu0 %1417 }
 0x242   : > { %v1423_v47 = vadd.f32 %v1418_v44, %v1409_v46  ;;  %v1368_v55 = vadd.f32 %v1364_v9, %v1354_v41 }
 0x245   : > { %v1378_v48 = vpop.permute.xlu1 %1377  ;;  %v1432_v49 = vpop.permute.xlu0 %1431 }
 0x246   : > { %v1437_v51 = vadd.f32 %v1432_v49, %v1423_v47  ;;  %v1382_v60 = vadd.f32 %v1378_v48, %v1368_v55 }
 0x248   : > { %v1445_v54 = vadd.f32 %v1443_v50, %v1437_v51 }
 0x249   : > { %v1392_v39 = vpop.permute.xlu1 %1391  ;;  %v1454_v33 = vpop.permute.xlu0 %1453 }
 0x24a   : > { %v1396_v18 = vadd.f32 %v1392_v39, %v1382_v60  ;;  %v1459_v63 = vadd.f32 %v1454_v33, %v1445_v54  ;;  %v2108_v60 = vmov 1966171168  }
 0x24d   : > { %v1406_v56 = vpop.permute.xlu1 %1405  ;;  %v1468_v57 = vpop.permute.xlu0 %1467 }
 0x24e   : > { %v1410_v16 = vadd.f32 %v1406_v56, %v1396_v18  ;;  %v1473_v4 = vadd.f32 %v1468_v57, %v1459_v63  ;;  %v1635_v57 = vlaneseq  ;;  %v1642_v18 = vunpack.c.l.s4 %v2108_v60 }
 0x250   : > { %vm2959_vm4 = vcmp.lt.s32.totalorder %v1635_v57, 16  ;;  %vm2968_vm5 = vcmp.ge.s32.totalorder %v1635_v57, 16  ;;  %vm2973_vm6 = vcmp.lt.s32.totalorder %v1635_v57, 32  ;;  %vm2982_vm8 = vcmp.ge.s32.totalorder %v1635_v57, 32 }
 0x251   : > { %v1420_v42 = vpop.permute.xlu1 %1419  ;;  %v1482_v62 = vpop.permute.xlu0 %1481  ;;  %vm1668_vm7 = vmand %vm2968_vm5, %vm2973_vm6  ;;  %vm2987_vm9 = vcmp.lt.s32.totalorder %v1635_v57, 48  ;;  %vm3006_vm11 = vcmp.ge.s32.totalorder %v1635_v57, 48  ;;  %vm3011_vm12 = vcmp.lt.s32.totalorder %v1635_v57, 64  ;;  %vm3016_vm13 = vcmp.ge.s32.totalorder %v1635_v57, 64 }
 0x252   : > { %v1424_v0 = vadd.f32 %v1420_v42, %v1410_v16  ;;  %v1487_v58 = vadd.f32 %v1482_v62, %v1473_v4  ;;  %v1643_v62 = vunpack.c.0.s8 %v1642_v18  ;;  %v2955_v16 = vshrl.u32 %v1635_v57, 7  ;;  %vm3139_vm10 = vmand %vm2982_vm8, %vm2987_vm9 }
 0x253   : > { %vm3021_vm14 = vcmp.lt.s32.totalorder %v1635_v57, 80  ;;  %vm3141_vm15 = vmand %vm3006_vm11, %vm3011_vm12  ;;  %vm3034_vm1 = vcmp.ge.s32.totalorder %v1635_v57, 80  ;;  %vm3039_vm2 = vcmp.lt.s32.totalorder %v1635_v57, 96 }
 0x254   : > { %v1646_v63 = vsub.s32 %v1643_v62, %v2955_v16  ;;  %vm3140_vm0 = vmand %vm3016_vm13, %vm3021_vm14  ;;  %v1822_v18 = vsub.s32 0, %v2955_v16 }
 0x255   : > { %v1434_v2 = vpop.permute.xlu1 %1433  ;;  %v1496_v3 = vpop.permute.xlu0 %1495  ;;  %vm1721_vm3 = vmand %vm3034_vm1, %vm3039_vm2 }
 0x256   : > { %v1438_v36 = vadd.f32 %v1434_v2, %v1424_v0  ;;  %v1501_v11 = vadd.f32 %v1496_v3, %v1487_v58  ;;  %vm3174_vm5 = vmand %vm2982_vm8, %vm2987_vm9 }
 0x258   : > { %v1446_v53 = vadd.f32 %v1444_v7, %v1438_v36 }
 0x259   : > { %v1456_v8 = vpop.permute.xlu1 %1455  ;;  %v1510_v10 = vpop.permute.xlu0 %1509 }
 0x25a   : > { %v1515_v13 = vadd.f32 %v1510_v10, %v1501_v11  ;;  %v1460_v61 = vadd.f32 %v1456_v8, %v1446_v53 }
 0x25d   : > { %v1470_v15 = vpop.permute.xlu1 %1469  ;;  %v1524_v37 = vpop.permute.xlu0 %1523 }
 0x25e   : > { %v1529_v17 = vadd.f32 %v1524_v37, %v1515_v13  ;;  %v1474_v24 = vadd.f32 %v1470_v15, %v1460_v61 }
 0x260   : > { %v1537_v19 = vadd.f32 %v1535_v26, %v1529_v17 }
 0x261   : > { %v1484_v20 = vpop.permute.xlu1 %1483  ;;  %v1546_v5 = vpop.permute.xlu0 %1545 }
 0x262   : > { %v1488_v12 = vadd.f32 %v1484_v20, %v1474_v24  ;;  %v1551_v25 = vadd.f32 %v1546_v5, %v1537_v19 }
 0x265   : > { %v1498_v22 = vpop.permute.xlu1 %1497  ;;  %v1560_v23 = vpop.permute.xlu0 %1559 }
 0x266   : > { %v1502_v28 = vadd.f32 %v1498_v22, %v1488_v12  ;;  %v1565_v32 = vadd.f32 %v1560_v23, %v1551_v25 }
 0x269   : > { %v1512_v1 = vpop.permute.xlu1 %1511  ;;  %v1574_v27 = vpop.permute.xlu0 %1573 }
 0x26a   : > { %v1516_v29 = vadd.f32 %v1512_v1, %v1502_v28  ;;  %v1579_v59 = vadd.f32 %v1574_v27, %v1565_v32 }
 0x26d   : > { %v1526_v31 = vpop.permute.xlu1 %1525  ;;  %v1588_v6 = vpop.permute.xlu0 %1587 }
 0x26e   : > { %v1530_v30 = vadd.f32 %v1526_v31, %v1516_v29  ;;  %v1593_v38 = vadd.f32 %v1588_v6, %v1579_v59 }
 0x270   : > { %v1538_v35 = vadd.f32 %v1536_v34, %v1530_v30 }
 0x271   : > { %v1548_v14 = vpop.permute.xlu1 %1547  ;;  %v1602_v45 = vpop.permute.xlu0 %1601 }
 0x272   : > { %v1607_v40 = vadd.f32 %v1602_v45, %v1593_v38  ;;  %v1552_v47 = vadd.f32 %v1548_v14, %v1538_v35 }
 0x275   : > { %v1562_v41 = vpop.permute.xlu1 %1561  ;;  %v1616_v9 = vpop.permute.xlu0 %1615 }
 0x276   : > { %v1621_v44 = vadd.f32 %v1616_v9, %v1607_v40  ;;  %v1566_v49 = vadd.f32 %v1562_v41, %v1552_v47  ;;  %v3160_v41 = vmov 0 }
 0x277   : > { %v3161_v41 = vsel %vm3021_vm14, 4294967295, %v3160_v41  ;;  %vm3087_vm14 = vcmp.lt.s32.totalorder %v1635_v57, 128 }
 0x278   : > { %v2007_v46 = vmul.f32 -1.442695, %v1621_v44  ;;  %vm3176_vm8 = vnez %v3161_v41 }
 0x279   : > { %v1576_v21 = vpop.permute.xlu1 %1575  ;;  %vm3177_vm9 = vmand %vm3016_vm13, %vm3176_vm8 }
 0x27a   : > { %2056 = vpow2.f32 %v2007_v46  ;;  %v1580_v51 = vadd.f32 %v1576_v21, %v1566_v49 }
 0x27d   : > { %v1590_v48 = vpop.permute.xlu1 %1589 }
 0x27e   : > { %v1594_v54 = vadd.f32 %v1590_v48, %v1580_v51 }
 0x281   : > { %v1604_v50 = vpop.permute.xlu1 %1603 }
 0x282   : > { %v1608_v43 = vadd.f32 %v1604_v50, %v1594_v54 }
 0x284   : > { %v2057_v39 = vpop.eup %2056 }
 0x285   : > { %v1629_v33 = vadd.f32 1.0, %v2057_v39  ;;  %v1618_v55 = vpop.permute.xlu1 %1617 }
 0x286   : > { %v1622_v56 = vadd.f32 %v1618_v55, %v1608_v43 }
 0x287   : > { %2058 = vrcp.f32 %v1629_v33 }
 0x288   : > { %v2008_v42 = vmul.f32 -1.442695, %v1622_v56 }
 0x28a   : > { %2060 = vpow2.f32 %v2008_v42  ;;  %v1826_v42 = vsub.s32 1, %v2955_v16 }
 0x291   : > { %v2059_v2 = vpop.eup %2058 }
 0x292   : > { %v1647_v3 = vrot.slane %v2059_v2, %v1646_v63  ;;  %1639 = vst.msk [vmem:[#allocation3] sm:$0x1] %vm2959_vm4, %v2059_v2  ;;  %v1686_v8 = vcombine.high %v2059_v2, %v2059_v2 }
 0x294   : > { %v2061_v4 = vpop.eup %2060  ;;  %v1648_v36 = vcombine.high %v1647_v3, %v1647_v3  ;;  %v1655_v53 = vrot.slane %v1647_v3, %v1646_v63  ;;  %v1693_v11 = vrot.slane %v1686_v8, %v1646_v63  ;;  %v2064_v3 = vld [vmem:[%s2169_s20] sm:$0xff] }
 0x295   : > { %v1630_v7 = vadd.f32 1.0, %v2061_v4 }
 0x296   : > { %v1662_v58 = vrot.slane %v1648_v36, %v1646_v63  ;;  %v1670_v10 = vcombine.high %v1655_v53, %v1655_v53  ;;  %v1700_v52 = vrot.slane %v1693_v11, %v1646_v63  ;;  %v1708_v17 = vcombine.high %v1693_v11, %v1693_v11 }
 0x297   : > { %2062 = vrcp.f32 %v1630_v7 }
 0x298   : > { %1663 = vrot.lane.b32.xlu0 %v1662_v58, %s2109_s15  ;;  %v1678_v15 = vcombine.high %v1662_v58, %v1662_v58  ;;  %v1715_v20 = vrot.slane %v1708_v17, %v1646_v63  ;;  %v1723_v23 = vcombine.high %v1700_v52, %v1700_v52 }
 0x29a   : > { %v1731_v1 = vcombine.high %v1715_v20, %v1715_v20 }
 0x29c   : > { %1671 = vrot.lane.b32.xlu0 %v1670_v10, %s2110_s18 }
 0x2a0   : > { %1701 = vrot.lane.b32.xlu0 %v1700_v52, %s2111_s6 }
 0x2a1   : > { %v2063_v13 = vpop.eup %2062 }
 0x2a2   : > { %v1747_v37 = vrot.slane %v2063_v13, %v1646_v63  ;;  %1739 = vst.msk [vmem:[#allocation3 + $0x1] sm:$0x1] %vm2959_vm4, %v2063_v13  ;;  %v1777_v61 = vcombine.high %v2063_v13, %v2063_v13  ;;  %vm3058_vm4 = vcmp.ge.s32.totalorder %v1635_v57, 96 }
 0x2a4   : > { %1679 = vrot.lane.b32.xlu0 %v1678_v15, %s2112_s8  ;;  %v1748_v26 = vcombine.high %v1747_v37, %v1747_v37  ;;  %v1755_v5 = vrot.slane %v1747_v37, %v1646_v63  ;;  %v1784_v24 = vrot.slane %v1777_v61, %v1646_v63 }
 0x2a6   : > { %v1762_v19 = vrot.slane %v1748_v26, %v1646_v63  ;;  %v1767_v22 = vcombine.high %v1755_v5, %v1755_v5  ;;  %v1791_v12 = vrot.slane %v1784_v24, %v1646_v63  ;;  %v1796_v28 = vcombine.high %v1784_v24, %v1784_v24 }
 0x2a8   : > { %1763 = vrot.lane.b32.xlu1 %v1762_v19, %s2109_s15  ;;  %1716 = vrot.lane.b32.xlu0 %v1715_v20, %s2113_s12  ;;  %v1772_v27 = vcombine.high %v1762_v19, %v1762_v19  ;;  %v1803_v25 = vrot.slane %v1796_v28, %v1646_v63  ;;  %v1808_v29 = vcombine.high %v1791_v12, %v1791_v12 }
 0x2aa   : > { %v1813_v31 = vcombine.high %v1803_v25, %v1803_v25 }
 0x2ac   : > { %1768 = vrot.lane.b32.xlu1 %v1767_v22, %s2110_s18  ;;  %1724 = vrot.lane.b32.xlu0 %v1723_v23, %s2114_s14 }
 0x2b0   : > { %1792 = vrot.lane.b32.xlu1 %v1791_v12, %s2111_s6  ;;  %1732 = vrot.lane.b32.xlu0 %v1731_v1, %s2115_s16 }
 0x2b4   : > { %1773 = vrot.lane.b32.xlu1 %v1772_v27, %s2112_s8 }
 0x2b8   : > { %1804 = vrot.lane.b32.xlu1 %v1803_v25, %s2113_s12 }
 0x2bc   : > { %1809 = vrot.lane.b32.xlu1 %v1808_v29, %s2114_s14 }
 0x2c0   : > { %1814 = vrot.lane.b32.xlu1 %v1813_v31, %s2115_s16 }
 0x30a   : > { %v1664_v59 = vpop.permute.xlu0 %1663 }
 0x30b   : > { %1669 = vst.msk [vmem:[#allocation3] sm:$0x1] %vm1668_vm7, %v1664_v59 }
 0x30e   : > { %v1672_v35 = vpop.permute.xlu0 %1671 }
 0x30f   : > { %1677 = vst.msk [vmem:[#allocation3] sm:$0x1] %vm3139_vm10, %v1672_v35  ;;  %vm3063_vm10 = vcmp.lt.s32.totalorder %v1635_v57, 112 }
 0x312   : > { %v1702_v38 = vpop.permute.xlu0 %1701 }
 0x316   : > { %v1680_v46 = vpop.permute.xlu0 %1679 }
 0x317   : > { %1685 = vst.msk [vmem:[#allocation3] sm:$0x1] %vm3141_vm15, %v1680_v46  ;;  %vm3082_vm15 = vcmp.ge.s32.totalorder %v1635_v57, 112 }
 0x318   : > { %1707 = vst.msk [vmem:[#allocation3] sm:$0x1] %vm3140_vm0, %v1702_v38  ;;  %vm1729_vm0 = vmand %vm3058_vm4, %vm3063_vm10 }
 0x319   : > { %vm1737_vm6 = vmand %vm3082_vm15, %vm3087_vm14 }
 0x31a   : > { %v1764_v48 = vpop.permute.xlu1 %1763  ;;  %v1717_v49 = vpop.permute.xlu0 %1716 }
 0x31b   : > { %1766 = vst.msk [vmem:[#allocation3 + $0x1] sm:$0x1] %vm1668_vm7, %v1764_v48  ;;  %vm3175_vm7 = vmand %vm3006_vm11, %vm3011_vm12 }
 0x31c   : > { %1722 = vst.msk [vmem:[#allocation3] sm:$0x1] %vm1721_vm3, %v1717_v49 }
 0x31e   : > { %v1769_v54 = vpop.permute.xlu1 %1768  ;;  %v1725_v39 = vpop.permute.xlu0 %1724 }
 0x31f   : > { %1771 = vst.msk [vmem:[#allocation3 + $0x1] sm:$0x1] %vm3174_vm5, %v1769_v54 }
 0x320   : > { %1730 = vst.msk [vmem:[#allocation3] sm:$0x1] %vm1729_vm0, %v1725_v39 }
 0x322   : > { %v1793_v43 = vpop.permute.xlu1 %1792  ;;  %v1733_v33 = vpop.permute.xlu0 %1732 }
 0x323   : > { %1738 = vst.msk [vmem:[#allocation3] sm:$0x1] %vm1737_vm6, %v1733_v33 }
 0x326   : > { %v1774_v55 = vpop.permute.xlu1 %1773 }
 0x327   : > { %1776 = vst.msk [vmem:[#allocation3 + $0x1] sm:$0x1] %vm3175_vm7, %v1774_v55 }
 0x328   : > { %1795 = vst.msk [vmem:[#allocation3 + $0x1] sm:$0x1] %vm3177_vm9, %v1793_v43 }
 0x32a   : > { %v1805_v56 = vpop.permute.xlu1 %1804 }
 0x32b   : > { %1807 = vst.msk [vmem:[#allocation3 + $0x1] sm:$0x1] %vm1721_vm3, %v1805_v56 }
 0x32e   : > { %v1810_v57 = vpop.permute.xlu1 %1809 }
 0x32f   : > { %1812 = vst.msk [vmem:[#allocation3 + $0x1] sm:$0x1] %vm1729_vm0, %v1810_v57 }
 0x332   : > { %v1815_v60 = vpop.permute.xlu1 %1814 }
 0x333   : > { %1817 = vst.msk [vmem:[#allocation3 + $0x1] sm:$0x1] %vm1737_vm6, %v1815_v60 }
 0x33a   : > { %v1818_v62 = vld [vmem:[#allocation3] sm:$0x3] }
 0x33b   : > { %v1823_v63 = vrot.slane %v1818_v62, %v1822_v18  ;;  %v1827_v0 = vrot.slane %v1818_v62, %v1826_v42 }
 0x33d   : > { %v1828_v2 = vcombine.low %v1823_v63, %v1827_v0 }
 0x33f   : > { %v1830_v4 = vmul.f32 %v2064_v3, %v1828_v2 }
 0x341   : > { %1831 = vst [vmem:[%s157_s22] sm:$0xff] %v1830_v4 }
 0x342 PF: > { %s13_s9 = sadd.s32 1, %s2090_s9  }
 0x343   : > { %p10_p1 = scmp.ge.s32.totalorder %s13_s9, 4  }
 0x345   :  { %12 = sbr.rel (!%p10_p1) target bundleno = 1 (0x1), region = 64 }
 0x34c   :  { %1853 = vsyncpa [#allocation5], 1 }
 0x34d   :  { %1855 = vsyncpa [#allocation5 + $0x1], 1 }

</bundles_post_ra>
